<compile_context>
chip_gen: v7x
topology: tpu7x:2x2x1
jax: 0.10.0
libtpu: 0.0.40
codegen_flags: <defaults>
</compile_context>

<pallas_src>
import jax
import jax.numpy as jnp
from jax.experimental import pallas as pl
from jax.experimental.pallas import tpu as pltpu

LATENT_DIM = 100
EMB_DIM = 10
NUM_CLASSES = 10
IMG_PIXELS = 28 * 28            # 784 (logical output features)
IMG_PIXELS_PAD = 896            # 7 * 128, lane-dense output
IN_FEATURES = LATENT_DIM + EMB_DIM   # 110 (logical input features)
IN_FEATURES_PAD = 128           # lane-dense K for the first matmul
LAYER_DIMS = [IN_FEATURES, 128, 256, 512, 1024, IMG_PIXELS]
PAD_LAYER_DIMS = [IN_FEATURES_PAD, 128, 256, 512, 1024, IMG_PIXELS_PAD]
BN_EPS = 1e-5
LEAKY_SLOPE = 0.2


def _generator_mlp_kernel(
    x_ref,
    w1_ref, b1_ref, g1_ref, be1_ref,
    w2_ref, b2_ref, g2_ref, be2_ref,
    w3_ref, b3_ref, g3_ref, be3_ref,
    w4_ref, b4_ref, g4_ref, be4_ref,
    w5_ref, b5_ref,
    out_ref,
):
    """Full Generator MLP hot path, executed on a single grid point."""

    def linear(h, w_ref, b_ref):
        # bf16 x bf16 on the MXU, f32 accumulation; bias add in f32.
        return jnp.dot(h.astype(jnp.bfloat16), w_ref[...],
                       preferred_element_type=jnp.float32) + b_ref[...]

    def bn_leaky(h, g_ref, be_ref):
        # BatchNorm1d (training mode): batch statistics, biased variance,
        # fused affine:  out = (h - mean) * (gamma * rsqrt(var + eps)) + beta
        mean = jnp.mean(h, axis=0, keepdims=True)
        d = h - mean
        var = jnp.mean(d * d, axis=0, keepdims=True)
        scale = g_ref[...] * jax.lax.rsqrt(var + BN_EPS)   # EUP rsqrt (free slot)
        hn = d * scale + be_ref[...]
        # LeakyReLU(0.2)
        return jnp.where(hn > 0, hn, LEAKY_SLOPE * hn)

    h = x_ref[...]
    h = bn_leaky(linear(h, w1_ref, b1_ref), g1_ref, be1_ref)
    h = bn_leaky(linear(h, w2_ref, b2_ref), g2_ref, be2_ref)
    h = bn_leaky(linear(h, w3_ref, b3_ref), g3_ref, be3_ref)
    h = bn_leaky(linear(h, w4_ref, b4_ref), g4_ref, be4_ref)
    out_ref[...] = jnp.tanh(linear(h, w5_ref, b5_ref))


def init_generator_params(key):
    """Deterministic synthetic f32 parameters with the PyTorch module's shapes."""
    params = {}
    key, ek = jax.random.split(key)
    # nn.Embedding(10, 10)
    params["emb"] = jax.random.normal(ek, (NUM_CLASSES, EMB_DIM), jnp.float32)

    # 5 Linear layers; layers 1-4 also carry BatchNorm1d affine params.
    for i in range(5):
        fan_in, fan_out = LAYER_DIMS[i], LAYER_DIMS[i + 1]
        key, wk, bk = jax.random.split(key, 3)
        bound = 1.0 / jnp.sqrt(fan_in)
        # stored as (in, out) -- transpose of PyTorch's (out, in)
        params[f"w{i+1}"] = jax.random.uniform(
            wk, (fan_in, fan_out), jnp.float32, -bound, bound)
        params[f"b{i+1}"] = jax.random.uniform(
            bk, (1, fan_out), jnp.float32, -bound, bound)
        if i < 4:
            # BatchNorm1d affine: gamma=1, beta=0 (PyTorch default init)
            params[f"g{i+1}"] = jnp.ones((1, fan_out), jnp.float32)
            params[f"be{i+1}"] = jnp.zeros((1, fan_out), jnp.float32)
    return params


def prepare_generator_params(params):
    """One-time prep: bf16 weights + zero-pad the ragged 110/784 feature dims."""
    p = dict(params)
    # First layer: pad input rows 110 -> 128 (matches zero-padded x).
    w1 = jnp.pad(params["w1"], ((0, IN_FEATURES_PAD - IN_FEATURES), (0, 0)))
    p["w1"] = w1.astype(jnp.bfloat16)
    for i in range(2, 5):
        p[f"w{i}"] = params[f"w{i}"].astype(jnp.bfloat16)
    # Last layer: pad output columns 784 -> 896 for a lane-dense store.
    w5 = jnp.pad(params["w5"], ((0, 0), (0, IMG_PIXELS_PAD - IMG_PIXELS)))
    p["w5"] = w5.astype(jnp.bfloat16)
    p["b5"] = jnp.pad(params["b5"], ((0, 0), (0, IMG_PIXELS_PAD - IMG_PIXELS)))
    # Biases / BN affine params stay f32 (used on the VPU path).
    return p


@jax.jit
def generator_forward(prepared, noise, labels):
    """noise: (B, 100) f32, labels: (B,) int32 -> images (B, 28, 28) f32."""
    B = noise.shape[0]
    # Embedding lookup + concat + pad are cheap glue; done in plain JAX.
    labels_embs = jnp.take(prepared["emb"], labels, axis=0)        # (B, 10)
    x = jnp.concatenate([noise, labels_embs], axis=1)              # (B, 110)
    x = jnp.pad(x, ((0, 0), (0, IN_FEATURES_PAD - IN_FEATURES)))   # (B, 128)

    kernel_args = [x]
    for i in range(1, 5):
        kernel_args += [prepared[f"w{i}"], prepared[f"b{i}"],
                        prepared[f"g{i}"], prepared[f"be{i}"]]
    kernel_args += [prepared["w5"], prepared["b5"]]

    # Advisory cost estimate for XLA's scheduler.
    flops = 2 * B * sum(PAD_LAYER_DIMS[i] * PAD_LAYER_DIMS[i + 1]
                        for i in range(5))
    transcendentals = B * IMG_PIXELS_PAD + sum(PAD_LAYER_DIMS[1:5])
    bytes_accessed = int(
        sum(a.size * a.dtype.itemsize for a in kernel_args)
        + B * IMG_PIXELS_PAD * 4)

    vmem_spec = pl.BlockSpec(memory_space=pltpu.MemorySpace.VMEM)
    out_flat = pl.pallas_call(
        _generator_mlp_kernel,
        out_shape=jax.ShapeDtypeStruct((B, IMG_PIXELS_PAD), jnp.float32),
        in_specs=[vmem_spec] * len(kernel_args),
        out_specs=vmem_spec,
        compiler_params=pltpu.CompilerParams(vmem_limit_bytes=32 << 20),
        cost_estimate=pl.CostEstimate(flops=flops,
                                      transcendentals=transcendentals,
                                      bytes_accessed=bytes_accessed),
    )(*kernel_args)

    return out_flat[:, :IMG_PIXELS].reshape(B, 28, 28)


def _reference_forward_prepared(prepared, noise, labels):
    """Pure-JAX mirror of the exact kernel math (bf16 weights, f32 accumulate)."""
    labels_embs = jnp.take(prepared["emb"], labels, axis=0)
    h = jnp.concatenate([noise, labels_embs], axis=1)
    h = jnp.pad(h, ((0, 0), (0, IN_FEATURES_PAD - IN_FEATURES)))
    for i in range(1, 5):
        h = jnp.dot(h.astype(jnp.bfloat16), prepared[f"w{i}"],
                    preferred_element_type=jnp.float32) + prepared[f"b{i}"]
        mean = jnp.mean(h, axis=0, keepdims=True)
        d = h - mean
        var = jnp.mean(d * d, axis=0, keepdims=True)
        h = d * (prepared[f"g{i}"] * jax.lax.rsqrt(var + BN_EPS)) + prepared[f"be{i}"]
        h = jnp.where(h > 0, h, LEAKY_SLOPE * h)
    h = jnp.tanh(jnp.dot(h.astype(jnp.bfloat16), prepared["w5"],
                         preferred_element_type=jnp.float32) + prepared["b5"])
    return h[:, :IMG_PIXELS].reshape(noise.shape[0], 28, 28)


def _reference_forward_f32(params, noise, labels):
    """Full-f32 reference matching the original PyTorch module semantics."""
    labels_embs = jnp.take(params["emb"], labels, axis=0)
    h = jnp.concatenate([noise, labels_embs], axis=1)
    for i in range(1, 5):
        h = h @ params[f"w{i}"] + params[f"b{i}"]
        mean = jnp.mean(h, axis=0, keepdims=True)
        var = jnp.mean((h - mean) ** 2, axis=0, keepdims=True)
        h = (h - mean) / jnp.sqrt(var + BN_EPS)
        h = h * params[f"g{i}"] + params[f"be{i}"]
        h = jnp.where(h > 0, h, LEAKY_SLOPE * h)
    h = jnp.tanh(h @ params["w5"] + params["b5"])
    return h.reshape(noise.shape[0], 28, 28)


if __name__ == "__main__":
    key = jax.random.PRNGKey(0)
    pkey, nkey, lkey = jax.random.split(key, 3)

    B = 8   # training-mode BN needs B >= 2 (PyTorch errors at B=1)
    params = init_generator_params(pkey)
    prepared = prepare_generator_params(params)
    noise = jax.random.normal(nkey, (B, LATENT_DIM), jnp.float32)
    labels = jax.random.randint(lkey, (B,), 0, NUM_CLASSES, jnp.int32)

    out = generator_forward(prepared, noise, labels)
    out = jax.block_until_ready(out)
    assert out.shape == (B, 28, 28), out.shape
    assert bool(jnp.all(jnp.isfinite(out))), "non-finite values in output"

    # Tight check against a pure-JAX mirror of the same (bf16-weight) math.
    ref_bf16 = _reference_forward_prepared(prepared, noise, labels)
    err_tight = float(jnp.max(jnp.abs(out - ref_bf16)))
    assert err_tight < 5e-3, f"mismatch vs bf16 reference: {err_tight}"

    # Loose sanity check against the full-f32 (PyTorch-semantics) reference;
    # generous bound, only guards against gross semantic errors.
    ref_f32 = _reference_forward_f32(params, noise, labels)
    err_loose = float(jnp.max(jnp.abs(out - ref_f32)))
    assert err_loose < 0.25, f"bf16 drift vs f32 reference too large: {err_loose}"

    print("KERNEL_OK")
</pallas_src>

<mosaic_0001>
module attributes {stable_mosaic.version = 11 : i64} {
  func.func @_generator_mlp_kernel(%arg0: memref<8x128xf32, #tpu.memory_space<vmem>>, %arg1: memref<128x128xbf16, #tpu.memory_space<vmem>>, %arg2: memref<1x128xf32, #tpu.memory_space<vmem>>, %arg3: memref<1x128xf32, #tpu.memory_space<vmem>>, %arg4: memref<1x128xf32, #tpu.memory_space<vmem>>, %arg5: memref<128x256xbf16, #tpu.memory_space<vmem>>, %arg6: memref<1x256xf32, #tpu.memory_space<vmem>>, %arg7: memref<1x256xf32, #tpu.memory_space<vmem>>, %arg8: memref<1x256xf32, #tpu.memory_space<vmem>>, %arg9: memref<256x512xbf16, #tpu.memory_space<vmem>>, %arg10: memref<1x512xf32, #tpu.memory_space<vmem>>, %arg11: memref<1x512xf32, #tpu.memory_space<vmem>>, %arg12: memref<1x512xf32, #tpu.memory_space<vmem>>, %arg13: memref<512x1024xbf16, #tpu.memory_space<vmem>>, %arg14: memref<1x1024xf32, #tpu.memory_space<vmem>>, %arg15: memref<1x1024xf32, #tpu.memory_space<vmem>>, %arg16: memref<1x1024xf32, #tpu.memory_space<vmem>>, %arg17: memref<1024x896xbf16, #tpu.memory_space<vmem>>, %arg18: memref<1x896xf32, #tpu.memory_space<vmem>>, %arg19: memref<8x896xf32, #tpu.memory_space<vmem>>) attributes {dimension_semantics = [], scalar_prefetch = 0 : i64, scratch_operands = 0 : i64, tpu.core_type = #tpu.core_type<tc>} {
    %c0 = arith.constant 0 : index
    %c0_0 = arith.constant 0 : index
    %0 = vector.load %arg0[%c0, %c0_0] : memref<8x128xf32, #tpu.memory_space<vmem>>, vector<8x128xf32>
    %1 = arith.truncf %0 : vector<8x128xf32> to vector<8x128xbf16>
    %c0_1 = arith.constant 0 : index
    %c0_2 = arith.constant 0 : index
    %2 = vector.load %arg1[%c0_1, %c0_2] : memref<128x128xbf16, #tpu.memory_space<vmem>>, vector<128x128xbf16>
    %cst = arith.constant dense<0.000000e+00> : vector<8x128xf32>
    %3 = tpu.matmul %1, %2, %cst {dimension_numbers = #tpu.dot_dimension_numbers<[1], [0], [0], [1], [0, 0, 1, 1], [], []>} : vector<8x128xbf16>, vector<128x128xbf16>, vector<8x128xf32> -> vector<8x128xf32>
    %c0_3 = arith.constant 0 : index
    %c0_4 = arith.constant 0 : index
    %4 = vector.load %arg2[%c0_3, %c0_4] : memref<1x128xf32, #tpu.memory_space<vmem>>, vector<1x128xf32>
    %5 = vector.broadcast %4 : vector<1x128xf32> to vector<8x128xf32>
    %6 = arith.addf %3, %5 : vector<8x128xf32>
    %cst_5 = arith.constant dense<0.000000e+00> : vector<128xf32>
    %7 = vector.multi_reduction <add>, %6, %cst_5 [0] : vector<8x128xf32> to vector<128xf32>
    %8 = vector.shape_cast %7 : vector<128xf32> to vector<1x128xf32>
    %cst_6 = arith.constant 8.000000e+00 : f32
    %9 = vector.broadcast %cst_6 : f32 to vector<1x128xf32>
    %10 = arith.divf %8, %9 : vector<1x128xf32>
    %11 = vector.broadcast %10 : vector<1x128xf32> to vector<8x128xf32>
    %12 = arith.subf %6, %11 : vector<8x128xf32>
    %13 = arith.mulf %12, %12 : vector<8x128xf32>
    %cst_7 = arith.constant dense<0.000000e+00> : vector<128xf32>
    %14 = vector.multi_reduction <add>, %13, %cst_7 [0] : vector<8x128xf32> to vector<128xf32>
    %15 = vector.shape_cast %14 : vector<128xf32> to vector<1x128xf32>
    %cst_8 = arith.constant 8.000000e+00 : f32
    %16 = vector.broadcast %cst_8 : f32 to vector<1x128xf32>
    %17 = arith.divf %15, %16 : vector<1x128xf32>
    %c0_9 = arith.constant 0 : index
    %c0_10 = arith.constant 0 : index
    %18 = vector.load %arg3[%c0_9, %c0_10] : memref<1x128xf32, #tpu.memory_space<vmem>>, vector<1x128xf32>
    %cst_11 = arith.constant 9.99999974E-6 : f32
    %19 = vector.broadcast %cst_11 : f32 to vector<1x128xf32>
    %20 = arith.addf %17, %19 : vector<1x128xf32>
    %21 = math.rsqrt %20 : vector<1x128xf32>
    %22 = arith.mulf %18, %21 : vector<1x128xf32>
    %23 = vector.broadcast %22 : vector<1x128xf32> to vector<8x128xf32>
    %24 = arith.mulf %12, %23 : vector<8x128xf32>
    %c0_12 = arith.constant 0 : index
    %c0_13 = arith.constant 0 : index
    %25 = vector.load %arg4[%c0_12, %c0_13] : memref<1x128xf32, #tpu.memory_space<vmem>>, vector<1x128xf32>
    %26 = vector.broadcast %25 : vector<1x128xf32> to vector<8x128xf32>
    %27 = arith.addf %24, %26 : vector<8x128xf32>
    %cst_14 = arith.constant 0.000000e+00 : f32
    %28 = vector.broadcast %cst_14 : f32 to vector<8x128xf32>
    %29 = arith.cmpf ogt, %27, %28 : vector<8x128xf32>
    %cst_15 = arith.constant 2.000000e-01 : f32
    %30 = vector.broadcast %cst_15 : f32 to vector<8x128xf32>
    %31 = arith.mulf %30, %27 : vector<8x128xf32>
    %32 = arith.select %29, %27, %31 : vector<8x128xi1>, vector<8x128xf32>
    %33 = arith.truncf %32 : vector<8x128xf32> to vector<8x128xbf16>
    %c0_16 = arith.constant 0 : index
    %c0_17 = arith.constant 0 : index
    %34 = vector.load %arg5[%c0_16, %c0_17] : memref<128x256xbf16, #tpu.memory_space<vmem>>, vector<128x256xbf16>
    %cst_18 = arith.constant dense<0.000000e+00> : vector<8x256xf32>
    %35 = tpu.matmul %33, %34, %cst_18 {dimension_numbers = #tpu.dot_dimension_numbers<[1], [0], [0], [1], [0, 0, 1, 1], [], []>} : vector<8x128xbf16>, vector<128x256xbf16>, vector<8x256xf32> -> vector<8x256xf32>
    %c0_19 = arith.constant 0 : index
    %c0_20 = arith.constant 0 : index
    %36 = vector.load %arg6[%c0_19, %c0_20] : memref<1x256xf32, #tpu.memory_space<vmem>>, vector<1x256xf32>
    %37 = vector.broadcast %36 : vector<1x256xf32> to vector<8x256xf32>
    %38 = arith.addf %35, %37 : vector<8x256xf32>
    %cst_21 = arith.constant dense<0.000000e+00> : vector<256xf32>
    %39 = vector.multi_reduction <add>, %38, %cst_21 [0] : vector<8x256xf32> to vector<256xf32>
    %40 = vector.shape_cast %39 : vector<256xf32> to vector<1x256xf32>
    %cst_22 = arith.constant 8.000000e+00 : f32
    %41 = vector.broadcast %cst_22 : f32 to vector<1x256xf32>
    %42 = arith.divf %40, %41 : vector<1x256xf32>
    %43 = vector.broadcast %42 : vector<1x256xf32> to vector<8x256xf32>
    %44 = arith.subf %38, %43 : vector<8x256xf32>
    %45 = arith.mulf %44, %44 : vector<8x256xf32>
    %cst_23 = arith.constant dense<0.000000e+00> : vector<256xf32>
    %46 = vector.multi_reduction <add>, %45, %cst_23 [0] : vector<8x256xf32> to vector<256xf32>
    %47 = vector.shape_cast %46 : vector<256xf32> to vector<1x256xf32>
    %cst_24 = arith.constant 8.000000e+00 : f32
    %48 = vector.broadcast %cst_24 : f32 to vector<1x256xf32>
    %49 = arith.divf %47, %48 : vector<1x256xf32>
    %c0_25 = arith.constant 0 : index
    %c0_26 = arith.constant 0 : index
    %50 = vector.load %arg7[%c0_25, %c0_26] : memref<1x256xf32, #tpu.memory_space<vmem>>, vector<1x256xf32>
    %cst_27 = arith.constant 9.99999974E-6 : f32
    %51 = vector.broadcast %cst_27 : f32 to vector<1x256xf32>
    %52 = arith.addf %49, %51 : vector<1x256xf32>
    %53 = math.rsqrt %52 : vector<1x256xf32>
    %54 = arith.mulf %50, %53 : vector<1x256xf32>
    %55 = vector.broadcast %54 : vector<1x256xf32> to vector<8x256xf32>
    %56 = arith.mulf %44, %55 : vector<8x256xf32>
    %c0_28 = arith.constant 0 : index
    %c0_29 = arith.constant 0 : index
    %57 = vector.load %arg8[%c0_28, %c0_29] : memref<1x256xf32, #tpu.memory_space<vmem>>, vector<1x256xf32>
    %58 = vector.broadcast %57 : vector<1x256xf32> to vector<8x256xf32>
    %59 = arith.addf %56, %58 : vector<8x256xf32>
    %cst_30 = arith.constant 0.000000e+00 : f32
    %60 = vector.broadcast %cst_30 : f32 to vector<8x256xf32>
    %61 = arith.cmpf ogt, %59, %60 : vector<8x256xf32>
    %cst_31 = arith.constant 2.000000e-01 : f32
    %62 = vector.broadcast %cst_31 : f32 to vector<8x256xf32>
    %63 = arith.mulf %62, %59 : vector<8x256xf32>
    %64 = arith.select %61, %59, %63 : vector<8x256xi1>, vector<8x256xf32>
    %65 = arith.truncf %64 : vector<8x256xf32> to vector<8x256xbf16>
    %c0_32 = arith.constant 0 : index
    %c0_33 = arith.constant 0 : index
    %66 = vector.load %arg9[%c0_32, %c0_33] : memref<256x512xbf16, #tpu.memory_space<vmem>>, vector<256x512xbf16>
    %cst_34 = arith.constant dense<0.000000e+00> : vector<8x512xf32>
    %67 = tpu.matmul %65, %66, %cst_34 {dimension_numbers = #tpu.dot_dimension_numbers<[1], [0], [0], [1], [0, 0, 1, 1], [], []>} : vector<8x256xbf16>, vector<256x512xbf16>, vector<8x512xf32> -> vector<8x512xf32>
    %c0_35 = arith.constant 0 : index
    %c0_36 = arith.constant 0 : index
    %68 = vector.load %arg10[%c0_35, %c0_36] : memref<1x512xf32, #tpu.memory_space<vmem>>, vector<1x512xf32>
    %69 = vector.broadcast %68 : vector<1x512xf32> to vector<8x512xf32>
    %70 = arith.addf %67, %69 : vector<8x512xf32>
    %cst_37 = arith.constant dense<0.000000e+00> : vector<512xf32>
    %71 = vector.multi_reduction <add>, %70, %cst_37 [0] : vector<8x512xf32> to vector<512xf32>
    %72 = vector.shape_cast %71 : vector<512xf32> to vector<1x512xf32>
    %cst_38 = arith.constant 8.000000e+00 : f32
    %73 = vector.broadcast %cst_38 : f32 to vector<1x512xf32>
    %74 = arith.divf %72, %73 : vector<1x512xf32>
    %75 = vector.broadcast %74 : vector<1x512xf32> to vector<8x512xf32>
    %76 = arith.subf %70, %75 : vector<8x512xf32>
    %77 = arith.mulf %76, %76 : vector<8x512xf32>
    %cst_39 = arith.constant dense<0.000000e+00> : vector<512xf32>
    %78 = vector.multi_reduction <add>, %77, %cst_39 [0] : vector<8x512xf32> to vector<512xf32>
    %79 = vector.shape_cast %78 : vector<512xf32> to vector<1x512xf32>
    %cst_40 = arith.constant 8.000000e+00 : f32
    %80 = vector.broadcast %cst_40 : f32 to vector<1x512xf32>
    %81 = arith.divf %79, %80 : vector<1x512xf32>
    %c0_41 = arith.constant 0 : index
    %c0_42 = arith.constant 0 : index
    %82 = vector.load %arg11[%c0_41, %c0_42] : memref<1x512xf32, #tpu.memory_space<vmem>>, vector<1x512xf32>
    %cst_43 = arith.constant 9.99999974E-6 : f32
    %83 = vector.broadcast %cst_43 : f32 to vector<1x512xf32>
    %84 = arith.addf %81, %83 : vector<1x512xf32>
    %85 = math.rsqrt %84 : vector<1x512xf32>
    %86 = arith.mulf %82, %85 : vector<1x512xf32>
    %87 = vector.broadcast %86 : vector<1x512xf32> to vector<8x512xf32>
    %88 = arith.mulf %76, %87 : vector<8x512xf32>
    %c0_44 = arith.constant 0 : index
    %c0_45 = arith.constant 0 : index
    %89 = vector.load %arg12[%c0_44, %c0_45] : memref<1x512xf32, #tpu.memory_space<vmem>>, vector<1x512xf32>
    %90 = vector.broadcast %89 : vector<1x512xf32> to vector<8x512xf32>
    %91 = arith.addf %88, %90 : vector<8x512xf32>
    %cst_46 = arith.constant 0.000000e+00 : f32
    %92 = vector.broadcast %cst_46 : f32 to vector<8x512xf32>
    %93 = arith.cmpf ogt, %91, %92 : vector<8x512xf32>
    %cst_47 = arith.constant 2.000000e-01 : f32
    %94 = vector.broadcast %cst_47 : f32 to vector<8x512xf32>
    %95 = arith.mulf %94, %91 : vector<8x512xf32>
    %96 = arith.select %93, %91, %95 : vector<8x512xi1>, vector<8x512xf32>
    %97 = arith.truncf %96 : vector<8x512xf32> to vector<8x512xbf16>
    %c0_48 = arith.constant 0 : index
    %c0_49 = arith.constant 0 : index
    %98 = vector.load %arg13[%c0_48, %c0_49] : memref<512x1024xbf16, #tpu.memory_space<vmem>>, vector<512x1024xbf16>
    %cst_50 = arith.constant dense<0.000000e+00> : vector<8x1024xf32>
    %99 = tpu.matmul %97, %98, %cst_50 {dimension_numbers = #tpu.dot_dimension_numbers<[1], [0], [0], [1], [0, 0, 1, 1], [], []>} : vector<8x512xbf16>, vector<512x1024xbf16>, vector<8x1024xf32> -> vector<8x1024xf32>
    %c0_51 = arith.constant 0 : index
    %c0_52 = arith.constant 0 : index
    %100 = vector.load %arg14[%c0_51, %c0_52] : memref<1x1024xf32, #tpu.memory_space<vmem>>, vector<1x1024xf32>
    %101 = vector.broadcast %100 : vector<1x1024xf32> to vector<8x1024xf32>
    %102 = arith.addf %99, %101 : vector<8x1024xf32>
    %cst_53 = arith.constant dense<0.000000e+00> : vector<1024xf32>
    %103 = vector.multi_reduction <add>, %102, %cst_53 [0] : vector<8x1024xf32> to vector<1024xf32>
    %104 = vector.shape_cast %103 : vector<1024xf32> to vector<1x1024xf32>
    %cst_54 = arith.constant 8.000000e+00 : f32
    %105 = vector.broadcast %cst_54 : f32 to vector<1x1024xf32>
    %106 = arith.divf %104, %105 : vector<1x1024xf32>
    %107 = vector.broadcast %106 : vector<1x1024xf32> to vector<8x1024xf32>
    %108 = arith.subf %102, %107 : vector<8x1024xf32>
    %109 = arith.mulf %108, %108 : vector<8x1024xf32>
    %cst_55 = arith.constant dense<0.000000e+00> : vector<1024xf32>
    %110 = vector.multi_reduction <add>, %109, %cst_55 [0] : vector<8x1024xf32> to vector<1024xf32>
    %111 = vector.shape_cast %110 : vector<1024xf32> to vector<1x1024xf32>
    %cst_56 = arith.constant 8.000000e+00 : f32
    %112 = vector.broadcast %cst_56 : f32 to vector<1x1024xf32>
    %113 = arith.divf %111, %112 : vector<1x1024xf32>
    %c0_57 = arith.constant 0 : index
    %c0_58 = arith.constant 0 : index
    %114 = vector.load %arg15[%c0_57, %c0_58] : memref<1x1024xf32, #tpu.memory_space<vmem>>, vector<1x1024xf32>
    %cst_59 = arith.constant 9.99999974E-6 : f32
    %115 = vector.broadcast %cst_59 : f32 to vector<1x1024xf32>
    %116 = arith.addf %113, %115 : vector<1x1024xf32>
    %117 = math.rsqrt %116 : vector<1x1024xf32>
    %118 = arith.mulf %114, %117 : vector<1x1024xf32>
    %119 = vector.broadcast %118 : vector<1x1024xf32> to vector<8x1024xf32>
    %120 = arith.mulf %108, %119 : vector<8x1024xf32>
    %c0_60 = arith.constant 0 : index
    %c0_61 = arith.constant 0 : index
    %121 = vector.load %arg16[%c0_60, %c0_61] : memref<1x1024xf32, #tpu.memory_space<vmem>>, vector<1x1024xf32>
    %122 = vector.broadcast %121 : vector<1x1024xf32> to vector<8x1024xf32>
    %123 = arith.addf %120, %122 : vector<8x1024xf32>
    %cst_62 = arith.constant 0.000000e+00 : f32
    %124 = vector.broadcast %cst_62 : f32 to vector<8x1024xf32>
    %125 = arith.cmpf ogt, %123, %124 : vector<8x1024xf32>
    %cst_63 = arith.constant 2.000000e-01 : f32
    %126 = vector.broadcast %cst_63 : f32 to vector<8x1024xf32>
    %127 = arith.mulf %126, %123 : vector<8x1024xf32>
    %128 = arith.select %125, %123, %127 : vector<8x1024xi1>, vector<8x1024xf32>
    %129 = arith.truncf %128 : vector<8x1024xf32> to vector<8x1024xbf16>
    %c0_64 = arith.constant 0 : index
    %c0_65 = arith.constant 0 : index
    %130 = vector.load %arg17[%c0_64, %c0_65] : memref<1024x896xbf16, #tpu.memory_space<vmem>>, vector<1024x896xbf16>
    %cst_66 = arith.constant dense<0.000000e+00> : vector<8x896xf32>
    %131 = tpu.matmul %129, %130, %cst_66 {dimension_numbers = #tpu.dot_dimension_numbers<[1], [0], [0], [1], [0, 0, 1, 1], [], []>} : vector<8x1024xbf16>, vector<1024x896xbf16>, vector<8x896xf32> -> vector<8x896xf32>
    %c0_67 = arith.constant 0 : index
    %c0_68 = arith.constant 0 : index
    %132 = vector.load %arg18[%c0_67, %c0_68] : memref<1x896xf32, #tpu.memory_space<vmem>>, vector<1x896xf32>
    %133 = vector.broadcast %132 : vector<1x896xf32> to vector<8x896xf32>
    %134 = arith.addf %131, %133 : vector<8x896xf32>
    %135 = math.tanh %134 : vector<8x896xf32>
    %c0_69 = arith.constant 0 : index
    %c0_70 = arith.constant 0 : index
    %136 = vector.load %arg19[%c0_69, %c0_70] : memref<8x896xf32, #tpu.memory_space<vmem>>, vector<8x896xf32>
    tpu.vector_store %arg19[%c0_69, %c0_70], %135 {strides = array<i32>} : memref<8x896xf32, #tpu.memory_space<vmem>>, vector<8x896xf32>,
    return
  }
}

</mosaic_0001>

<bundles_post_ra>
// kernel: generator_forward.1
= control target key start
LH: loop header
LB: loop body
LE: loop exit
PB: predicated region body
PF: predicated region fallthrough
CT: control target
= control target key end

     0   :  { %s10017_s0 = inlined_call_operand.vmem [shape: f32[8,128], index: 0, kind: input, shape index: {}]   ;;  %s10018_s1 = inlined_call_operand.hbm [shape: bf16[128,128], index: 1, kind: input, shape index: {}]   ;;  %s10019_s2 = inlined_call_operand.hbm [shape: f32[1,128], index: 2, kind: input, shape index: {}]   ;;  %s10020_s3 = inlined_call_operand.hbm [shape: f32[1,128], index: 3, kind: input, shape index: {}]   ;;  %s10021_s4 = inlined_call_operand.hbm [shape: f32[1,128], index: 4, kind: input, shape index: {}]   ;;  %s10022_s5 = inlined_call_operand.hbm [shape: bf16[128,256], index: 5, kind: input, shape index: {}]   ;;  %s10023_s6 = inlined_call_operand.hbm [shape: f32[1,256], index: 6, kind: input, shape index: {}]   ;;  %s10024_s7 = inlined_call_operand.hbm [shape: f32[1,256], index: 7, kind: input, shape index: {}]   ;;  %s10025_s8 = inlined_call_operand.hbm [shape: f32[1,256], index: 8, kind: input, shape index: {}]   ;;  %s10026_s9 = inlined_call_operand.hbm [shape: bf16[256,512], index: 9, kind: input, shape index: {}]   ;;  %s10027_s10 = inlined_call_operand.hbm [shape: f32[1,512], index: 10, kind: input, shape index: {}]   ;;  %s10028_s11 = inlined_call_operand.hbm [shape: f32[1,512], index: 11, kind: input, shape index: {}]   ;;  %s10029_s12 = inlined_call_operand.hbm [shape: f32[1,512], index: 12, kind: input, shape index: {}]   ;;  %s10030_s13 = inlined_call_operand.hbm [shape: bf16[512,1024], index: 13, kind: input, shape index: {}]   ;;  %s10031_s14 = inlined_call_operand.hbm [shape: f32[1,1024], index: 14, kind: input, shape index: {}]   ;;  %s10032_s15 = inlined_call_operand.hbm [shape: f32[1,1024], index: 15, kind: input, shape index: {}]   ;;  %s10033_s16 = inlined_call_operand.hbm [shape: f32[1,1024], index: 16, kind: input, shape index: {}]   ;;  %s10034_s17 = inlined_call_operand.hbm [shape: bf16[1024,896], index: 17, kind: input, shape index: {}]   ;;  %s10035_s18 = inlined_call_operand.hbm [shape: f32[1,896], index: 18, kind: input, shape index: {}]   ;;  %s10036_s19 = inlined_call_operand.vmem [shape: f32[8,896], index: 19, kind: output, shape index: {}]  }
   0x1   :  { %10040 = sst [smem:[#allocation40_spill]] %s10017_s0 }
   0x2   :  { %10041 = sst [smem:[#allocation41_spill]] %s10018_s1 }
   0x3   :  { %10042 = sst [smem:[#allocation42_spill]] %s10019_s2 }
   0x4   :  { %10043 = sst [smem:[#allocation43_spill]] %s10020_s3 }
   0x5   :  { %24 = vsyncpa [#allocation3], 0 }
   0x6   :  { %25 = vsyncpa [#allocation5], 0 }
   0x7   :  { %26 = vsyncpa [#allocation8], 0 }
   0x8   :  { %27 = vsyncpa [#allocation11], 0 }
   0x9   :  { %28 = vsyncpa [#allocation14], 0 }
   0xa   :  { %29 = vsyncpa [#allocation17], 0 }
   0xb   :  { %30 = vsyncpa [#allocation20], 0 }
   0xc   :  { %31 = vsyncpa [#allocation23], 0 }
   0xd   :  { %32 = vsyncpa [#allocation26], 0 }
   0xe   :  { %33 = vsyncpa [#allocation29], 0  ;;  %s9343_s0 = smov [#allocation4]   ;;  %s9344_s20 = smov [#allocation7]  }
   0xf   :  { %s54_s30 = sshll.u32 %s9343_s0, 4  ;;  %s74_s21 = sshll.u32 %s9344_s20, 4  ;;  %s55_s30 = int_to_ptr.vmem [resolvable:$true] %s54_s30  ;;  %s75_s21 = int_to_ptr.vmem [resolvable:$true] %s74_s21 }
  0x10   :  { %s10044_s2 = sld [smem:[#allocation42_spill]] }
  0x16   :  { %s8927_s23 = scalar_lea.hbm %s10044_s2, 16 }
  0x17   :  { %p8928_p0 = scmp.ne.s32.totalorder %s10044_s2, %s8927_s23  ;;  %p8931_p1 = scmp.lt.u32.totalorder %s8927_s23, %s10044_s2 }
  0x19   :  { %p8933_p2 = pnand %p8931_p1, %p8928_p0 }
  0x1b   :  { %8936 = shalt.err (!%p8933_p2)
}
  0x1c   :  { %s8937_s27 = scalar_lea.vmem %s55_s30, 16  ;;  %s8941_s28 = scalar_lea.vmem %s55_s30, 32 }
  0x1d   :  { %p8938_p3 = scmp.ne.s32.totalorder %s55_s30, %s8937_s27  ;;  %p8942_p4 = scmp.lt.s32.totalorder %s55_s30, %s55_s30 }
  0x1e   :  { %p8943_p5 = scmp.lt.s32.totalorder %s8941_s28, %s8937_s27 }
  0x20   :  { %p8944_p6 = por %p8943_p5, %p8942_p4 }
  0x22   :  { %p8945_p7 = pnand %p8944_p6, %p8938_p3 }
  0x24   :  { %8948 = shalt.err (!%p8945_p7)
}
  0x25   :  { %57 = dma.hbm_to_vmem [thread:$0]  %s10044_s2, 16, %s55_s30, [#allocation5]  }
  0x26   :  { %s8949_s22 = scalar_lea.hbm %s10021_s4, 16 }
  0x27   :  { %p8950_p8 = scmp.ne.s32.totalorder %s10021_s4, %s8949_s22  ;;  %p8953_p9 = scmp.lt.u32.totalorder %s8949_s22, %s10021_s4 }
  0x29   :  { %p8955_p10 = pnand %p8953_p9, %p8950_p8 }
  0x2b   :  { %8958 = shalt.err (!%p8955_p10)
}
  0x2c   :  { %s8959_s26 = scalar_lea.vmem %s75_s21, 16  ;;  %s8963_s27 = scalar_lea.vmem %s75_s21, 32 }
  0x2d   :  { %p8960_p11 = scmp.ne.s32.totalorder %s75_s21, %s8959_s26  ;;  %p8964_p12 = scmp.lt.s32.totalorder %s75_s21, %s75_s21 }
  0x2e   :  { %p8965_p13 = scmp.lt.s32.totalorder %s8963_s27, %s8959_s26 }
  0x30   :  { %p8966_p0 = por %p8965_p13, %p8964_p12 }
  0x32   :  { %p8967_p1 = pnand %p8966_p0, %p8960_p11 }
  0x34   :  { %8970 = shalt.err (!%p8967_p1)
}
  0x35   :  { %77 = dma.hbm_to_vmem [thread:$0]  %s10021_s4, 16, %s75_s21, [#allocation8]  }
  0x36   :  { %s9345_s28 = smov [#allocation10]   ;;  %s9346_s0 = smov [#allocation13]  }
  0x37   :  { %s96_s29 = sshll.u32 %s9345_s28, 4  ;;  %s116_s20 = sshll.u32 %s9346_s0, 4  ;;  %s97_s29 = int_to_ptr.vmem [resolvable:$true] %s96_s29  ;;  %s117_s20 = int_to_ptr.vmem [resolvable:$true] %s116_s20 }
  0x38   :  { %s8971_s24 = scalar_lea.hbm %s10023_s6, 32 }
  0x39   :  { %p8972_p2 = scmp.ne.s32.totalorder %s10023_s6, %s8971_s24  ;;  %p8975_p3 = scmp.lt.u32.totalorder %s8971_s24, %s10023_s6 }
  0x3b   :  { %p8977_p4 = pnand %p8975_p3, %p8972_p2 }
  0x3d   :  { %8980 = shalt.err (!%p8977_p4)
}
  0x3e   :  { %s8981_s4 = scalar_lea.vmem %s97_s29, 32  ;;  %p8986_p6 = scmp.lt.s32.totalorder %s97_s29, %s97_s29 }
  0x3f   :  { %p8982_p5 = scmp.ne.s32.totalorder %s97_s29, %s8981_s4  ;;  %p8987_p7 = scmp.lt.s32.totalorder %s8981_s4, %s8981_s4 }
  0x41   :  { %p8988_p8 = por %p8987_p7, %p8986_p6 }
  0x43   :  { %p8989_p9 = pnand %p8988_p8, %p8982_p5 }
  0x45   :  { %8992 = shalt.err (!%p8989_p9)
}
  0x46   :  { %99 = dma.hbm_to_vmem [thread:$0]  %s10023_s6, 32, %s97_s29, [#allocation11]  }
  0x47   :  { %s8993_s28 = scalar_lea.hbm %s10025_s8, 32 }
  0x48   :  { %p8994_p10 = scmp.ne.s32.totalorder %s10025_s8, %s8993_s28  ;;  %p8997_p11 = scmp.lt.u32.totalorder %s8993_s28, %s10025_s8 }
  0x4a   :  { %p8999_p12 = pnand %p8997_p11, %p8994_p10 }
  0x4c   :  { %9002 = shalt.err (!%p8999_p12)
}
  0x4d   :  { %s9003_s23 = scalar_lea.vmem %s117_s20, 32  ;;  %p9008_p0 = scmp.lt.s32.totalorder %s117_s20, %s117_s20 }
  0x4e   :  { %p9004_p13 = scmp.ne.s32.totalorder %s117_s20, %s9003_s23  ;;  %p9009_p1 = scmp.lt.s32.totalorder %s9003_s23, %s9003_s23 }
  0x50   :  { %p9010_p2 = por %p9009_p1, %p9008_p0 }
  0x52   :  { %p9011_p3 = pnand %p9010_p2, %p9004_p13 }
  0x54   :  { %9014 = shalt.err (!%p9011_p3)
}
  0x55   :  { %119 = dma.hbm_to_vmem [thread:$0]  %s10025_s8, 32, %s117_s20, [#allocation14]  }
  0x56   :  { %s9347_s25 = smov [#allocation16]   ;;  %s9348_s26 = smov [#allocation19]  }
  0x57   :  { %s138_s3 = sshll.u32 %s9347_s25, 4  ;;  %s158_s4 = sshll.u32 %s9348_s26, 4  ;;  %s139_s3 = int_to_ptr.vmem [resolvable:$true] %s138_s3  ;;  %s159_s4 = int_to_ptr.vmem [resolvable:$true] %s158_s4 }
  0x58   :  { %s9015_s30 = scalar_lea.hbm %s10027_s10, 64 }
  0x59   :  { %p9016_p4 = scmp.ne.s32.totalorder %s10027_s10, %s9015_s30  ;;  %p9019_p5 = scmp.lt.u32.totalorder %s9015_s30, %s10027_s10 }
  0x5b   :  { %p9021_p6 = pnand %p9019_p5, %p9016_p4 }
  0x5d   :  { %9024 = shalt.err (!%p9021_p6)
}
  0x5e   :  { %s9025_s8 = scalar_lea.vmem %s139_s3, 64  ;;  %p9030_p8 = scmp.lt.s32.totalorder %s139_s3, %s139_s3 }
  0x5f   :  { %p9026_p7 = scmp.ne.s32.totalorder %s139_s3, %s9025_s8  ;;  %p9031_p9 = scmp.lt.s32.totalorder %s9025_s8, %s9025_s8 }
  0x61   :  { %p9032_p10 = por %p9031_p9, %p9030_p8 }
  0x63   :  { %p9033_p11 = pnand %p9032_p10, %p9026_p7 }
  0x65   :  { %9036 = shalt.err (!%p9033_p11)
}
  0x66   :  { %141 = dma.hbm_to_vmem [thread:$0]  %s10027_s10, 64, %s139_s3, [#allocation17]  }
  0x67   :  { %s9037_s6 = scalar_lea.hbm %s10029_s12, 64 }
  0x68   :  { %p9038_p12 = scmp.ne.s32.totalorder %s10029_s12, %s9037_s6  ;;  %p9041_p13 = scmp.lt.u32.totalorder %s9037_s6, %s10029_s12 }
  0x6a   :  { %p9043_p0 = pnand %p9041_p13, %p9038_p12 }
  0x6c   :  { %9046 = shalt.err (!%p9043_p0)
}
  0x6d   :  { %s9047_s27 = scalar_lea.vmem %s159_s4, 64  ;;  %p9052_p2 = scmp.lt.s32.totalorder %s159_s4, %s159_s4 }
  0x6e   :  { %p9048_p1 = scmp.ne.s32.totalorder %s159_s4, %s9047_s27  ;;  %p9053_p3 = scmp.lt.s32.totalorder %s9047_s27, %s9047_s27 }
  0x70   :  { %p9054_p4 = por %p9053_p3, %p9052_p2 }
  0x72   :  { %p9055_p5 = pnand %p9054_p4, %p9048_p1 }
  0x74   :  { %9058 = shalt.err (!%p9055_p5)
}
  0x75   :  { %161 = dma.hbm_to_vmem [thread:$0]  %s10029_s12, 64, %s159_s4, [#allocation20]  }
  0x76   :  { %s9349_s30 = smov [#allocation22]   ;;  %s9350_s28 = smov [#allocation25]  }
  0x77   :  { %s180_s2 = sshll.u32 %s9349_s30, 4  ;;  %s200_s0 = sshll.u32 %s9350_s28, 4  ;;  %s181_s2 = int_to_ptr.vmem [resolvable:$true] %s180_s2  ;;  %s201_s0 = int_to_ptr.vmem [resolvable:$true] %s200_s0 }
  0x78   :  { %s9059_s20 = scalar_lea.hbm %s10031_s14, 128 }
  0x79   :  { %p9060_p6 = scmp.ne.s32.totalorder %s10031_s14, %s9059_s20  ;;  %p9063_p7 = scmp.lt.u32.totalorder %s9059_s20, %s10031_s14 }
  0x7b   :  { %p9065_p8 = pnand %p9063_p7, %p9060_p6 }
  0x7d   :  { %9068 = shalt.err (!%p9065_p8)
}
  0x7e   :  { %s9069_s12 = scalar_lea.vmem %s181_s2, 128  ;;  %p9074_p10 = scmp.lt.s32.totalorder %s181_s2, %s181_s2 }
  0x7f   :  { %p9070_p9 = scmp.ne.s32.totalorder %s181_s2, %s9069_s12  ;;  %p9075_p11 = scmp.lt.s32.totalorder %s9069_s12, %s9069_s12 }
  0x81   :  { %p9076_p12 = por %p9075_p11, %p9074_p10 }
  0x83   :  { %p9077_p13 = pnand %p9076_p12, %p9070_p9 }
  0x85   :  { %9080 = shalt.err (!%p9077_p13)
}
  0x86   :  { %183 = dma.hbm_to_vmem [thread:$0]  %s10031_s14, 128, %s181_s2, [#allocation23]  }
  0x87   :  { %s9081_s21 = scalar_lea.hbm %s10033_s16, 128 }
  0x88   :  { %p9082_p0 = scmp.ne.s32.totalorder %s10033_s16, %s9081_s21  ;;  %p9085_p1 = scmp.lt.u32.totalorder %s9081_s21, %s10033_s16 }
  0x8a   :  { %p9087_p2 = pnand %p9085_p1, %p9082_p0 }
  0x8c   :  { %9090 = shalt.err (!%p9087_p2)
}
  0x8d   :  { %s9091_s28 = scalar_lea.vmem %s201_s0, 128  ;;  %p9096_p4 = scmp.lt.s32.totalorder %s201_s0, %s201_s0 }
  0x8e   :  { %p9092_p3 = scmp.ne.s32.totalorder %s201_s0, %s9091_s28  ;;  %p9097_p5 = scmp.lt.s32.totalorder %s9091_s28, %s9091_s28 }
  0x90   :  { %p9098_p6 = por %p9097_p5, %p9096_p4 }
  0x92   :  { %p9099_p7 = pnand %p9098_p6, %p9092_p3 }
  0x94   :  { %9102 = shalt.err (!%p9099_p7)
}
  0x95   :  { %203 = dma.hbm_to_vmem [thread:$0]  %s10033_s16, 128, %s201_s0, [#allocation26]  }
  0x96   :  { %s9351_s1 = smov [#allocation2]   ;;  %s10045_s24 = sld [smem:[#allocation41_spill]] }
  0x97   :  { %s41_s8 = sshll.u32 %s9351_s1, 4  ;;  %s42_s8 = int_to_ptr.vmem [resolvable:$true] %s41_s8 }
  0x9c   :  { %s9103_s23 = scalar_lea.hbm %s10045_s24, 1024 }
  0x9d   :  { %p9104_p8 = scmp.ne.s32.totalorder %s10045_s24, %s9103_s23  ;;  %p9107_p9 = scmp.lt.u32.totalorder %s9103_s23, %s10045_s24 }
  0x9f   :  { %p9109_p10 = pnand %p9107_p9, %p9104_p8 }
  0xa1   :  { %9112 = shalt.err (!%p9109_p10)
}
  0xa2   :  { %s9113_s25 = scalar_lea.vmem %s42_s8, 1024  ;;  %p9118_p12 = scmp.lt.s32.totalorder %s42_s8, %s42_s8 }
  0xa3   :  { %p9114_p11 = scmp.ne.s32.totalorder %s42_s8, %s9113_s25  ;;  %p9119_p13 = scmp.lt.s32.totalorder %s9113_s25, %s9113_s25 }
  0xa5   :  { %p9120_p0 = por %p9119_p13, %p9118_p12 }
  0xa7   :  { %p9121_p1 = pnand %p9120_p0, %p9114_p11 }
  0xa9   :  { %9124 = shalt.err (!%p9121_p1)
}
  0xaa   :  { %s9352_s16 = smov 64   ;;  %s9353_s0 = smov 4  }
  0xab   :  { %47 = dma.hbm_to_vmem [thread:$0]  %s10045_s24, 1024, %s42_s8, [#allocation3], %s9352_s16, %s9352_s16, %s9353_s0  }
  0xac   :  { %s9354_s27 = smov [#allocation6]   ;;  %s9355_s3 = smov [#allocation9]  }
  0xad   :  { %s64_s10 = sshll.u32 %s9354_s27, 4  ;;  %s83_s30 = sshll.u32 %s9355_s3, 4  ;;  %s65_s10 = int_to_ptr.vmem [resolvable:$true] %s64_s10  ;;  %s84_s30 = int_to_ptr.vmem [resolvable:$true] %s83_s30 }
  0xae   :  { %s10046_s2 = sld [smem:[#allocation43_spill]] }
  0xb4   :  { %s9125_s1 = scalar_lea.hbm %s10046_s2, 16 }
  0xb5   :  { %p9126_p2 = scmp.ne.s32.totalorder %s10046_s2, %s9125_s1  ;;  %p9129_p3 = scmp.lt.u32.totalorder %s9125_s1, %s10046_s2 }
  0xb7   :  { %p9131_p4 = pnand %p9129_p3, %p9126_p2 }
  0xb9   :  { %9134 = shalt.err (!%p9131_p4)
}
  0xba   :  { %s9135_s8 = scalar_lea.vmem %s65_s10, 16  ;;  %s9139_s24 = scalar_lea.vmem %s65_s10, 32 }
  0xbb   :  { %p9136_p5 = scmp.ne.s32.totalorder %s65_s10, %s9135_s8  ;;  %p9140_p6 = scmp.lt.s32.totalorder %s65_s10, %s65_s10 }
  0xbc   :  { %p9141_p7 = scmp.lt.s32.totalorder %s9139_s24, %s9135_s8 }
  0xbe   :  { %p9142_p8 = por %p9141_p7, %p9140_p6 }
  0xc0   :  { %p9143_p9 = pnand %p9142_p8, %p9136_p5 }
  0xc2   :  { %9146 = shalt.err (!%p9143_p9)
}
  0xc3   :  { %67 = dma.hbm_to_vmem [thread:$0]  %s10046_s2, 16, %s65_s10, [#allocation5]  }
  0xc4   :  { %s9147_s16 = scalar_lea.hbm %s10022_s5, 2048 }
  0xc5   :  { %p9148_p10 = scmp.ne.s32.totalorder %s10022_s5, %s9147_s16  ;;  %p9151_p11 = scmp.lt.u32.totalorder %s9147_s16, %s10022_s5 }
  0xc7   :  { %p9153_p12 = pnand %p9151_p11, %p9148_p10 }
  0xc9   :  { %9156 = shalt.err (!%p9153_p12)
}
  0xca   :  { %s9157_s3 = scalar_lea.vmem %s84_s30, 2048  ;;  %p9162_p0 = scmp.lt.s32.totalorder %s84_s30, %s84_s30 }
  0xcb   :  { %p9158_p13 = scmp.ne.s32.totalorder %s84_s30, %s9157_s3  ;;  %p9163_p1 = scmp.lt.s32.totalorder %s9157_s3, %s9157_s3 }
  0xcd   :  { %p9164_p2 = por %p9163_p1, %p9162_p0 }
  0xcf   :  { %p9165_p3 = pnand %p9164_p2, %p9158_p13 }
  0xd1   :  { %9168 = shalt.err (!%p9165_p3)
}
  0xd2   :  { %s9356_s10 = smov 128   ;;  %s9357_s28 = smov 8  }
  0xd3   :  { %89 = dma.hbm_to_vmem [thread:$0]  %s10022_s5, 2048, %s84_s30, [#allocation8], %s9356_s10, %s9356_s10, %s9357_s28  }
  0xd4   :  { %s9358_s1 = smov [#allocation12]   ;;  %s9359_s22 = smov [#allocation15]  }
  0xd5   :  { %s106_s20 = sshll.u32 %s9358_s1, 4  ;;  %s125_s23 = sshll.u32 %s9359_s22, 4  ;;  %s107_s20 = int_to_ptr.vmem [resolvable:$true] %s106_s20  ;;  %s126_s23 = int_to_ptr.vmem [resolvable:$true] %s125_s23 }
  0xd6   :  { %s9169_s24 = scalar_lea.hbm %s10024_s7, 32 }
  0xd7   :  { %p9170_p4 = scmp.ne.s32.totalorder %s10024_s7, %s9169_s24  ;;  %p9173_p5 = scmp.lt.u32.totalorder %s9169_s24, %s10024_s7 }
  0xd9   :  { %p9175_p6 = pnand %p9173_p5, %p9170_p4 }
  0xdb   :  { %9178 = shalt.err (!%p9175_p6)
}
  0xdc   :  { %s9179_s5 = scalar_lea.vmem %s107_s20, 32  ;;  %p9184_p8 = scmp.lt.s32.totalorder %s107_s20, %s107_s20 }
  0xdd   :  { %p9180_p7 = scmp.ne.s32.totalorder %s107_s20, %s9179_s5  ;;  %p9185_p9 = scmp.lt.s32.totalorder %s9179_s5, %s9179_s5 }
  0xdf   :  { %p9186_p10 = por %p9185_p9, %p9184_p8 }
  0xe1   :  { %p9187_p11 = pnand %p9186_p10, %p9180_p7 }
  0xe3   :  { %9190 = shalt.err (!%p9187_p11)
}
  0xe4   :  { %109 = dma.hbm_to_vmem [thread:$0]  %s10024_s7, 32, %s107_s20, [#allocation11]  }
  0xe5   :  { %s9191_s21 = scalar_lea.hbm %s10026_s9, 8192 }
  0xe6   :  { %p9192_p12 = scmp.ne.s32.totalorder %s10026_s9, %s9191_s21  ;;  %p9195_p13 = scmp.lt.u32.totalorder %s9191_s21, %s10026_s9 }
  0xe8   :  { %p9197_p0 = pnand %p9195_p13, %p9192_p12 }
  0xea   :  { %9200 = shalt.err (!%p9197_p0)
}
  0xeb   :  { %s9201_s14 = scalar_lea.vmem %s126_s23, 8192  ;;  %p9206_p2 = scmp.lt.s32.totalorder %s126_s23, %s126_s23 }
  0xec   :  { %p9202_p1 = scmp.ne.s32.totalorder %s126_s23, %s9201_s14  ;;  %p9207_p3 = scmp.lt.s32.totalorder %s9201_s14, %s9201_s14 }
  0xee   :  { %p9208_p4 = por %p9207_p3, %p9206_p2 }
  0xf0   :  { %p9209_p5 = pnand %p9208_p4, %p9202_p1 }
  0xf2   :  { %9212 = shalt.err (!%p9209_p5)
}
  0xf3   :  { %s9360_s7 = smov 256   ;;  %s9361_s2 = smov 16  }
  0xf4   :  { %131 = dma.hbm_to_vmem [thread:$0]  %s10026_s9, 8192, %s126_s23, [#allocation14], %s9360_s7, %s9360_s7, %s9361_s2  }
  0xf5   :  { %s9362_s22 = smov [#allocation18]   ;;  %s9363_s8 = smov [#allocation21]  }
  0xf6   :  { %s148_s6 = sshll.u32 %s9362_s22, 4  ;;  %s167_s24 = sshll.u32 %s9363_s8, 4  ;;  %s149_s6 = int_to_ptr.vmem [resolvable:$true] %s148_s6  ;;  %s168_s24 = int_to_ptr.vmem [resolvable:$true] %s167_s24 }
  0xf7   :  { %s9213_s29 = scalar_lea.hbm %s10028_s11, 64 }
  0xf8   :  { %p9214_p6 = scmp.ne.s32.totalorder %s10028_s11, %s9213_s29  ;;  %p9217_p7 = scmp.lt.u32.totalorder %s9213_s29, %s10028_s11 }
  0xfa   :  { %p9219_p8 = pnand %p9217_p7, %p9214_p6 }
  0xfc   :  { %9222 = shalt.err (!%p9219_p8)
}
  0xfd   :  { %s9223_s9 = scalar_lea.vmem %s149_s6, 64  ;;  %p9228_p10 = scmp.lt.s32.totalorder %s149_s6, %s149_s6 }
  0xfe   :  { %p9224_p9 = scmp.ne.s32.totalorder %s149_s6, %s9223_s9  ;;  %p9229_p11 = scmp.lt.s32.totalorder %s9223_s9, %s9223_s9 }
 0x100   :  { %p9230_p12 = por %p9229_p11, %p9228_p10 }
 0x102   :  { %p9231_p13 = pnand %p9230_p12, %p9224_p9 }
 0x104   :  { %9234 = shalt.err (!%p9231_p13)
}
 0x105   :  { %151 = dma.hbm_to_vmem [thread:$0]  %s10028_s11, 64, %s149_s6, [#allocation17]  }
 0x106   :  { %s9235_s27 = scalar_lea.hbm %s10030_s13, 32768 }
 0x107   :  { %p9236_p0 = scmp.ne.s32.totalorder %s10030_s13, %s9235_s27  ;;  %p9239_p1 = scmp.lt.u32.totalorder %s9235_s27, %s10030_s13 }
 0x109   :  { %p9241_p2 = pnand %p9239_p1, %p9236_p0 }
 0x10b   :  { %9244 = shalt.err (!%p9241_p2)
}
 0x10c   :  { %s9245_s7 = scalar_lea.vmem %s168_s24, 32768  ;;  %p9250_p4 = scmp.lt.s32.totalorder %s168_s24, %s168_s24 }
 0x10d   :  { %p9246_p3 = scmp.ne.s32.totalorder %s168_s24, %s9245_s7  ;;  %p9251_p5 = scmp.lt.s32.totalorder %s9245_s7, %s9245_s7 }
 0x10f   :  { %p9252_p6 = por %p9251_p5, %p9250_p4 }
 0x111   :  { %p9253_p7 = pnand %p9252_p6, %p9246_p3 }
 0x113   :  { %9256 = shalt.err (!%p9253_p7)
}
 0x114   :  { %s9364_s11 = smov 512   ;;  %s9365_s2 = smov 32  }
 0x115   :  { %173 = dma.hbm_to_vmem [thread:$0]  %s10030_s13, 32768, %s168_s24, [#allocation20], %s9364_s11, %s9364_s11, %s9365_s2  }
 0x116   :  { %s9366_s22 = smov [#allocation24]   ;;  %s9367_s8 = smov [#allocation27]  }
 0x117   :  { %s190_s6 = sshll.u32 %s9366_s22, 4  ;;  %s209_s12 = sshll.u32 %s9367_s8, 4  ;;  %s191_s6 = int_to_ptr.vmem [resolvable:$true] %s190_s6  ;;  %s210_s12 = int_to_ptr.vmem [resolvable:$true] %s209_s12 }
 0x118   :  { %s9257_s25 = scalar_lea.hbm %s10032_s15, 128 }
 0x119   :  { %p9258_p8 = scmp.ne.s32.totalorder %s10032_s15, %s9257_s25  ;;  %p9261_p9 = scmp.lt.u32.totalorder %s9257_s25, %s10032_s15 }
 0x11b   :  { %p9263_p10 = pnand %p9261_p9, %p9258_p8 }
 0x11d   :  { %9266 = shalt.err (!%p9263_p10)
}
 0x11e   :  { %s9267_s13 = scalar_lea.vmem %s191_s6, 128  ;;  %p9272_p12 = scmp.lt.s32.totalorder %s191_s6, %s191_s6 }
 0x11f   :  { %p9268_p11 = scmp.ne.s32.totalorder %s191_s6, %s9267_s13  ;;  %p9273_p13 = scmp.lt.s32.totalorder %s9267_s13, %s9267_s13 }
 0x121   :  { %p9274_p0 = por %p9273_p13, %p9272_p12 }
 0x123   :  { %p9275_p1 = pnand %p9274_p0, %p9268_p11 }
 0x125   :  { %9278 = shalt.err (!%p9275_p1)
}
 0x126   :  { %193 = dma.hbm_to_vmem [thread:$0]  %s10032_s15, 128, %s191_s6, [#allocation23]  }
 0x127   :  { %s9279_s21 = scalar_lea.hbm %s10034_s17, 57344 }
 0x128   :  { %p9280_p2 = scmp.ne.s32.totalorder %s10034_s17, %s9279_s21  ;;  %p9283_p3 = scmp.lt.u32.totalorder %s9279_s21, %s10034_s17 }
 0x12a   :  { %p9285_p4 = pnand %p9283_p3, %p9280_p2 }
 0x12c   :  { %9288 = shalt.err (!%p9285_p4)
}
 0x12d   :  { %s9289_s14 = scalar_lea.vmem %s210_s12, 57344  ;;  %p9294_p6 = scmp.lt.s32.totalorder %s210_s12, %s210_s12 }
 0x12e   :  { %p9290_p5 = scmp.ne.s32.totalorder %s210_s12, %s9289_s14  ;;  %p9295_p7 = scmp.lt.s32.totalorder %s9289_s14, %s9289_s14 }
 0x130   :  { %p9296_p8 = por %p9295_p7, %p9294_p6 }
 0x132   :  { %p9297_p9 = pnand %p9296_p8, %p9290_p5 }
 0x134   :  { %9300 = shalt.err (!%p9297_p9)
}
 0x135   :  { %s9368_s15 = smov 448   ;;  %s9369_s7 = smov 28  }
 0x136   :  { %215 = dma.hbm_to_vmem [thread:$0]  %s10034_s17, 57344, %s210_s12, [#allocation26], %s9368_s15, %s9368_s15, %s9369_s7  }
 0x137   :  { %s9370_s1 = smov [#allocation28]   ;;  %s9301_s8 = scalar_lea.hbm %s10035_s18, 112 }
 0x138   :  { %s222_s20 = sshll.u32 %s9370_s1, 4  ;;  %p9302_p10 = scmp.ne.s32.totalorder %s10035_s18, %s9301_s8  ;;  %s223_s20 = int_to_ptr.vmem [resolvable:$true] %s222_s20 }
 0x139   :  { %p9305_p11 = scmp.lt.u32.totalorder %s9301_s8, %s10035_s18 }
 0x13b   :  { %p9307_p12 = pnand %p9305_p11, %p9302_p10 }
 0x13d   :  { %9310 = shalt.err (!%p9307_p12)
}
 0x13e   :  { %s9311_s30 = scalar_lea.vmem %s223_s20, 112  ;;  %s9315_s17 = scalar_lea.vmem %s223_s20, 128 }
 0x13f   :  { %p9312_p13 = scmp.ne.s32.totalorder %s223_s20, %s9311_s30  ;;  %p9316_p0 = scmp.lt.s32.totalorder %s223_s20, %s223_s20 }
 0x140   :  { %p9317_p1 = scmp.lt.s32.totalorder %s9315_s17, %s9311_s30 }
 0x142   :  { %p9318_p2 = por %p9317_p1, %p9316_p0 }
 0x144   :  { %p9319_p3 = pnand %p9318_p2, %p9312_p13 }
 0x146   :  { %9322 = shalt.err (!%p9319_p3)
}
 0x147   :  { %225 = dma.hbm_to_vmem [thread:$0]  %s10035_s18, 112, %s223_s20, [#allocation29]  }
 0x148   :  { %9323 = dma.done.wait [#allocation3], 1024  }
 0x149   :  { %9324 = vsyncadd [#allocation3], 4294966272 }
 0x14a   :  { %9325 = dma.done.wait [#allocation5], 32  }
 0x14b   :  { %9326 = vsyncadd [#allocation5], 4294967264 }
 0x14c   :  { %9327 = dma.done.wait [#allocation8], 2064  }
 0x14d   :  { %9328 = vsyncadd [#allocation8], 4294965232 }
 0x14e   :  { %9329 = dma.done.wait [#allocation11], 64  }
 0x14f   :  { %9330 = vsyncadd [#allocation11], 4294967232 }
 0x150   :  { %9331 = dma.done.wait [#allocation14], 8224  }
 0x151   :  { %9332 = vsyncadd [#allocation14], 4294959072 }
 0x152   :  { %9333 = dma.done.wait [#allocation17], 128  }
 0x153   :  { %9334 = vsyncadd [#allocation17], 4294967168 }
 0x154   :  { %9335 = dma.done.wait [#allocation20], 32832  }
 0x155   :  { %9336 = vsyncadd [#allocation20], 4294934464 }
 0x156   :  { %9337 = dma.done.wait [#allocation23], 256  }
 0x157   :  { %9338 = vsyncadd [#allocation23], 4294967040 }
 0x158   :  { %9339 = dma.done.wait [#allocation26], 57472  }
 0x159   :  { %9340 = vsyncadd [#allocation26], 4294909824 }
 0x15a   :  { %9341 = dma.done.wait [#allocation29], 112  }
 0x15b   :  { %9342 = vsyncadd [#allocation29], 4294967184  ;;  %v9371_v0 = vmov 0.0   ;;  %vm9372_vm0 = vmmov 0   ;;  %v8115_v1 = vld [vmem:[#allocation2] sm:$0xff]   ;;  %v8116_v2 = vld [vmem:[#allocation2 + $0x8] sm:$0xff]   ;;  %v416_v51 = vlaneseq }
 0x15c   :  { %7997 = vmatprep.subr.bf16.mxu0 %v9371_v0  ;;  %8013 = vmatprep.mubr.msk.bf16.mxu0 %vm9372_vm0, %v9371_v0  ;;  %v8117_v3 = vld [vmem:[#allocation2 + $0x10] sm:$0xff]   ;;  %v8118_v4 = vld [vmem:[#allocation2 + $0x18] sm:$0xff]   ;;  %v8119_v5 = vld [vmem:[#allocation2 + $0x20] sm:$0xff]   ;;  %s10047_s13 = sld [smem:[#allocation40_spill]]  ;;  %v9373_v27 = vmov 0  }
 0x15d   :  { %7998 = vmatpush3.bf16.msra.mxu0 %v8115_v1  ;;  %v8120_v6 = vld [vmem:[#allocation2 + $0x28] sm:$0xff]   ;;  %v8121_v7 = vld [vmem:[#allocation2 + $0x30] sm:$0xff]   ;;  %v8122_v8 = vld [vmem:[#allocation2 + $0x38] sm:$0xff]   ;;  %574 = vmatprep.mubr.bf16.mxu1 %v9373_v27  ;;  %v9694_v52 = vshrl.u32 %v416_v51, 7 }
 0x15e   :  { %7999 = vmatprep.subr.bf16.mxu0 %v9371_v0  ;;  %v8123_v11 = vld [vmem:[#allocation9 + $0x4] ss:$8 sps:$4 sm:$0xff]   ;;  %v8125_v12 = vld [vmem:[#allocation9] ss:$8 sps:$4 sm:$0xff]   ;;  %v8126_v13 = vld [vmem:[#allocation9 + $0x14] ss:$8 sps:$4 sm:$0xff]  }
 0x15f   :  { %542 = vmatprep.subr.bf16.mxu1 %v8123_v11  ;;  %v8128_v14 = vld [vmem:[#allocation9 + $0x10] ss:$8 sps:$4 sm:$0xff]   ;;  %v8129_v15 = vld [vmem:[#allocation9 + $0x24] ss:$8 sps:$4 sm:$0xff]   ;;  %v8131_v16 = vld [vmem:[#allocation9 + $0x20] ss:$8 sps:$4 sm:$0xff]  }
 0x160   :  { %543 = vmatpush1.bf16.msra.mxu1 %v8125_v12  ;;  %v8132_v17 = vld [vmem:[#allocation9 + $0x34] ss:$8 sps:$4 sm:$0xff]   ;;  %v8134_v18 = vld [vmem:[#allocation9 + $0x30] ss:$8 sps:$4 sm:$0xff]   ;;  %v8135_v19 = vld [vmem:[#allocation9 + $0x44] ss:$8 sps:$4 sm:$0xff]  }
 0x161   :  { %8000 = vmatpush3.bf16.msra.mxu0 %v8116_v2  ;;  %544 = vmatprep.subr.bf16.mxu1 %v8126_v13  ;;  %v8137_v20 = vld [vmem:[#allocation9 + $0x40] ss:$8 sps:$4 sm:$0xff]   ;;  %v8138_v21 = vld [vmem:[#allocation9 + $0x54] ss:$8 sps:$4 sm:$0xff]   ;;  %v8140_v22 = vld [vmem:[#allocation9 + $0x50] ss:$8 sps:$4 sm:$0xff]  }
 0x162   :  { %8001 = vmatprep.subr.bf16.mxu0 %v9371_v0  ;;  %v281_v9 = vld [vmem:[%s10047_s13] sm:$0xff]  ;;  %v8141_v23 = vld [vmem:[#allocation9 + $0x64] ss:$8 sps:$4 sm:$0xff]   ;;  %v9697_v54 = vsub.s32 0, %v9694_v52 }
 0x163   :  { %v282_v10 = vpack.c.bf16 %v281_v9, %v281_v9  ;;  %v8143_v24 = vld [vmem:[#allocation9 + $0x60] ss:$8 sps:$4 sm:$0xff]   ;;  %v8144_v25 = vld [vmem:[#allocation9 + $0x74] ss:$8 sps:$4 sm:$0xff]   ;;  %v8146_v26 = vld [vmem:[#allocation9 + $0x70] ss:$8 sps:$4 sm:$0xff]  }
 0x164   :  { %545 = vmatpush1.bf16.msra.mxu1 %v8128_v14  ;;  %v7106_v28 = vld [vmem:[#allocation4] ss:$0 sm:$0xff]  ;;  %v411_v53 = vld [vmem:[#allocation6] sm:$0x1]  ;;  %v7115_v58 = vld [vmem:[#allocation7] ss:$0 sm:$0xff] }
 0x165   :  { %8002 = vmatpush3.bf16.msra.mxu0 %v8117_v3  ;;  %546 = vmatprep.subr.bf16.mxu1 %v8129_v15  ;;  %v8147_v1 = vld [vmem:[#allocation15] ss:$16 sps:$4 sm:$0xff]   ;;  %v8152_v2 = vld [vmem:[#allocation15 + $0x24] ss:$16 sps:$4 sm:$0xff]  }
 0x166   :  { %8003 = vmatprep.subr.bf16.mxu0 %v9371_v0  ;;  %v8150_v3 = vld [vmem:[#allocation15 + $0x20] ss:$16 sps:$4 sm:$0xff]   ;;  %v8167_v12 = vld [vmem:[#allocation15 + $0xc4] ss:$16 sps:$4 sm:$0xff]  }
 0x167   :  { %v8159_v9 = vld [vmem:[#allocation15 + $0x80] ss:$16 sps:$4 sm:$0xff]   ;;  %v8170_v14 = vld [vmem:[#allocation15 + $0xe4] ss:$16 sps:$4 sm:$0xff]  }
 0x168   :  { %547 = vmatpush1.bf16.msra.mxu1 %v8131_v16  ;;  %v8162_v11 = vld [vmem:[#allocation15 + $0xa0] ss:$16 sps:$4 sm:$0xff]   ;;  %v8173_v16 = vld [vmem:[#allocation15 + $0x104] ss:$16 sps:$4 sm:$0xff]  }
 0x169   :  { %8004 = vmatpush3.bf16.msra.mxu0 %v8118_v4  ;;  %548 = vmatprep.subr.bf16.mxu1 %v8132_v17  ;;  %v8155_v4 = vld [vmem:[#allocation15 + $0x44] ss:$16 sps:$4 sm:$0xff]   ;;  %v8165_v13 = vld [vmem:[#allocation15 + $0xc0] ss:$16 sps:$4 sm:$0xff]  }
 0x16a   :  { %8005 = vmatprep.subr.bf16.mxu0 %v9371_v0  ;;  %v8168_v15 = vld [vmem:[#allocation15 + $0xe0] ss:$16 sps:$4 sm:$0xff]  }
 0x16b   :  { %v8171_v17 = vld [vmem:[#allocation15 + $0x100] ss:$16 sps:$4 sm:$0xff]  }
 0x16c   :  { %549 = vmatpush1.bf16.msra.mxu1 %v8134_v18  ;;  %v8176_v18 = vld [vmem:[#allocation15 + $0x124] ss:$16 sps:$4 sm:$0xff]   ;;  %v8186_v27 = vld [vmem:[#allocation15 + $0x1a0] ss:$16 sps:$4 sm:$0xff]  }
 0x16d   :  { %8006 = vmatpush3.bf16.msra.mxu0 %v8119_v5  ;;  %550 = vmatprep.subr.bf16.mxu1 %v8135_v19  ;;  %v8153_v5 = vld [vmem:[#allocation15 + $0x40] ss:$16 sps:$4 sm:$0xff]  }
 0x16e   :  { %8007 = vmatprep.subr.bf16.mxu0 %v9371_v0  ;;  %v8174_v19 = vld [vmem:[#allocation15 + $0x120] ss:$16 sps:$4 sm:$0xff]  }
 0x170   :  { %551 = vmatpush1.bf16.msra.mxu1 %v8137_v20  ;;  %v8179_v20 = vld [vmem:[#allocation15 + $0x144] ss:$16 sps:$4 sm:$0xff]  }
 0x171   :  { %8008 = vmatpush3.bf16.msra.mxu0 %v8120_v6  ;;  %552 = vmatprep.subr.bf16.mxu1 %v8138_v21  ;;  %v8158_v6 = vld [vmem:[#allocation15 + $0x64] ss:$16 sps:$4 sm:$0xff]   ;;  %v8177_v21 = vld [vmem:[#allocation15 + $0x140] ss:$16 sps:$4 sm:$0xff]  }
 0x172   :  { %8009 = vmatprep.subr.bf16.mxu0 %v9371_v0 }
 0x174   :  { %553 = vmatpush1.bf16.msra.mxu1 %v8140_v22  ;;  %v8182_v22 = vld [vmem:[#allocation15 + $0x164] ss:$16 sps:$4 sm:$0xff]  }
 0x175   :  { %8010 = vmatpush3.bf16.msra.mxu0 %v8121_v7  ;;  %554 = vmatprep.subr.bf16.mxu1 %v8141_v23  ;;  %v8156_v7 = vld [vmem:[#allocation15 + $0x60] ss:$16 sps:$4 sm:$0xff]  }
 0x176   :  { %8011 = vmatprep.subr.bf16.mxu0 %v9371_v0  ;;  %v8149_v0 = vld [vmem:[#allocation15 + $0x4] ss:$16 sps:$4 sm:$0xff]   ;;  %v8180_v23 = vld [vmem:[#allocation15 + $0x160] ss:$16 sps:$4 sm:$0xff]  }
 0x178   :  { %555 = vmatpush1.bf16.msra.mxu1 %v8143_v24  ;;  %v8185_v24 = vld [vmem:[#allocation15 + $0x184] ss:$16 sps:$4 sm:$0xff]  }
 0x179   :  { %8012 = vmatpush3.bf16.msra.mxu0 %v8122_v8  ;;  %556 = vmatprep.subr.bf16.mxu1 %v8144_v25  ;;  %v8161_v8 = vld [vmem:[#allocation15 + $0x84] ss:$16 sps:$4 sm:$0xff]   ;;  %v8183_v25 = vld [vmem:[#allocation15 + $0x180] ss:$16 sps:$4 sm:$0xff]  }
 0x17c   :  { %8014 = vmatmul.mubr.bf16.vlgmr.msra.gmra.mrb[0].mxu0 %v282_v10  ;;  %557 = vmatpush1.bf16.msra.mxu1 %v8146_v26  ;;  %v8164_v10 = vld [vmem:[#allocation15 + $0xa4] ss:$16 sps:$4 sm:$0xff]  }
 0x17d   :  { %1080 = vmatprep.subr.bf16.mxu1 %v8149_v0  ;;  %v8188_v26 = vld [vmem:[#allocation15 + $0x1a4] ss:$16 sps:$4 sm:$0xff]  }
 0x24f   :  { %v388_v29 = vpop.f32.mrb[0].mxu0 }
 0x250   :  { %v389_v30 = vadd.f32 %v7106_v28, %v388_v29  ;;  %v8015_v31 = vpop.f32.mrb[1].mxu0  ;;  %v8191_v28 = vld [vmem:[#allocation15 + $0x1c4] ss:$16 sps:$4 sm:$0xff]   ;;  %v8189_v29 = vld [vmem:[#allocation15 + $0x1c0] ss:$16 sps:$4 sm:$0xff]  }
 0x251   :  { %v391_v32 = vpop.f32.mrb[2].mxu0  ;;  %v8192_v31 = vld [vmem:[#allocation15 + $0x1e0] ss:$16 sps:$4 sm:$0xff]  }
 0x252   :  { %v394_v33 = vrot.slane %v389_v30, 4  ;;  %v8016_v34 = vpop.f32.mrb[3].mxu0  ;;  %v8197_v32 = vld [vmem:[#allocation15 + $0xc] ss:$16 sps:$4 sm:$0xff]  }
 0x253   :  { %v9701_v34 = vsub.s32 1, %v9694_v52 }
 0x254   :  { %v395_v35 = vadd.f32 %v394_v33, %v389_v30  ;;  %v450_v33 = vld [vmem:[#allocation10] sm:$0x3] }
 0x256   :  { %v396_v36 = vrot.slane %v395_v35, 2 }
 0x258   :  { %v397_v37 = vadd.f32 %v396_v36, %v395_v35  ;;  %v455_v35 = vrot.slane %v450_v33, %v9697_v54  ;;  %v459_v36 = vrot.slane %v450_v33, %v9701_v34 }
 0x25a   :  { %v398_v38 = vrot.slane %v397_v37, 1 }
 0x25c   :  { %v399_v39 = vadd.f32 %v398_v38, %v397_v37 }
 0x25e   :  { %v401_v40 = vmul.f32 0.125, %v399_v39 }
 0x260   :  { %v402_v41 = vsub.f32 %v389_v30, %v401_v40  ;;  %v8194_v30 = vld [vmem:[#allocation15 + $0x1e4] ss:$16 sps:$4 sm:$0xff]  }
 0x262   :  { %v403_v42 = vmul.f32 %v402_v41, %v402_v41 }
 0x264   :  { %v404_v43 = vrot.slane %v403_v42, 4 }
 0x266   :  { %v405_v44 = vadd.f32 %v404_v43, %v403_v42 }
 0x268   :  { %v406_v45 = vrot.slane %v405_v44, 2 }
 0x26a   :  { %v407_v46 = vadd.f32 %v406_v45, %v405_v44 }
 0x26c   :  { %v408_v47 = vrot.slane %v407_v46, 1 }
 0x26e   :  { %v409_v48 = vadd.f32 %v408_v47, %v407_v46 }
 0x270   :  { %v410_v49 = vmul.f32 0.125, %v409_v48 }
 0x272   :  { %v412_v50 = vadd.f32 1e-05, %v410_v49 }
 0x274   :  { %8883 = vrsqrt.f32 %v412_v50 }
 0x27e   :  { %v8884_v55 = vpop.eup %8883 }
 0x27f   :  { %v414_v56 = vmul.f32 %v8884_v55, %v411_v53 }
 0x281   :  { %v419_v57 = vrot.slane %v414_v56, %v9697_v54 }
 0x283   :  { %v421_v59 = vmul.f32 %v419_v57, %v402_v41 }
 0x285   :  { %v429_v60 = vadd.f32 %v7115_v58, %v421_v59 }
 0x287   :  { %vm430_vm1 = vcmp.gt.f32.partialorder %v429_v60, 0.0  ;;  %v431_v61 = vmul.f32 0.2, %v429_v60 }
 0x289   :  { %v432_v62 = vsel %vm430_vm1, %v429_v60, %v431_v61 }
 0x28a   :  { %v433_v63 = vpack.c.bf16 %v432_v62, %v432_v62 }
 0x28c   :  { %575 = vmatmul.mubr.bf16.vlgmr.msra.gmra.mrb[0].mxu1 %v433_v63 }
 0x28d   :  { %1081 = vmatpush1.bf16.msra.mxu1 %v8147_v1 }
 0x28e   :  { %1082 = vmatprep.subr.bf16.mxu1 %v8152_v2 }
 0x291   :  { %1083 = vmatpush1.bf16.msra.mxu1 %v8150_v3 }
 0x292   :  { %1084 = vmatprep.subr.bf16.mxu1 %v8155_v4 }
 0x295   :  { %1085 = vmatpush1.bf16.msra.mxu1 %v8153_v5 }
 0x296   :  { %1086 = vmatprep.subr.bf16.mxu1 %v8158_v6 }
 0x299   :  { %1087 = vmatpush1.bf16.msra.mxu1 %v8156_v7 }
 0x29a   :  { %1088 = vmatprep.subr.bf16.mxu1 %v8161_v8 }
 0x29d   :  { %1089 = vmatpush1.bf16.msra.mxu1 %v8159_v9 }
 0x29e   :  { %1090 = vmatprep.subr.bf16.mxu1 %v8164_v10 }
 0x2a1   :  { %1091 = vmatpush1.bf16.msra.mxu1 %v8162_v11 }
 0x2a2   :  { %1092 = vmatprep.subr.bf16.mxu1 %v8167_v12 }
 0x2a5   :  { %1093 = vmatpush1.bf16.msra.mxu1 %v8165_v13 }
 0x2a6   :  { %1094 = vmatprep.subr.bf16.mxu1 %v8170_v14 }
 0x2a9   :  { %1095 = vmatpush1.bf16.msra.mxu1 %v8168_v15  ;;  %v9374_v15 = vmov 1966171168  }
 0x2aa   :  { %1096 = vmatprep.subr.bf16.mxu1 %v8173_v16  ;;  %v624_v16 = vunpack.c.l.s4 %v9374_v15  ;;  %v1337_v15 = vld [vmem:[#allocation21 + $0x28] sm:$0xff] }
 0x2ad   :  { %1097 = vmatpush1.bf16.msra.mxu1 %v8171_v17  ;;  %v625_v17 = vunpack.c.0.s8 %v624_v16 }
 0x2ae   :  { %1098 = vmatprep.subr.bf16.mxu1 %v8176_v18 }
 0x2b1   :  { %1099 = vmatpush1.bf16.msra.mxu1 %v8174_v19  ;;  %v9706_v19 = vsub.s32 %v625_v17, %v9694_v52 }
 0x2b2   :  { %1100 = vmatprep.subr.bf16.mxu1 %v8179_v20 }
 0x2b5   :  { %1101 = vmatpush1.bf16.msra.mxu1 %v8177_v21 }
 0x2b6   :  { %1102 = vmatprep.subr.bf16.mxu1 %v8182_v22 }
 0x2b9   :  { %1103 = vmatpush1.bf16.msra.mxu1 %v8180_v23  ;;  %v615_v23 = vld [vmem:[#allocation12] sm:$0x3] }
 0x2ba   :  { %1104 = vmatprep.subr.bf16.mxu1 %v8185_v24 }
 0x2bd   :  { %1105 = vmatpush1.bf16.msra.mxu1 %v8183_v25  ;;  %v652_v25 = vld [vmem:[#allocation13] sm:$0x3] }
 0x2be   :  { %1106 = vmatprep.subr.bf16.mxu1 %v8188_v26 }
 0x2c1   :  { %1107 = vmatpush1.bf16.msra.mxu1 %v8186_v27 }
 0x2c2   :  { %1108 = vmatprep.subr.bf16.mxu1 %v8191_v28 }
 0x2c5   :  { %1109 = vmatpush1.bf16.msra.mxu1 %v8189_v29  ;;  %v657_v29 = vrot.slane %v652_v25, %v9697_v54 }
 0x2c6   :  { %1110 = vmatprep.subr.bf16.mxu1 %v8194_v30  ;;  %v661_v30 = vrot.slane %v652_v25, %v9701_v34 }
 0x2c9   :  { %1111 = vmatpush1.bf16.msra.mxu1 %v8192_v31 }
 0x2ca   :  { %1121 = vmatprep.subr.bf16.mxu1 %v8197_v32 }
 0x35f   :  { %v576_v37 = vpop.f32.mrb[0].mxu1 }
 0x360   :  { %v577_v38 = vadd.f32 %v576_v37, %v455_v35  ;;  %v578_v39 = vpop.f32.mrb[1].mxu1 }
 0x361   :  { %v579_v40 = vadd.f32 %v578_v39, %v459_v36  ;;  %v580_v41 = vpop.f32.mrb[2].mxu1 }
 0x362   :  { %v583_v42 = vrot.slane %v577_v38, 4  ;;  %v581_v43 = vpop.f32.mrb[3].mxu1  ;;  %v8195_v41 = vld [vmem:[#allocation15 + $0x8] ss:$16 sps:$4 sm:$0xff]  }
 0x363   :  { %v589_v44 = vrot.slane %v579_v40, 4  ;;  %v8200_v43 = vld [vmem:[#allocation15 + $0x2c] ss:$16 sps:$4 sm:$0xff]  }
 0x364   :  { %v584_v45 = vadd.f32 %v583_v42, %v577_v38 }
 0x365   :  { %v590_v46 = vadd.f32 %v589_v44, %v579_v40  ;;  %v8198_v44 = vld [vmem:[#allocation15 + $0x28] ss:$16 sps:$4 sm:$0xff]  }
 0x366   :  { %v585_v47 = vrot.slane %v584_v45, 2 }
 0x367   :  { %v591_v48 = vrot.slane %v590_v46, 2 }
 0x368   :  { %v586_v49 = vadd.f32 %v585_v47, %v584_v45  ;;  %v8203_v45 = vld [vmem:[#allocation15 + $0x4c] ss:$16 sps:$4 sm:$0xff]  }
 0x369   :  { %v592_v50 = vadd.f32 %v591_v48, %v590_v46  ;;  %v8201_v46 = vld [vmem:[#allocation15 + $0x48] ss:$16 sps:$4 sm:$0xff]   ;;  %v8206_v47 = vld [vmem:[#allocation15 + $0x6c] ss:$16 sps:$4 sm:$0xff]  }
 0x36a   :  { %v587_v51 = vrot.slane %v586_v49, 1  ;;  %v8204_v48 = vld [vmem:[#allocation15 + $0x68] ss:$16 sps:$4 sm:$0xff]  }
 0x36b   :  { %v593_v53 = vrot.slane %v592_v50, 1 }
 0x36c   :  { %v588_v55 = vadd.f32 %v587_v51, %v586_v49  ;;  %v8209_v49 = vld [vmem:[#allocation15 + $0x8c] ss:$16 sps:$4 sm:$0xff]  }
 0x36d   :  { %v594_v56 = vadd.f32 %v593_v53, %v592_v50  ;;  %v8207_v50 = vld [vmem:[#allocation15 + $0x88] ss:$16 sps:$4 sm:$0xff]   ;;  %v8212_v51 = vld [vmem:[#allocation15 + $0xac] ss:$16 sps:$4 sm:$0xff]  }
 0x36e   :  { %v595_v57 = vmul.f32 0.125, %v588_v55  ;;  %v8210_v53 = vld [vmem:[#allocation15 + $0xa8] ss:$16 sps:$4 sm:$0xff]   ;;  %v8215_v55 = vld [vmem:[#allocation15 + $0xcc] ss:$16 sps:$4 sm:$0xff]  }
 0x36f   :  { %v596_v58 = vmul.f32 0.125, %v594_v56  ;;  %v8213_v56 = vld [vmem:[#allocation15 + $0xc8] ss:$16 sps:$4 sm:$0xff]  }
 0x370   :  { %v597_v59 = vsub.f32 %v577_v38, %v595_v57  ;;  %v8218_v57 = vld [vmem:[#allocation15 + $0xec] ss:$16 sps:$4 sm:$0xff]  }
 0x371   :  { %v598_v60 = vsub.f32 %v579_v40, %v596_v58  ;;  %v8216_v58 = vld [vmem:[#allocation15 + $0xe8] ss:$16 sps:$4 sm:$0xff]  }
 0x372   :  { %v599_v61 = vmul.f32 %v597_v59, %v597_v59 }
 0x373   :  { %v600_v62 = vmul.f32 %v598_v60, %v598_v60 }
 0x374   :  { %v601_v63 = vrot.slane %v599_v61, 4 }
 0x375   :  { %v607_v0 = vrot.slane %v600_v62, 4 }
 0x376   :  { %v602_v1 = vadd.f32 %v601_v63, %v599_v61  ;;  %v8224_v61 = vld [vmem:[#allocation15 + $0x12c] ss:$16 sps:$4 sm:$0xff]  }
 0x377   :  { %v608_v2 = vadd.f32 %v607_v0, %v600_v62  ;;  %v8222_v62 = vld [vmem:[#allocation15 + $0x128] ss:$16 sps:$4 sm:$0xff]   ;;  %v8227_v63 = vld [vmem:[#allocation15 + $0x14c] ss:$16 sps:$4 sm:$0xff]  }
 0x378   :  { %v603_v3 = vrot.slane %v602_v1, 2  ;;  %v8225_v0 = vld [vmem:[#allocation15 + $0x148] ss:$16 sps:$4 sm:$0xff]  }
 0x379   :  { %v609_v4 = vrot.slane %v608_v2, 2 }
 0x37a   :  { %v604_v5 = vadd.f32 %v603_v3, %v602_v1  ;;  %v8230_v1 = vld [vmem:[#allocation15 + $0x16c] ss:$16 sps:$4 sm:$0xff]  }
 0x37b   :  { %v610_v6 = vadd.f32 %v609_v4, %v608_v2  ;;  %v8228_v2 = vld [vmem:[#allocation15 + $0x168] ss:$16 sps:$4 sm:$0xff]   ;;  %v8233_v3 = vld [vmem:[#allocation15 + $0x18c] ss:$16 sps:$4 sm:$0xff]  }
 0x37c   :  { %v605_v7 = vrot.slane %v604_v5, 1  ;;  %v8231_v4 = vld [vmem:[#allocation15 + $0x188] ss:$16 sps:$4 sm:$0xff]  }
 0x37d   :  { %v611_v8 = vrot.slane %v610_v6, 1 }
 0x37e   :  { %v606_v9 = vadd.f32 %v605_v7, %v604_v5  ;;  %v8236_v5 = vld [vmem:[#allocation15 + $0x1ac] ss:$16 sps:$4 sm:$0xff]  }
 0x37f   :  { %v612_v10 = vadd.f32 %v611_v8, %v610_v6  ;;  %v8234_v6 = vld [vmem:[#allocation15 + $0x1a8] ss:$16 sps:$4 sm:$0xff]   ;;  %v8239_v7 = vld [vmem:[#allocation15 + $0x1cc] ss:$16 sps:$4 sm:$0xff]  }
 0x380   :  { %v613_v11 = vmul.f32 0.125, %v606_v9  ;;  %v8237_v8 = vld [vmem:[#allocation15 + $0x1c8] ss:$16 sps:$4 sm:$0xff]   ;;  %v8242_v9 = vld [vmem:[#allocation15 + $0x1ec] ss:$16 sps:$4 sm:$0xff]  }
 0x381   :  { %v614_v12 = vmul.f32 0.125, %v612_v10  ;;  %v8240_v10 = vld [vmem:[#allocation15 + $0x1e8] ss:$16 sps:$4 sm:$0xff]  }
 0x382   :  { %v616_v13 = vadd.f32 1e-05, %v613_v11  ;;  %v1332_v11 = vld [vmem:[#allocation21] sm:$0xff] }
 0x383   :  { %v617_v14 = vadd.f32 1e-05, %v614_v12  ;;  %v1336_v12 = vld [vmem:[#allocation21 + $0x20] sm:$0xff] }
 0x384   :  { %8885 = vrsqrt.f32 %v616_v13  ;;  %v1333_v13 = vld [vmem:[#allocation21 + $0x8] sm:$0xff]  ;;  %v7196_v16 = vcombine.low %v1332_v11, %v1336_v12 }
 0x385   :  { %8887 = vrsqrt.f32 %v617_v14  ;;  %v7197_v14 = vcombine.high %v1332_v11, %v1336_v12  ;;  %v7198_v17 = vcombine.low %v1333_v13, %v1337_v15  ;;  %v1393_v11 = vld [vmem:[#allocation21 + $0x1e8] sm:$0xff] }
 0x387   :  { %2910 = vmatprep.subr.bf16.mxu0 %v7197_v14 }
 0x388   :  { %2911 = vmatpush1.bf16.msra.mxu0 %v7196_v16  ;;  %v1400_v16 = vld [vmem:[#allocation21 + $0x220] sm:$0xff] }
 0x38e   :  { %v8886_v18 = vpop.eup %8885 }
 0x38f   :  { %v8888_v20 = vpop.eup %8887 }
 0x390   :  { %v622_v21 = vcombine.low %v8886_v18, %v8888_v20  ;;  %v7199_v18 = vcombine.high %v1333_v13, %v1337_v15  ;;  %v1340_v20 = vld [vmem:[#allocation21 + $0x40] sm:$0xff] }
 0x391   :  { %v1396_v15 = vld [vmem:[#allocation21 + $0x200] sm:$0xff] }
 0x392   :  { %v629_v22 = vrot.slane %v622_v21, %v9706_v19  ;;  %v1344_v21 = vld [vmem:[#allocation21 + $0x60] sm:$0xff] }
 0x393   :  { %v7204_v25 = vcombine.low %v1340_v20, %v1344_v21 }
 0x394   :  { %v636_v24 = vrot.slane %v629_v22, %v9706_v19  ;;  %v1341_v22 = vld [vmem:[#allocation21 + $0x48] sm:$0xff] }
 0x396   :  { %v638_v26 = vmul.f32 %v636_v24, %v615_v23  ;;  %v7205_v23 = vcombine.high %v1340_v20, %v1344_v21  ;;  %v1345_v24 = vld [vmem:[#allocation21 + $0x68] sm:$0xff]  ;;  %v7260_v21 = vcombine.low %v1396_v15, %v1400_v16 }
 0x397   :  { %v1401_v20 = vld [vmem:[#allocation21 + $0x228] sm:$0xff] }
 0x398   :  { %v643_v27 = vrot.slane %v638_v26, %v9697_v54  ;;  %v647_v28 = vrot.slane %v638_v26, %v9701_v34  ;;  %v7206_v26 = vcombine.low %v1341_v22, %v1345_v24  ;;  %2912 = vmatprep.subr.bf16.mxu0 %v7205_v23 }
 0x399   :  { %2913 = vmatpush1.bf16.msra.mxu0 %v7204_v25  ;;  %v1408_v25 = vld [vmem:[#allocation21 + $0x260] sm:$0xff] }
 0x39a   :  { %v651_v31 = vmul.f32 %v647_v28, %v598_v60  ;;  %v650_v32 = vmul.f32 %v643_v27, %v597_v59  ;;  %v8221_v59 = vld [vmem:[#allocation15 + $0x10c] ss:$16 sps:$4 sm:$0xff]   ;;  %v8219_v60 = vld [vmem:[#allocation15 + $0x108] ss:$16 sps:$4 sm:$0xff]   ;;  %v7207_v27 = vcombine.high %v1341_v22, %v1345_v24 }
 0x39b   :  { %v1348_v28 = vld [vmem:[#allocation21 + $0x80] sm:$0xff] }
 0x39c   :  { %v665_v33 = vadd.f32 %v661_v30, %v651_v31  ;;  %v664_v35 = vadd.f32 %v657_v29, %v650_v32  ;;  %v1352_v29 = vld [vmem:[#allocation21 + $0xa0] sm:$0xff]  ;;  %v1349_v30 = vld [vmem:[#allocation21 + $0x88] sm:$0xff] }
 0x39d   :  { %v7213_v31 = vcombine.high %v1348_v28, %v1352_v29  ;;  %v1353_v32 = vld [vmem:[#allocation21 + $0xa8] sm:$0xff]  ;;  %v1404_v24 = vld [vmem:[#allocation21 + $0x240] sm:$0xff] }
 0x39e   :  { %vm667_vm2 = vcmp.gt.f32.partialorder %v665_v33, 0.0  ;;  %v669_v36 = vmul.f32 0.2, %v665_v33  ;;  %vm666_vm3 = vcmp.gt.f32.partialorder %v664_v35, 0.0  ;;  %v668_v37 = vmul.f32 0.2, %v664_v35 }
 0x39f   :  { %2914 = vmatprep.subr.bf16.mxu0 %v7213_v31 }
 0x3a0   :  { %v671_v38 = vsel %vm667_vm2, %v665_v33, %v669_v36  ;;  %v670_v39 = vsel %vm666_vm3, %v664_v35, %v668_v37  ;;  %v7212_v33 = vcombine.low %v1348_v28, %v1352_v29  ;;  %v7214_v35 = vcombine.low %v1349_v30, %v1353_v32  ;;  %v1356_v37 = vld [vmem:[#allocation21 + $0xc0] sm:$0xff]  ;;  %v1409_v28 = vld [vmem:[#allocation21 + $0x268] sm:$0xff] }
 0x3a1   :  { %v673_v40 = vpack.c.bf16 %v671_v38, %v671_v38  ;;  %v9714_v42 = vpack.c.bf16 %v670_v39, %v670_v39  ;;  %v7215_v36 = vcombine.high %v1349_v30, %v1353_v32  ;;  %v1360_v38 = vld [vmem:[#allocation21 + $0xe0] sm:$0xff]  ;;  %v1357_v39 = vld [vmem:[#allocation21 + $0xc8] sm:$0xff]  ;;  %v7268_v29 = vcombine.low %v1404_v24, %v1408_v25 }
 0x3a2   :  { %2915 = vmatpush1.bf16.msra.mxu0 %v7212_v33  ;;  %v1412_v32 = vld [vmem:[#allocation21 + $0x280] sm:$0xff] }
 0x3a3   :  { %1112 = vmatprep.mubr.bf16.mxu1 %v673_v40  ;;  %v1416_v33 = vld [vmem:[#allocation21 + $0x2a0] sm:$0xff] }
 0x3a4   :  { %1113 = vmatmul.mubr.bf16.vlgmr.msra.gmra.mrb[4].mxu1 %v9714_v42 }
 0x3a5   :  { %1122 = vmatpush1.bf16.msra.mxu1 %v8195_v41  ;;  %1153 = vmatprep.mubr.bf16.mxu1 %v673_v40  ;;  %v7221_v40 = vcombine.high %v1356_v37, %v1360_v38  ;;  %v1361_v41 = vld [vmem:[#allocation21 + $0xe8] sm:$0xff] }
 0x3a6   :  { %1123 = vmatprep.subr.bf16.mxu1 %v8200_v43  ;;  %v7222_v43 = vcombine.low %v1357_v39, %v1361_v41 }
 0x3a7   :  { %2916 = vmatprep.subr.bf16.mxu0 %v7221_v40 }
 0x3a9   :  { %1124 = vmatpush1.bf16.msra.mxu1 %v8198_v44  ;;  %v7223_v44 = vcombine.high %v1357_v39, %v1361_v41  ;;  %v1420_v41 = vld [vmem:[#allocation21 + $0x2c0] sm:$0xff] }
 0x3aa   :  { %1125 = vmatprep.subr.bf16.mxu1 %v8203_v45  ;;  %v1364_v45 = vld [vmem:[#allocation21 + $0x100] sm:$0xff] }
 0x3ad   :  { %1126 = vmatpush1.bf16.msra.mxu1 %v8201_v46  ;;  %v1368_v46 = vld [vmem:[#allocation21 + $0x120] sm:$0xff] }
 0x3ae   :  { %1127 = vmatprep.subr.bf16.mxu1 %v8206_v47  ;;  %v1365_v47 = vld [vmem:[#allocation21 + $0x108] sm:$0xff] }
 0x3b1   :  { %1128 = vmatpush1.bf16.msra.mxu1 %v8204_v48  ;;  %v7229_v48 = vcombine.high %v1364_v45, %v1368_v46 }
 0x3b2   :  { %1129 = vmatprep.subr.bf16.mxu1 %v8209_v49  ;;  %v1369_v49 = vld [vmem:[#allocation21 + $0x128] sm:$0xff] }
 0x3b5   :  { %1130 = vmatpush1.bf16.msra.mxu1 %v8207_v50  ;;  %v7228_v50 = vcombine.low %v1364_v45, %v1368_v46  ;;  %v1425_v45 = vld [vmem:[#allocation21 + $0x2e8] sm:$0xff] }
 0x3b6   :  { %1131 = vmatprep.subr.bf16.mxu1 %v8212_v51  ;;  %v7230_v51 = vcombine.low %v1365_v47, %v1369_v49 }
 0x3b9   :  { %1132 = vmatpush1.bf16.msra.mxu1 %v8210_v53  ;;  %v7231_v53 = vcombine.high %v1365_v47, %v1369_v49  ;;  %v1428_v49 = vld [vmem:[#allocation21 + $0x300] sm:$0xff] }
 0x3ba   :  { %1133 = vmatprep.subr.bf16.mxu1 %v8215_v55  ;;  %v1372_v55 = vld [vmem:[#allocation21 + $0x140] sm:$0xff] }
 0x3bd   :  { %1134 = vmatpush1.bf16.msra.mxu1 %v8213_v56  ;;  %v1376_v56 = vld [vmem:[#allocation21 + $0x160] sm:$0xff] }
 0x3be   :  { %1135 = vmatprep.subr.bf16.mxu1 %v8218_v57  ;;  %v1373_v57 = vld [vmem:[#allocation21 + $0x148] sm:$0xff] }
 0x3c1   :  { %1136 = vmatpush1.bf16.msra.mxu1 %v8216_v58  ;;  %v7237_v58 = vcombine.high %v1372_v55, %v1376_v56 }
 0x3c2   :  { %1137 = vmatprep.subr.bf16.mxu1 %v8221_v59  ;;  %v1377_v59 = vld [vmem:[#allocation21 + $0x168] sm:$0xff] }
 0x3c5   :  { %1138 = vmatpush1.bf16.msra.mxu1 %v8219_v60  ;;  %v7236_v60 = vcombine.low %v1372_v55, %v1376_v56  ;;  %v1433_v55 = vld [vmem:[#allocation21 + $0x328] sm:$0xff] }
 0x3c6   :  { %1139 = vmatprep.subr.bf16.mxu1 %v8224_v61  ;;  %v7238_v61 = vcombine.low %v1373_v57, %v1377_v59 }
 0x3c9   :  { %1140 = vmatpush1.bf16.msra.mxu1 %v8222_v62  ;;  %v7239_v62 = vcombine.high %v1373_v57, %v1377_v59  ;;  %v1436_v59 = vld [vmem:[#allocation21 + $0x340] sm:$0xff] }
 0x3ca   :  { %1141 = vmatprep.subr.bf16.mxu1 %v8227_v63  ;;  %v1380_v63 = vld [vmem:[#allocation21 + $0x180] sm:$0xff] }
 0x3cd   :  { %1142 = vmatpush1.bf16.msra.mxu1 %v8225_v0  ;;  %v1384_v0 = vld [vmem:[#allocation21 + $0x1a0] sm:$0xff] }
 0x3ce   :  { %1143 = vmatprep.subr.bf16.mxu1 %v8230_v1  ;;  %v1381_v1 = vld [vmem:[#allocation21 + $0x188] sm:$0xff] }
 0x3d1   :  { %1144 = vmatpush1.bf16.msra.mxu1 %v8228_v2  ;;  %v7245_v2 = vcombine.high %v1380_v63, %v1384_v0 }
 0x3d2   :  { %1145 = vmatprep.subr.bf16.mxu1 %v8233_v3  ;;  %v1385_v3 = vld [vmem:[#allocation21 + $0x1a8] sm:$0xff] }
 0x3d5   :  { %1146 = vmatpush1.bf16.msra.mxu1 %v8231_v4  ;;  %v7244_v4 = vcombine.low %v1380_v63, %v1384_v0  ;;  %v1441_v63 = vld [vmem:[#allocation21 + $0x368] sm:$0xff] }
 0x3d6   :  { %1147 = vmatprep.subr.bf16.mxu1 %v8236_v5  ;;  %v7246_v5 = vcombine.low %v1381_v1, %v1385_v3 }
 0x3d9   :  { %1148 = vmatpush1.bf16.msra.mxu1 %v8234_v6  ;;  %v7247_v6 = vcombine.high %v1381_v1, %v1385_v3  ;;  %v9718_v3 = vld [vmem:[#allocation16] sm:$0xf] }
 0x3da   :  { %1149 = vmatprep.subr.bf16.mxu1 %v8239_v7  ;;  %v1388_v7 = vld [vmem:[#allocation21 + $0x1c0] sm:$0xff] }
 0x3dd   :  { %1150 = vmatpush1.bf16.msra.mxu1 %v8237_v8  ;;  %v1392_v8 = vld [vmem:[#allocation21 + $0x1e0] sm:$0xff] }
 0x3de   :  { %1151 = vmatprep.subr.bf16.mxu1 %v8242_v9  ;;  %v1389_v9 = vld [vmem:[#allocation21 + $0x1c8] sm:$0xff]  ;;  %v7252_v12 = vcombine.low %v1388_v7, %v1392_v8 }
 0x3df   :  { %v7254_v13 = vcombine.low %v1389_v9, %v1393_v11  ;;  %v7255_v14 = vcombine.high %v1389_v9, %v1393_v11  ;;  %v743_v9 = vrot.slane %v9718_v3, %v9697_v54 }
 0x3e1   :  { %1152 = vmatpush1.bf16.msra.mxu1 %v8240_v10  ;;  %v7253_v10 = vcombine.high %v1388_v7, %v1392_v8  ;;  %v1449_v8 = vld [vmem:[#allocation21 + $0x3a8] sm:$0xff] }
 0x3e2   :  { %2992 = vmatprep.subr.bf16.mxu1 %v7199_v18  ;;  %v7261_v18 = vcombine.high %v1396_v15, %v1400_v16  ;;  %v1456_v15 = vld [vmem:[#allocation21 + $0x3e0] sm:$0xff]  ;;  %v1453_v16 = vld [vmem:[#allocation21 + $0x3c8] sm:$0xff] }
 0x3e4   :  { %1154 = vmatmul.mubr.bf16.vlgmr.msra.gmra.mrb[8].mxu1 %v9714_v42  ;;  %v7220_v42 = vcombine.low %v1356_v37, %v1360_v38  ;;  %v1417_v37 = vld [vmem:[#allocation21 + $0x2a8] sm:$0xff]  ;;  %v7276_v38 = vcombine.low %v1412_v32, %v1416_v33 }
 0x3e5   :  { %2993 = vmatpush1.bf16.msra.mxu1 %v7198_v17  ;;  %v1397_v17 = vld [vmem:[#allocation21 + $0x208] sm:$0xff] }
 0x3e6   :  { %2994 = vmatprep.subr.bf16.mxu1 %v7207_v27  ;;  %2917 = vmatpush1.bf16.msra.mxu0 %v7220_v42  ;;  %v7262_v22 = vcombine.low %v1397_v17, %v1401_v20  ;;  %v7263_v23 = vcombine.high %v1397_v17, %v1401_v20  ;;  %v7269_v27 = vcombine.high %v1404_v24, %v1408_v25  ;;  %v1424_v42 = vld [vmem:[#allocation21 + $0x2e0] sm:$0xff] }
 0x3e7   :  { %2918 = vmatprep.subr.bf16.mxu0 %v7229_v48  ;;  %v7284_v46 = vcombine.low %v1420_v41, %v1424_v42 }
 0x3e9   :  { %2995 = vmatpush1.bf16.msra.mxu1 %v7206_v26  ;;  %v1405_v26 = vld [vmem:[#allocation21 + $0x248] sm:$0xff] }
 0x3ea   :  { %2996 = vmatprep.subr.bf16.mxu1 %v7215_v36  ;;  %2919 = vmatpush1.bf16.msra.mxu0 %v7228_v50  ;;  %v7270_v30 = vcombine.low %v1405_v26, %v1409_v28  ;;  %v7271_v31 = vcombine.high %v1405_v26, %v1409_v28  ;;  %v7277_v36 = vcombine.high %v1412_v32, %v1416_v33  ;;  %v1432_v50 = vld [vmem:[#allocation21 + $0x320] sm:$0xff]  ;;  %v9728_v32 = vld [vmem:[#allocation21 + $0x408] sm:$0xff] }
 0x3eb   :  { %2920 = vmatprep.subr.bf16.mxu0 %v7237_v58  ;;  %v7292_v56 = vcombine.low %v1428_v49, %v1432_v50 }
 0x3ed   :  { %2997 = vmatpush1.bf16.msra.mxu1 %v7214_v35  ;;  %v1413_v35 = vld [vmem:[#allocation21 + $0x288] sm:$0xff] }
 0x3ee   :  { %2998 = vmatprep.subr.bf16.mxu1 %v7223_v44  ;;  %2921 = vmatpush1.bf16.msra.mxu0 %v7236_v60  ;;  %v7278_v39 = vcombine.low %v1413_v35, %v1417_v37  ;;  %v7279_v40 = vcombine.high %v1413_v35, %v1417_v37  ;;  %v7285_v44 = vcombine.high %v1420_v41, %v1424_v42  ;;  %v1440_v60 = vld [vmem:[#allocation21 + $0x360] sm:$0xff] }
 0x3ef   :  { %2922 = vmatprep.subr.bf16.mxu0 %v7245_v2  ;;  %v7300_v0 = vcombine.low %v1436_v59, %v1440_v60 }
 0x3f1   :  { %2999 = vmatpush1.bf16.msra.mxu1 %v7222_v43  ;;  %v1421_v43 = vld [vmem:[#allocation21 + $0x2c8] sm:$0xff] }
 0x3f2   :  { %3000 = vmatprep.subr.bf16.mxu1 %v7231_v53  ;;  %2923 = vmatpush1.bf16.msra.mxu0 %v7244_v4  ;;  %v7286_v47 = vcombine.low %v1421_v43, %v1425_v45  ;;  %v7287_v48 = vcombine.high %v1421_v43, %v1425_v45  ;;  %v7293_v53 = vcombine.high %v1428_v49, %v1432_v50  ;;  %v1444_v4 = vld [vmem:[#allocation21 + $0x380] sm:$0xff] }
 0x3f3   :  { %2924 = vmatprep.subr.bf16.mxu0 %v7253_v10 }
 0x3f5   :  { %3001 = vmatpush1.bf16.msra.mxu1 %v7230_v51  ;;  %v1429_v51 = vld [vmem:[#allocation21 + $0x308] sm:$0xff] }
 0x3f6   :  { %3002 = vmatprep.subr.bf16.mxu1 %v7239_v62  ;;  %2925 = vmatpush1.bf16.msra.mxu0 %v7252_v12  ;;  %v7294_v57 = vcombine.low %v1429_v51, %v1433_v55  ;;  %v7295_v58 = vcombine.high %v1429_v51, %v1433_v55  ;;  %v7301_v62 = vcombine.high %v1436_v59, %v1440_v60 }
 0x3f7   :  { %2926 = vmatprep.subr.bf16.mxu0 %v7261_v18 }
 0x3f9   :  { %3003 = vmatpush1.bf16.msra.mxu1 %v7238_v61  ;;  %v1437_v61 = vld [vmem:[#allocation21 + $0x348] sm:$0xff] }
 0x3fa   :  { %3004 = vmatprep.subr.bf16.mxu1 %v7247_v6  ;;  %2927 = vmatpush1.bf16.msra.mxu0 %v7260_v21  ;;  %v7302_v1 = vcombine.low %v1437_v61, %v1441_v63  ;;  %v7303_v2 = vcombine.high %v1437_v61, %v1441_v63  ;;  %v1445_v6 = vld [vmem:[#allocation21 + $0x388] sm:$0xff] }
 0x3fb   :  { %2928 = vmatprep.subr.bf16.mxu0 %v7269_v27  ;;  %v7310_v11 = vcombine.low %v1445_v6, %v1449_v8  ;;  %v7311_v12 = vcombine.high %v1445_v6, %v1449_v8  ;;  %v1457_v21 = vld [vmem:[#allocation21 + $0x3e8] sm:$0xff] }
 0x3fc   :  { %v7318_v24 = vcombine.low %v1453_v16, %v1457_v21  ;;  %v7319_v25 = vcombine.high %v1453_v16, %v1457_v21 }
 0x3fd   :  { %3005 = vmatpush1.bf16.msra.mxu1 %v7246_v5  ;;  %v1448_v5 = vld [vmem:[#allocation21 + $0x3a0] sm:$0xff] }
 0x3fe   :  { %3006 = vmatprep.subr.bf16.mxu1 %v7255_v14  ;;  %2929 = vmatpush1.bf16.msra.mxu0 %v7268_v29  ;;  %v7309_v7 = vcombine.high %v1444_v4, %v1448_v5  ;;  %v7308_v10 = vcombine.low %v1444_v4, %v1448_v5  ;;  %v1452_v14 = vld [vmem:[#allocation21 + $0x3c0] sm:$0xff] }
 0x3ff   :  { %2930 = vmatprep.subr.bf16.mxu0 %v7277_v36  ;;  %v7316_v18 = vcombine.low %v1452_v14, %v1456_v15  ;;  %v7317_v20 = vcombine.high %v1452_v14, %v1456_v15  ;;  %v9732_v36 = vld [vmem:[#allocation21 + $0x428] sm:$0xff]  ;;  %v9749_v14 = vsub.s32 2, %v9694_v52  ;;  %v9752_v15 = vsub.s32 3, %v9694_v52 }
 0x401   :  { %3007 = vmatpush1.bf16.msra.mxu1 %v7254_v13  ;;  %v747_v13 = vrot.slane %v9718_v3, %v9701_v34  ;;  %v751_v16 = vrot.slane %v9718_v3, %v9749_v14 }
 0x402   :  { %3008 = vmatprep.subr.bf16.mxu1 %v7263_v23  ;;  %2931 = vmatpush1.bf16.msra.mxu0 %v7276_v38 }
 0x403   :  { %2932 = vmatprep.subr.bf16.mxu0 %v7285_v44 }
 0x405   :  { %3009 = vmatpush1.bf16.msra.mxu1 %v7262_v22 }
 0x406   :  { %3010 = vmatprep.subr.bf16.mxu1 %v7271_v31  ;;  %2933 = vmatpush1.bf16.msra.mxu0 %v7284_v46  ;;  %v9726_v31 = vld [vmem:[#allocation21 + $0x420] sm:$0xff] }
 0x407   :  { %2934 = vmatprep.subr.bf16.mxu0 %v7293_v53 }
 0x409   :  { %3011 = vmatpush1.bf16.msra.mxu1 %v7270_v30  ;;  %v9724_v30 = vld [vmem:[#allocation21 + $0x400] sm:$0xff] }
 0x40a   :  { %3012 = vmatprep.subr.bf16.mxu1 %v7279_v40  ;;  %2935 = vmatpush1.bf16.msra.mxu0 %v7292_v56  ;;  %v7325_v35 = vcombine.high %v9724_v30, %v9726_v31  ;;  %v7324_v38 = vcombine.low %v9724_v30, %v9726_v31  ;;  %v7327_v40 = vcombine.high %v9728_v32, %v9732_v36 }
 0x40b   :  { %2936 = vmatprep.subr.bf16.mxu0 %v7301_v62 }
 0x40d   :  { %3013 = vmatpush1.bf16.msra.mxu1 %v7278_v39  ;;  %v7326_v39 = vcombine.low %v9728_v32, %v9732_v36 }
 0x40e   :  { %3014 = vmatprep.subr.bf16.mxu1 %v7287_v48  ;;  %2937 = vmatpush1.bf16.msra.mxu0 %v7300_v0 }
 0x40f   :  { %2938 = vmatprep.subr.bf16.mxu0 %v7309_v7 }
 0x411   :  { %3015 = vmatpush1.bf16.msra.mxu1 %v7286_v47 }
 0x412   :  { %3016 = vmatprep.subr.bf16.mxu1 %v7295_v58  ;;  %2939 = vmatpush1.bf16.msra.mxu0 %v7308_v10 }
 0x413   :  { %2940 = vmatprep.subr.bf16.mxu0 %v7317_v20 }
 0x415   :  { %3017 = vmatpush1.bf16.msra.mxu1 %v7294_v57 }
 0x416   :  { %3018 = vmatprep.subr.bf16.mxu1 %v7303_v2  ;;  %2941 = vmatpush1.bf16.msra.mxu0 %v7316_v18 }
 0x417   :  { %2951 = vmatprep.subr.bf16.mxu0 %v7325_v35 }
 0x419   :  { %3019 = vmatpush1.bf16.msra.mxu1 %v7302_v1 }
 0x41a   :  { %3020 = vmatprep.subr.bf16.mxu1 %v7311_v12 }
 0x41d   :  { %3021 = vmatpush1.bf16.msra.mxu1 %v7310_v11 }
 0x41e   :  { %3022 = vmatprep.subr.bf16.mxu1 %v7319_v25 }
 0x421   :  { %3023 = vmatpush1.bf16.msra.mxu1 %v7318_v24 }
 0x422   :  { %3033 = vmatprep.subr.bf16.mxu1 %v7327_v40 }
 0x477   :  { %v1114_v17 = vpop.f32.mrb[4].mxu1 }
 0x478   :  { %v1115_v22 = vadd.f32 %v1114_v17, %v743_v9  ;;  %v1116_v23 = vpop.f32.mrb[5].mxu1  ;;  %v755_v17 = vrot.slane %v9718_v3, %v9752_v15 }
 0x479   :  { %v1117_v26 = vadd.f32 %v1116_v23, %v747_v13  ;;  %v1118_v27 = vpop.f32.mrb[6].mxu1 }
 0x47a   :  { %v1162_v28 = vrot.slane %v1115_v22, 4  ;;  %v1119_v29 = vpop.f32.mrb[7].mxu1 }
 0x47b   :  { %v1168_v33 = vrot.slane %v1117_v26, 4 }
 0x47c   :  { %v1163_v37 = vadd.f32 %v1162_v28, %v1115_v22 }
 0x47d   :  { %v1169_v41 = vadd.f32 %v1168_v33, %v1117_v26 }
 0x47e   :  { %v1164_v42 = vrot.slane %v1163_v37, 2 }
 0x47f   :  { %v1170_v43 = vrot.slane %v1169_v41, 2 }
 0x480   :  { %v1165_v44 = vadd.f32 %v1164_v42, %v1163_v37 }
 0x481   :  { %v1171_v45 = vadd.f32 %v1170_v43, %v1169_v41 }
 0x482   :  { %v1166_v46 = vrot.slane %v1165_v44, 1 }
 0x483   :  { %v1172_v47 = vrot.slane %v1171_v45, 1 }
 0x484   :  { %v1167_v48 = vadd.f32 %v1166_v46, %v1165_v44 }
 0x485   :  { %v1173_v49 = vadd.f32 %v1172_v47, %v1171_v45 }
 0x486   :  { %v1186_v50 = vmul.f32 0.125, %v1167_v48 }
 0x487   :  { %v1187_v51 = vmul.f32 0.125, %v1173_v49 }
 0x488   :  { %v9740_v53 = vsub.f32 %v1115_v22, %v1186_v50 }
 0x489   :  { %v9742_v55 = vsub.f32 %v1117_v26, %v1187_v51 }
 0x48a   :  { %v1194_v56 = vmul.f32 %v9740_v53, %v9740_v53 }
 0x48b   :  { %v1195_v57 = vmul.f32 %v9742_v55, %v9742_v55 }
 0x48c   :  { %v1198_v58 = vrot.slane %v1194_v56, 4 }
 0x48d   :  { %v1204_v59 = vrot.slane %v1195_v57, 4 }
 0x48e   :  { %v1199_v60 = vadd.f32 %v1198_v58, %v1194_v56 }
 0x48f   :  { %v1205_v61 = vadd.f32 %v1204_v59, %v1195_v57 }
 0x490   :  { %v1200_v62 = vrot.slane %v1199_v60, 2 }
 0x491   :  { %v1206_v63 = vrot.slane %v1205_v61, 2 }
 0x492   :  { %v1201_v0 = vadd.f32 %v1200_v62, %v1199_v60 }
 0x493   :  { %v1207_v1 = vadd.f32 %v1206_v63, %v1205_v61 }
 0x494   :  { %v1202_v2 = vrot.slane %v1201_v0, 1 }
 0x495   :  { %v1208_v4 = vrot.slane %v1207_v1, 1 }
 0x496   :  { %v1203_v5 = vadd.f32 %v1202_v2, %v1201_v0 }
 0x497   :  { %v1209_v6 = vadd.f32 %v1208_v4, %v1207_v1 }
 0x498   :  { %v1222_v7 = vmul.f32 0.125, %v1203_v5 }
 0x499   :  { %v1223_v8 = vmul.f32 0.125, %v1209_v6 }
 0x49a   :  { %v1227_v9 = vadd.f32 1e-05, %v1222_v7 }
 0x49b   :  { %v1228_v10 = vadd.f32 1e-05, %v1223_v8 }
 0x49c   :  { %8889 = vrsqrt.f32 %v1227_v9 }
 0x49d   :  { %8891 = vrsqrt.f32 %v1228_v10 }
 0x4a6   :  { %v8890_v11 = vpop.eup %8889 }
 0x4a7   :  { %v8892_v12 = vpop.eup %8891 }
 0x4a8   :  { %v1239_v13 = vcombine.low %v8890_v11, %v8892_v12  ;;  %v1226_v12 = vld [vmem:[#allocation18] sm:$0xf] }
 0x4aa   :  { %v1247_v9 = vrot.slane %v1239_v13, %v9706_v19 }
 0x4b7   :  { %v1155_v18 = vpop.f32.mrb[8].mxu1 }
 0x4b8   :  { %v1156_v20 = vadd.f32 %v1155_v18, %v751_v16  ;;  %v1157_v21 = vpop.f32.mrb[9].mxu1 }
 0x4b9   :  { %v1158_v22 = vadd.f32 %v1157_v21, %v755_v17  ;;  %v1159_v23 = vpop.f32.mrb[10].mxu1  ;;  %v1290_v17 = vld [vmem:[#allocation19] sm:$0xf] }
 0x4ba   :  { %v1174_v24 = vrot.slane %v1156_v20, 4  ;;  %v1160_v25 = vpop.f32.mrb[11].mxu1  ;;  %v1299_v21 = vrot.slane %v1290_v17, %v9701_v34  ;;  %v1303_v23 = vrot.slane %v1290_v17, %v9749_v14 }
 0x4bb   :  { %v1180_v26 = vrot.slane %v1158_v22, 4 }
 0x4bc   :  { %v1175_v27 = vadd.f32 %v1174_v24, %v1156_v20 }
 0x4bd   :  { %v1181_v28 = vadd.f32 %v1180_v26, %v1158_v22 }
 0x4be   :  { %v1176_v29 = vrot.slane %v1175_v27, 2 }
 0x4bf   :  { %v1182_v33 = vrot.slane %v1181_v28, 2 }
 0x4c0   :  { %v1177_v35 = vadd.f32 %v1176_v29, %v1175_v27 }
 0x4c1   :  { %v1183_v37 = vadd.f32 %v1182_v33, %v1181_v28 }
 0x4c2   :  { %v1178_v40 = vrot.slane %v1177_v35, 1 }
 0x4c3   :  { %v1184_v41 = vrot.slane %v1183_v37, 1 }
 0x4c4   :  { %v1179_v42 = vadd.f32 %v1178_v40, %v1177_v35 }
 0x4c5   :  { %v1185_v43 = vadd.f32 %v1184_v41, %v1183_v37 }
 0x4c6   :  { %v1188_v44 = vmul.f32 0.125, %v1179_v42 }
 0x4c7   :  { %v1189_v3 = vmul.f32 0.125, %v1185_v43 }
 0x4c8   :  { %v1192_v45 = vsub.f32 %v1156_v20, %v1188_v44  ;;  %v1307_v20 = vrot.slane %v1290_v17, %v9752_v15 }
 0x4c9   :  { %v1193_v46 = vsub.f32 %v1158_v22, %v1189_v3  ;;  %v1295_v22 = vrot.slane %v1290_v17, %v9697_v54  ;;  %v1468_v3 = vld [vmem:[#allocation21 + $0x440] sm:$0xff] }
 0x4ca   :  { %v1196_v47 = vmul.f32 %v1192_v45, %v1192_v45  ;;  %v1504_v17 = vld [vmem:[#allocation21 + $0x560] sm:$0xff] }
 0x4cb   :  { %v1197_v48 = vmul.f32 %v1193_v46, %v1193_v46 }
 0x4cc   :  { %v1210_v49 = vrot.slane %v1196_v47, 4 }
 0x4cd   :  { %v1216_v50 = vrot.slane %v1197_v48, 4 }
 0x4ce   :  { %v1211_v51 = vadd.f32 %v1210_v49, %v1196_v47  ;;  %v1469_v49 = vld [vmem:[#allocation21 + $0x448] sm:$0xff] }
 0x4cf   :  { %v1217_v56 = vadd.f32 %v1216_v50, %v1197_v48 }
 0x4d0   :  { %v1212_v57 = vrot.slane %v1211_v51, 2 }
 0x4d1   :  { %v1218_v58 = vrot.slane %v1217_v56, 2 }
 0x4d2   :  { %v1213_v59 = vadd.f32 %v1212_v57, %v1211_v51  ;;  %v1476_v51 = vld [vmem:[#allocation21 + $0x480] sm:$0xff] }
 0x4d3   :  { %v1219_v60 = vadd.f32 %v1218_v58, %v1217_v56  ;;  %v1480_v58 = vld [vmem:[#allocation21 + $0x4a0] sm:$0xff] }
 0x4d4   :  { %v1214_v61 = vrot.slane %v1213_v59, 1  ;;  %v7340_v30 = vcombine.low %v1476_v51, %v1480_v58 }
 0x4d5   :  { %v1220_v62 = vrot.slane %v1219_v60, 1 }
 0x4d6   :  { %v1215_v63 = vadd.f32 %v1214_v61, %v1213_v59  ;;  %v1477_v59 = vld [vmem:[#allocation21 + $0x488] sm:$0xff] }
 0x4d7   :  { %v1221_v0 = vadd.f32 %v1220_v62, %v1219_v60  ;;  %v1481_v60 = vld [vmem:[#allocation21 + $0x4a8] sm:$0xff] }
 0x4d8   :  { %v1224_v1 = vmul.f32 0.125, %v1215_v63  ;;  %v7342_v31 = vcombine.low %v1477_v59, %v1481_v60 }
 0x4d9   :  { %v1225_v2 = vmul.f32 0.125, %v1221_v0  ;;  %v7341_v0 = vcombine.high %v1476_v51, %v1480_v58 }
 0x4da   :  { %v1229_v4 = vadd.f32 1e-05, %v1224_v1  ;;  %v7343_v1 = vcombine.high %v1477_v59, %v1481_v60  ;;  %v1532_v59 = vld [vmem:[#allocation21 + $0x640] sm:$0xff] }
 0x4db   :  { %v1230_v5 = vadd.f32 1e-05, %v1225_v2  ;;  %v1484_v2 = vld [vmem:[#allocation21 + $0x4c0] sm:$0xff] }
 0x4dc   :  { %8893 = vrsqrt.f32 %v1229_v4  ;;  %v1488_v4 = vld [vmem:[#allocation21 + $0x4e0] sm:$0xff] }
 0x4dd   :  { %8895 = vrsqrt.f32 %v1230_v5  ;;  %v1485_v5 = vld [vmem:[#allocation21 + $0x4c8] sm:$0xff]  ;;  %v7349_v32 = vcombine.high %v1484_v2, %v1488_v4  ;;  %v1536_v60 = vld [vmem:[#allocation21 + $0x660] sm:$0xff] }
 0x4e6   :  { %v8894_v6 = vpop.eup %8893 }
 0x4e7   :  { %v8896_v7 = vpop.eup %8895 }
 0x4e8   :  { %v1240_v8 = vcombine.low %v8894_v6, %v8896_v7  ;;  %v1489_v6 = vld [vmem:[#allocation21 + $0x4e8] sm:$0xff] }
 0x4e9   :  { %v7351_v36 = vcombine.high %v1485_v5, %v1489_v6  ;;  %v1493_v7 = vld [vmem:[#allocation21 + $0x508] sm:$0xff] }
 0x4ea   :  { %v1254_v10 = vrot.slane %v1240_v8, %v9706_v19  ;;  %v1497_v8 = vld [vmem:[#allocation21 + $0x528] sm:$0xff] }
 0x4ec   :  { %v1255_v11 = vcombine.low %v1247_v9, %v1254_v10  ;;  %v7348_v9 = vcombine.low %v1484_v2, %v1488_v4  ;;  %v7350_v10 = vcombine.low %v1485_v5, %v1489_v6  ;;  %v7397_v2 = vcombine.high %v1532_v59, %v1536_v60  ;;  %v1540_v5 = vld [vmem:[#allocation21 + $0x680] sm:$0xff] }
 0x4ed   :  { %v1544_v6 = vld [vmem:[#allocation21 + $0x6a0] sm:$0xff] }
 0x4ee   :  { %v1262_v16 = vrot.slane %v1255_v11, %v9706_v19 }
 0x4f0   :  { %v1264_v18 = vmul.f32 %v1262_v16, %v1226_v12  ;;  %v7359_v12 = vcombine.high %v1493_v7, %v1497_v8  ;;  %v1500_v16 = vld [vmem:[#allocation21 + $0x540] sm:$0xff] }
 0x4f2   :  { %v1281_v24 = vrot.slane %v1264_v18, %v9752_v15  ;;  %v1273_v13 = vrot.slane %v1264_v18, %v9701_v34  ;;  %v1269_v25 = vrot.slane %v1264_v18, %v9697_v54  ;;  %v1277_v26 = vrot.slane %v1264_v18, %v9749_v14  ;;  %v1501_v18 = vld [vmem:[#allocation21 + $0x548] sm:$0xff] }
 0x4f4   :  { %v1289_v27 = vmul.f32 %v1281_v24, %v1193_v46  ;;  %v1287_v28 = vmul.f32 %v1273_v13, %v9742_v55  ;;  %v1286_v29 = vmul.f32 %v1269_v25, %v9740_v53  ;;  %v1288_v33 = vmul.f32 %v1277_v26, %v1192_v45  ;;  %v1472_v46 = vld [vmem:[#allocation21 + $0x460] sm:$0xff]  ;;  %v1473_v55 = vld [vmem:[#allocation21 + $0x468] sm:$0xff] }
 0x4f5   :  { %v7333_v56 = vcombine.high %v1468_v3, %v1472_v46  ;;  %v7335_v57 = vcombine.high %v1469_v49, %v1473_v55  ;;  %v7332_v62 = vcombine.low %v1468_v3, %v1472_v46  ;;  %v7334_v63 = vcombine.low %v1469_v49, %v1473_v55  ;;  %v1508_v13 = vld [vmem:[#allocation21 + $0x580] sm:$0xff]  ;;  %v1509_v26 = vld [vmem:[#allocation21 + $0x588] sm:$0xff] }
 0x4f6   :  { %v1315_v35 = vadd.f32 %v1307_v20, %v1289_v27  ;;  %v1313_v37 = vadd.f32 %v1299_v21, %v1287_v28  ;;  %v1312_v40 = vadd.f32 %v1295_v22, %v1286_v29  ;;  %v9771_v41 = vadd.f32 %v1303_v23, %v1288_v33  ;;  %v1505_v20 = vld [vmem:[#allocation21 + $0x568] sm:$0xff]  ;;  %v1512_v25 = vld [vmem:[#allocation21 + $0x5a0] sm:$0xff] }
 0x4f7   :  { %v7358_v22 = vcombine.low %v1493_v7, %v1497_v8  ;;  %v7365_v23 = vcombine.high %v1500_v16, %v1504_v17  ;;  %v7367_v24 = vcombine.high %v1501_v18, %v1505_v20  ;;  %v1513_v27 = vld [vmem:[#allocation21 + $0x5a8] sm:$0xff]  ;;  %v7364_v28 = vcombine.low %v1500_v16, %v1504_v17  ;;  %v1524_v46 = vld [vmem:[#allocation21 + $0x600] sm:$0xff] }
 0x4f8   :  { %vm1317_vm4 = vcmp.gt.f32.partialorder %v1313_v37, 0.0  ;;  %v1321_v42 = vmul.f32 0.2, %v1313_v37  ;;  %vm1316_vm5 = vcmp.gt.f32.partialorder %v1312_v40, 0.0  ;;  %v1320_v43 = vmul.f32 0.2, %v1312_v40 }
 0x4f9   :  { %vm1319_vm6 = vcmp.gt.f32.partialorder %v1315_v35, 0.0  ;;  %v1323_v44 = vmul.f32 0.2, %v1315_v35  ;;  %v7366_v29 = vcombine.low %v1501_v18, %v1505_v20  ;;  %v7373_v33 = vcombine.high %v1508_v13, %v1512_v25  ;;  %v1528_v49 = vld [vmem:[#allocation21 + $0x620] sm:$0xff]  ;;  %v1525_v55 = vld [vmem:[#allocation21 + $0x608] sm:$0xff] }
 0x4fa   :  { %v1325_v47 = vsel %vm1317_vm4, %v1313_v37, %v1321_v42  ;;  %v1324_v48 = vsel %vm1316_vm5, %v1312_v40, %v1320_v43  ;;  %v1516_v37 = vld [vmem:[#allocation21 + $0x5c0] sm:$0xff]  ;;  %v1517_v42 = vld [vmem:[#allocation21 + $0x5c8] sm:$0xff]  ;;  %v7374_v3 = vcombine.low %v1509_v26, %v1513_v27  ;;  %vm1318_vm7 = vcmp.gt.f32.partialorder %v9771_v41, 0.0 }
 0x4fb   :  { %v9773_v50 = vpack.c.bf16 %v1325_v47, %v1325_v47  ;;  %v9775_v53 = vpack.c.bf16 %v1324_v48, %v1324_v48  ;;  %v1327_v45 = vsel %vm1319_vm6, %v1315_v35, %v1323_v44  ;;  %v7375_v35 = vcombine.high %v1509_v26, %v1513_v27  ;;  %v1520_v40 = vld [vmem:[#allocation21 + $0x5e0] sm:$0xff]  ;;  %v1521_v43 = vld [vmem:[#allocation21 + $0x5e8] sm:$0xff] }
 0x4fc   :  { %v9781_v61 = vpack.c.bf16 %v1327_v45, %v1327_v45  ;;  %v7372_v44 = vcombine.low %v1508_v13, %v1512_v25  ;;  %v7381_v47 = vcombine.high %v1516_v37, %v1520_v40  ;;  %v7383_v48 = vcombine.high %v1517_v42, %v1521_v43  ;;  %v1529_v45 = vld [vmem:[#allocation21 + $0x628] sm:$0xff]  ;;  %v1548_v7 = vld [vmem:[#allocation21 + $0x6c0] sm:$0xff] }
 0x4fd   :  { %2942 = vmatprep.mubr.bf16.mxu0 %v9773_v50  ;;  %3024 = vmatprep.mubr.bf16.mxu1 %v9773_v50  ;;  %v7380_v51 = vcombine.low %v1516_v37, %v1520_v40  ;;  %v7391_v58 = vcombine.high %v1525_v55, %v1529_v45  ;;  %v1552_v8 = vld [vmem:[#allocation21 + $0x6e0] sm:$0xff] }
 0x4fe   :  { %2943 = vmatmul.mubr.bf16.vlgmr.msra.gmra.mrb[4].mxu0 %v9775_v53  ;;  %3025 = vmatmul.mubr.bf16.vlgmr.msra.gmra.mrb[12].mxu1 %v9775_v53  ;;  %v7413_v16 = vcombine.high %v1548_v7, %v1552_v8  ;;  %v1556_v18 = vld [vmem:[#allocation21 + $0x700] sm:$0xff] }
 0x4ff   :  { %2952 = vmatpush1.bf16.msra.mxu0 %v7324_v38  ;;  %3034 = vmatpush1.bf16.msra.mxu1 %v7326_v39  ;;  %v1492_v38 = vld [vmem:[#allocation21 + $0x500] sm:$0xff] }
 0x500   :  { %2983 = vmatprep.mubr.bf16.mxu0 %v9781_v61  ;;  %3065 = vmatprep.mubr.bf16.mxu1 %v9781_v61  ;;  %v1496_v39 = vld [vmem:[#allocation21 + $0x520] sm:$0xff] }
 0x501   :  { %2953 = vmatprep.subr.bf16.mxu0 %v7333_v56  ;;  %3035 = vmatprep.subr.bf16.mxu1 %v7335_v57  ;;  %v7357_v11 = vcombine.high %v1492_v38, %v1496_v39  ;;  %v7356_v21 = vcombine.low %v1492_v38, %v1496_v39  ;;  %v7382_v56 = vcombine.low %v1517_v42, %v1521_v43  ;;  %v1560_v20 = vld [vmem:[#allocation21 + $0x720] sm:$0xff] }
 0x502   :  { %v7389_v57 = vcombine.high %v1524_v46, %v1528_v49  ;;  %v7405_v38 = vcombine.high %v1540_v5, %v1544_v6  ;;  %v7421_v13 = vcombine.high %v1556_v18, %v1560_v20  ;;  %v1564_v26 = vld [vmem:[#allocation21 + $0x740] sm:$0xff] }
 0x503   :  { %2954 = vmatpush1.bf16.msra.mxu0 %v7332_v62  ;;  %3036 = vmatpush1.bf16.msra.mxu1 %v7334_v63  ;;  %v1533_v62 = vld [vmem:[#allocation21 + $0x648] sm:$0xff]  ;;  %v1568_v27 = vld [vmem:[#allocation21 + $0x760] sm:$0xff] }
 0x504   :  { %2955 = vmatprep.subr.bf16.mxu0 %v7341_v0  ;;  %3037 = vmatprep.subr.bf16.mxu1 %v7343_v1  ;;  %v1537_v63 = vld [vmem:[#allocation21 + $0x668] sm:$0xff]  ;;  %v7388_v0 = vcombine.low %v1524_v46, %v1528_v49  ;;  %v7390_v1 = vcombine.low %v1525_v55, %v1529_v45  ;;  %v7429_v37 = vcombine.high %v1564_v26, %v1568_v27  ;;  %v1572_v42 = vld [vmem:[#allocation21 + $0x780] sm:$0xff] }
 0x505   :  { %v7399_v4 = vcombine.high %v1533_v62, %v1537_v63  ;;  %v1576_v43 = vld [vmem:[#allocation21 + $0x7a0] sm:$0xff] }
 0x506   :  { %v7437_v46 = vcombine.high %v1572_v42, %v1576_v43  ;;  %v1580_v55 = vld [vmem:[#allocation21 + $0x7c0] sm:$0xff] }
 0x507   :  { %2956 = vmatpush1.bf16.msra.mxu0 %v7340_v30  ;;  %3038 = vmatpush1.bf16.msra.mxu1 %v7342_v31  ;;  %v1541_v30 = vld [vmem:[#allocation21 + $0x688] sm:$0xff]  ;;  %v1584_v45 = vld [vmem:[#allocation21 + $0x7e0] sm:$0xff] }
 0x508   :  { %2957 = vmatprep.subr.bf16.mxu0 %v7349_v32  ;;  %3039 = vmatprep.subr.bf16.mxu1 %v7351_v36  ;;  %v1545_v31 = vld [vmem:[#allocation21 + $0x6a8] sm:$0xff]  ;;  %v7396_v32 = vcombine.low %v1532_v59, %v1536_v60  ;;  %v7398_v36 = vcombine.low %v1533_v62, %v1537_v63  ;;  %v7445_v59 = vcombine.high %v1580_v55, %v1584_v45  ;;  %v1334_v62 = vld [vmem:[#allocation21 + $0x10] sm:$0xff]  ;;  %v1322_v63 = vmul.f32 0.2, %v9771_v41 }
 0x509   :  { %v7407_v39 = vcombine.high %v1541_v30, %v1545_v31 }
 0x50b   :  { %2958 = vmatpush1.bf16.msra.mxu0 %v7348_v9  ;;  %3040 = vmatpush1.bf16.msra.mxu1 %v7350_v10  ;;  %v1549_v9 = vld [vmem:[#allocation21 + $0x6c8] sm:$0xff] }
 0x50c   :  { %2959 = vmatprep.subr.bf16.mxu0 %v7357_v11  ;;  %3041 = vmatprep.subr.bf16.mxu1 %v7359_v12  ;;  %v1553_v10 = vld [vmem:[#allocation21 + $0x6e8] sm:$0xff]  ;;  %v7404_v11 = vcombine.low %v1540_v5, %v1544_v6  ;;  %v7406_v12 = vcombine.low %v1541_v30, %v1545_v31  ;;  %v1326_v31 = vsel %vm1318_vm7, %v9771_v41, %v1322_v63  ;;  %v1351_v41 = vld [vmem:[#allocation21 + $0x98] sm:$0xff] }
 0x50d   :  { %v7415_v17 = vcombine.high %v1549_v9, %v1553_v10 }
 0x50f   :  { %2960 = vmatpush1.bf16.msra.mxu0 %v7356_v21  ;;  %3042 = vmatpush1.bf16.msra.mxu1 %v7358_v22  ;;  %v1557_v21 = vld [vmem:[#allocation21 + $0x708] sm:$0xff] }
 0x510   :  { %2961 = vmatprep.subr.bf16.mxu0 %v7365_v23  ;;  %3043 = vmatprep.subr.bf16.mxu1 %v7367_v24  ;;  %v1561_v22 = vld [vmem:[#allocation21 + $0x728] sm:$0xff]  ;;  %v7412_v23 = vcombine.low %v1548_v7, %v1552_v8  ;;  %v7414_v24 = vcombine.low %v1549_v9, %v1553_v10  ;;  %v9794_v8 = vpack.c.bf16 %v1326_v31, %v1326_v31 }
 0x511   :  { %v7423_v25 = vcombine.high %v1557_v21, %v1561_v22 }
 0x513   :  { %2962 = vmatpush1.bf16.msra.mxu0 %v7364_v28  ;;  %3044 = vmatpush1.bf16.msra.mxu1 %v7366_v29  ;;  %v1565_v28 = vld [vmem:[#allocation21 + $0x748] sm:$0xff] }
 0x514   :  { %2963 = vmatprep.subr.bf16.mxu0 %v7373_v33  ;;  %3045 = vmatprep.subr.bf16.mxu1 %v7375_v35  ;;  %v1569_v29 = vld [vmem:[#allocation21 + $0x768] sm:$0xff]  ;;  %v7420_v33 = vcombine.low %v1556_v18, %v1560_v20  ;;  %v7422_v35 = vcombine.low %v1557_v21, %v1561_v22 }
 0x515   :  { %v7431_v40 = vcombine.high %v1565_v28, %v1569_v29 }
 0x517   :  { %2964 = vmatpush1.bf16.msra.mxu0 %v7372_v44  ;;  %3046 = vmatpush1.bf16.msra.mxu1 %v7374_v3  ;;  %v1573_v44 = vld [vmem:[#allocation21 + $0x788] sm:$0xff] }
 0x518   :  { %2965 = vmatprep.subr.bf16.mxu0 %v7381_v47  ;;  %3047 = vmatprep.subr.bf16.mxu1 %v7383_v48  ;;  %v1577_v3 = vld [vmem:[#allocation21 + $0x7a8] sm:$0xff]  ;;  %v7428_v47 = vcombine.low %v1564_v26, %v1568_v27  ;;  %v7430_v48 = vcombine.low %v1565_v28, %v1569_v29 }
 0x519   :  { %v7439_v49 = vcombine.high %v1573_v44, %v1577_v3 }
 0x51b   :  { %2966 = vmatpush1.bf16.msra.mxu0 %v7380_v51  ;;  %3048 = vmatpush1.bf16.msra.mxu1 %v7382_v56  ;;  %v1581_v51 = vld [vmem:[#allocation21 + $0x7c8] sm:$0xff] }
 0x51c   :  { %2967 = vmatprep.subr.bf16.mxu0 %v7389_v57  ;;  %3049 = vmatprep.subr.bf16.mxu1 %v7391_v58  ;;  %v1585_v56 = vld [vmem:[#allocation21 + $0x7e8] sm:$0xff]  ;;  %v7436_v57 = vcombine.low %v1572_v42, %v1576_v43  ;;  %v7438_v58 = vcombine.low %v1573_v44, %v1577_v3  ;;  %v1374_v3 = vld [vmem:[#allocation21 + $0x150] sm:$0xff] }
 0x51d   :  { %v7447_v60 = vcombine.high %v1581_v51, %v1585_v56  ;;  %v7446_v5 = vcombine.low %v1581_v51, %v1585_v56  ;;  %v1382_v56 = vld [vmem:[#allocation21 + $0x190] sm:$0xff] }
 0x51f   :  { %2968 = vmatpush1.bf16.msra.mxu0 %v7388_v0  ;;  %3050 = vmatpush1.bf16.msra.mxu1 %v7390_v1  ;;  %v1338_v0 = vld [vmem:[#allocation21 + $0x30] sm:$0xff]  ;;  %v1335_v1 = vld [vmem:[#allocation21 + $0x18] sm:$0xff] }
 0x520   :  { %2969 = vmatprep.subr.bf16.mxu0 %v7397_v2  ;;  %3051 = vmatprep.subr.bf16.mxu1 %v7399_v4  ;;  %v1339_v2 = vld [vmem:[#allocation21 + $0x38] sm:$0xff]  ;;  %v7444_v4 = vcombine.low %v1580_v55, %v1584_v45  ;;  %v7201_v6 = vcombine.high %v1334_v62, %v1338_v0  ;;  %v7200_v7 = vcombine.low %v1334_v62, %v1338_v0 }
 0x521   :  { %v7203_v30 = vcombine.high %v1335_v1, %v1339_v2  ;;  %v7202_v9 = vcombine.low %v1335_v1, %v1339_v2  ;;  %v1390_v1 = vld [vmem:[#allocation21 + $0x1d0] sm:$0xff] }
 0x522   :  { %v1394_v2 = vld [vmem:[#allocation21 + $0x1f0] sm:$0xff] }
 0x523   :  { %2970 = vmatpush1.bf16.msra.mxu0 %v7396_v32  ;;  %3052 = vmatpush1.bf16.msra.mxu1 %v7398_v36  ;;  %v1342_v32 = vld [vmem:[#allocation21 + $0x50] sm:$0xff]  ;;  %v7257_v31 = vcombine.high %v1390_v1, %v1394_v2 }
 0x524   :  { %2971 = vmatprep.subr.bf16.mxu0 %v7405_v38  ;;  %3053 = vmatprep.subr.bf16.mxu1 %v7407_v39  ;;  %v1346_v36 = vld [vmem:[#allocation21 + $0x70] sm:$0xff]  ;;  %v1343_v38 = vld [vmem:[#allocation21 + $0x58] sm:$0xff] }
 0x525   :  { %v1347_v39 = vld [vmem:[#allocation21 + $0x78] sm:$0xff]  ;;  %v7209_v10 = vcombine.high %v1342_v32, %v1346_v36  ;;  %v7208_v18 = vcombine.low %v1342_v32, %v1346_v36  ;;  %v1398_v36 = vld [vmem:[#allocation21 + $0x210] sm:$0xff] }
 0x526   :  { %v7210_v20 = vcombine.low %v1343_v38, %v1347_v39 }
 0x527   :  { %2972 = vmatpush1.bf16.msra.mxu0 %v7404_v11  ;;  %3054 = vmatpush1.bf16.msra.mxu1 %v7406_v12  ;;  %v7211_v11 = vcombine.high %v1343_v38, %v1347_v39  ;;  %v1350_v12 = vld [vmem:[#allocation21 + $0x90] sm:$0xff]  ;;  %v1399_v39 = vld [vmem:[#allocation21 + $0x218] sm:$0xff] }
 0x528   :  { %2973 = vmatprep.subr.bf16.mxu0 %v7413_v16  ;;  %3055 = vmatprep.subr.bf16.mxu1 %v7415_v17  ;;  %v1354_v16 = vld [vmem:[#allocation21 + $0xb0] sm:$0xff]  ;;  %v1355_v17 = vld [vmem:[#allocation21 + $0xb8] sm:$0xff] }
 0x529   :  { %v7217_v21 = vcombine.high %v1350_v12, %v1354_v16  ;;  %v7219_v22 = vcombine.high %v1351_v41, %v1355_v17  ;;  %v7216_v26 = vcombine.low %v1350_v12, %v1354_v16  ;;  %v7218_v27 = vcombine.low %v1351_v41, %v1355_v17  ;;  %v1402_v38 = vld [vmem:[#allocation21 + $0x230] sm:$0xff]  ;;  %v1407_v17 = vld [vmem:[#allocation21 + $0x258] sm:$0xff] }
 0x52a   :  { %v1406_v16 = vld [vmem:[#allocation21 + $0x250] sm:$0xff] }
 0x52b   :  { %2974 = vmatpush1.bf16.msra.mxu0 %v7412_v23  ;;  %3056 = vmatpush1.bf16.msra.mxu1 %v7414_v24  ;;  %v1358_v23 = vld [vmem:[#allocation21 + $0xd0] sm:$0xff] }
 0x52c   :  { %2975 = vmatprep.subr.bf16.mxu0 %v7421_v13  ;;  %3057 = vmatprep.subr.bf16.mxu1 %v7423_v25  ;;  %v1362_v24 = vld [vmem:[#allocation21 + $0xf0] sm:$0xff]  ;;  %v1359_v13 = vld [vmem:[#allocation21 + $0xd8] sm:$0xff] }
 0x52d   :  { %v1363_v25 = vld [vmem:[#allocation21 + $0xf8] sm:$0xff]  ;;  %v7225_v28 = vcombine.high %v1358_v23, %v1362_v24  ;;  %v1410_v41 = vld [vmem:[#allocation21 + $0x270] sm:$0xff] }
 0x52e   :  { %v7227_v29 = vcombine.high %v1359_v13, %v1363_v25  ;;  %v7226_v42 = vcombine.low %v1359_v13, %v1363_v25  ;;  %v1418_v13 = vld [vmem:[#allocation21 + $0x2b0] sm:$0xff]  ;;  %v1415_v25 = vld [vmem:[#allocation21 + $0x298] sm:$0xff] }
 0x52f   :  { %2976 = vmatpush1.bf16.msra.mxu0 %v7420_v33  ;;  %3058 = vmatpush1.bf16.msra.mxu1 %v7422_v35  ;;  %v1366_v33 = vld [vmem:[#allocation21 + $0x110] sm:$0xff] }
 0x530   :  { %2977 = vmatprep.subr.bf16.mxu0 %v7429_v37  ;;  %3059 = vmatprep.subr.bf16.mxu1 %v7431_v40  ;;  %v1370_v35 = vld [vmem:[#allocation21 + $0x130] sm:$0xff]  ;;  %v1371_v37 = vld [vmem:[#allocation21 + $0x138] sm:$0xff]  ;;  %v7224_v40 = vcombine.low %v1358_v23, %v1362_v24 }
 0x531   :  { %v7233_v43 = vcombine.high %v1366_v33, %v1370_v35  ;;  %v1414_v24 = vld [vmem:[#allocation21 + $0x290] sm:$0xff] }
 0x533   :  { %2978 = vmatpush1.bf16.msra.mxu0 %v7428_v47  ;;  %3060 = vmatpush1.bf16.msra.mxu1 %v7430_v48  ;;  %v1378_v47 = vld [vmem:[#allocation21 + $0x170] sm:$0xff]  ;;  %v1375_v48 = vld [vmem:[#allocation21 + $0x158] sm:$0xff] }
 0x534   :  { %2979 = vmatprep.subr.bf16.mxu0 %v7437_v46  ;;  %3061 = vmatprep.subr.bf16.mxu1 %v7439_v49  ;;  %v1379_v46 = vld [vmem:[#allocation21 + $0x178] sm:$0xff]  ;;  %v7232_v49 = vcombine.low %v1366_v33, %v1370_v35  ;;  %v7241_v45 = vcombine.high %v1374_v3, %v1378_v47  ;;  %v1422_v35 = vld [vmem:[#allocation21 + $0x2d0] sm:$0xff] }
 0x535   :  { %v7243_v51 = vcombine.high %v1375_v48, %v1379_v46  ;;  %v7242_v62 = vcombine.low %v1375_v48, %v1379_v46  ;;  %v1434_v48 = vld [vmem:[#allocation21 + $0x330] sm:$0xff]  ;;  %v1431_v46 = vld [vmem:[#allocation21 + $0x318] sm:$0xff] }
 0x537   :  { %2980 = vmatpush1.bf16.msra.mxu0 %v7436_v57  ;;  %3062 = vmatpush1.bf16.msra.mxu1 %v7438_v58  ;;  %v1386_v57 = vld [vmem:[#allocation21 + $0x1b0] sm:$0xff]  ;;  %v1383_v58 = vld [vmem:[#allocation21 + $0x198] sm:$0xff] }
 0x538   :  { %2981 = vmatprep.subr.bf16.mxu0 %v7445_v59  ;;  %3063 = vmatprep.subr.bf16.mxu1 %v7447_v60  ;;  %v1387_v59 = vld [vmem:[#allocation21 + $0x1b8] sm:$0xff]  ;;  %v7240_v60 = vcombine.low %v1374_v3, %v1378_v47  ;;  %v7249_v63 = vcombine.high %v1382_v56, %v1386_v57  ;;  %v1430_v47 = vld [vmem:[#allocation21 + $0x310] sm:$0xff] }
 0x539   :  { %v7251_v0 = vcombine.high %v1383_v58, %v1387_v59 }
 0x53b   :  { %2982 = vmatpush1.bf16.msra.mxu0 %v7444_v4  ;;  %3064 = vmatpush1.bf16.msra.mxu1 %v7446_v5  ;;  %v1391_v4 = vld [vmem:[#allocation21 + $0x1d8] sm:$0xff] }
 0x53c   :  { %3074 = vmatprep.subr.bf16.mxu0 %v7201_v6  ;;  %3156 = vmatprep.subr.bf16.mxu1 %v7203_v30  ;;  %v1395_v5 = vld [vmem:[#allocation21 + $0x1f8] sm:$0xff]  ;;  %v7248_v6 = vcombine.low %v1382_v56, %v1386_v57  ;;  %v7250_v30 = vcombine.low %v1383_v58, %v1387_v59  ;;  %v1438_v57 = vld [vmem:[#allocation21 + $0x350] sm:$0xff] }
 0x53d   :  { %v7259_v32 = vcombine.high %v1391_v4, %v1395_v5  ;;  %v1442_v58 = vld [vmem:[#allocation21 + $0x370] sm:$0xff]  ;;  %v1439_v59 = vld [vmem:[#allocation21 + $0x358] sm:$0xff] }
 0x53e   :  { %2984 = vmatmul.mubr.bf16.vlgmr.msra.gmra.mrb[4].mxu0 %v9794_v8  ;;  %3066 = vmatmul.mubr.bf16.vlgmr.msra.gmra.mrb[12].mxu1 %v9794_v8 }
 0x53f   :  { %3075 = vmatpush1.bf16.msra.mxu0 %v7200_v7  ;;  %3106 = vmatprep.mubr.bf16.mxu0 %v9773_v50  ;;  %v1403_v7 = vld [vmem:[#allocation21 + $0x238] sm:$0xff] }
 0x540   :  { %3157 = vmatpush1.bf16.msra.mxu1 %v7202_v9  ;;  %3188 = vmatprep.mubr.bf16.mxu1 %v9773_v50  ;;  %v1367_v50 = vld [vmem:[#allocation21 + $0x118] sm:$0xff]  ;;  %v7256_v9 = vcombine.low %v1390_v1, %v1394_v2  ;;  %v7267_v12 = vcombine.high %v1399_v39, %v1403_v7  ;;  %v1446_v2 = vld [vmem:[#allocation21 + $0x390] sm:$0xff] }
 0x541   :  { %3076 = vmatprep.subr.bf16.mxu0 %v7209_v10  ;;  %3158 = vmatprep.subr.bf16.mxu1 %v7211_v11  ;;  %v7235_v44 = vcombine.high %v1367_v50, %v1371_v37  ;;  %v7234_v55 = vcombine.low %v1367_v50, %v1371_v37  ;;  %v7258_v10 = vcombine.low %v1391_v4, %v1395_v5  ;;  %v1426_v50 = vld [vmem:[#allocation21 + $0x2f0] sm:$0xff]  ;;  %v1423_v37 = vld [vmem:[#allocation21 + $0x2d8] sm:$0xff] }
 0x542   :  { %v7265_v11 = vcombine.high %v1398_v36, %v1402_v38  ;;  %v1450_v4 = vld [vmem:[#allocation21 + $0x3b0] sm:$0xff]  ;;  %v1447_v5 = vld [vmem:[#allocation21 + $0x398] sm:$0xff] }
 0x543   :  { %3077 = vmatpush1.bf16.msra.mxu0 %v7208_v18  ;;  %v1411_v18 = vld [vmem:[#allocation21 + $0x278] sm:$0xff] }
 0x544   :  { %3159 = vmatpush1.bf16.msra.mxu1 %v7210_v20  ;;  %3078 = vmatprep.subr.bf16.mxu0 %v7217_v21  ;;  %v7264_v20 = vcombine.low %v1398_v36, %v1402_v38  ;;  %v7266_v21 = vcombine.low %v1399_v39, %v1403_v7  ;;  %v7275_v23 = vcombine.high %v1407_v17, %v1411_v18  ;;  %v1454_v38 = vld [vmem:[#allocation21 + $0x3d0] sm:$0xff]  ;;  %v1455_v7 = vld [vmem:[#allocation21 + $0x3d8] sm:$0xff] }
 0x545   :  { %3160 = vmatprep.subr.bf16.mxu1 %v7219_v22  ;;  %v7273_v22 = vcombine.high %v1406_v16, %v1410_v41  ;;  %v1458_v39 = vld [vmem:[#allocation21 + $0x3f0] sm:$0xff] }
 0x547   :  { %3079 = vmatpush1.bf16.msra.mxu0 %v7216_v26  ;;  %v1419_v26 = vld [vmem:[#allocation21 + $0x2b8] sm:$0xff] }
 0x548   :  { %3161 = vmatpush1.bf16.msra.mxu1 %v7218_v27  ;;  %3080 = vmatprep.subr.bf16.mxu0 %v7225_v28  ;;  %v7272_v27 = vcombine.low %v1406_v16, %v1410_v41  ;;  %v7274_v28 = vcombine.low %v1407_v17, %v1411_v18  ;;  %v7283_v33 = vcombine.high %v1415_v25, %v1419_v26  ;;  %v1462_v41 = vld [vmem:[#allocation21 + $0x410] sm:$0xff]  ;;  %v1463_v18 = vld [vmem:[#allocation21 + $0x418] sm:$0xff] }
 0x549   :  { %3162 = vmatprep.subr.bf16.mxu1 %v7227_v29  ;;  %v7281_v29 = vcombine.high %v1414_v24, %v1418_v13  ;;  %v1466_v17 = vld [vmem:[#allocation21 + $0x430] sm:$0xff] }
 0x54b   :  { %3081 = vmatpush1.bf16.msra.mxu0 %v7224_v40  ;;  %v1427_v40 = vld [vmem:[#allocation21 + $0x2f8] sm:$0xff] }
 0x54c   :  { %3163 = vmatpush1.bf16.msra.mxu1 %v7226_v42  ;;  %3082 = vmatprep.subr.bf16.mxu0 %v7233_v43  ;;  %v7280_v42 = vcombine.low %v1414_v24, %v1418_v13  ;;  %v7282_v43 = vcombine.low %v1415_v25, %v1419_v26  ;;  %v7291_v3 = vcombine.high %v1423_v37, %v1427_v40  ;;  %v1470_v13 = vld [vmem:[#allocation21 + $0x450] sm:$0xff] }
 0x54d   :  { %3164 = vmatprep.subr.bf16.mxu1 %v7235_v44  ;;  %v7289_v44 = vcombine.high %v1422_v35, %v1426_v50  ;;  %v1474_v25 = vld [vmem:[#allocation21 + $0x470] sm:$0xff]  ;;  %v7328_v26 = vcombine.low %v1462_v41, %v1466_v17 }
 0x54f   :  { %3083 = vmatpush1.bf16.msra.mxu0 %v7232_v49  ;;  %v1435_v49 = vld [vmem:[#allocation21 + $0x338] sm:$0xff] }
 0x550   :  { %3165 = vmatpush1.bf16.msra.mxu1 %v7234_v55  ;;  %3084 = vmatprep.subr.bf16.mxu0 %v7241_v45  ;;  %v7288_v55 = vcombine.low %v1422_v35, %v1426_v50  ;;  %v7290_v45 = vcombine.low %v1423_v37, %v1427_v40  ;;  %v7299_v56 = vcombine.high %v1431_v46, %v1435_v49  ;;  %v1478_v35 = vld [vmem:[#allocation21 + $0x490] sm:$0xff]  ;;  %v1479_v40 = vld [vmem:[#allocation21 + $0x498] sm:$0xff] }
 0x551   :  { %3166 = vmatprep.subr.bf16.mxu1 %v7243_v51  ;;  %v7297_v51 = vcombine.high %v1430_v47, %v1434_v48  ;;  %v1482_v50 = vld [vmem:[#allocation21 + $0x4b0] sm:$0xff] }
 0x553   :  { %3085 = vmatpush1.bf16.msra.mxu0 %v7240_v60  ;;  %v1443_v60 = vld [vmem:[#allocation21 + $0x378] sm:$0xff] }
 0x554   :  { %3167 = vmatpush1.bf16.msra.mxu1 %v7242_v62  ;;  %3086 = vmatprep.subr.bf16.mxu0 %v7249_v63  ;;  %v7296_v62 = vcombine.low %v1430_v47, %v1434_v48  ;;  %v7298_v63 = vcombine.low %v1431_v46, %v1435_v49  ;;  %v7307_v1 = vcombine.high %v1439_v59, %v1443_v60  ;;  %v1486_v48 = vld [vmem:[#allocation21 + $0x4d0] sm:$0xff]  ;;  %v1487_v49 = vld [vmem:[#allocation21 + $0x4d8] sm:$0xff] }
 0x555   :  { %3168 = vmatprep.subr.bf16.mxu1 %v7251_v0  ;;  %v7305_v0 = vcombine.high %v1438_v57, %v1442_v58  ;;  %v1490_v46 = vld [vmem:[#allocation21 + $0x4f0] sm:$0xff] }
 0x557   :  { %3087 = vmatpush1.bf16.msra.mxu0 %v7248_v6  ;;  %v1451_v6 = vld [vmem:[#allocation21 + $0x3b8] sm:$0xff] }
 0x558   :  { %3169 = vmatpush1.bf16.msra.mxu1 %v7250_v30  ;;  %3088 = vmatprep.subr.bf16.mxu0 %v7257_v31  ;;  %v7304_v30 = vcombine.low %v1438_v57, %v1442_v58  ;;  %v7306_v31 = vcombine.low %v1439_v59, %v1443_v60  ;;  %v7315_v36 = vcombine.high %v1447_v5, %v1451_v6  ;;  %v1494_v57 = vld [vmem:[#allocation21 + $0x510] sm:$0xff]  ;;  %v1495_v59 = vld [vmem:[#allocation21 + $0x518] sm:$0xff] }
 0x559   :  { %3170 = vmatprep.subr.bf16.mxu1 %v7259_v32  ;;  %v7313_v32 = vcombine.high %v1446_v2, %v1450_v4  ;;  %v1498_v58 = vld [vmem:[#allocation21 + $0x530] sm:$0xff]  ;;  %v1499_v60 = vld [vmem:[#allocation21 + $0x538] sm:$0xff] }
 0x55b   :  { %3089 = vmatpush1.bf16.msra.mxu0 %v7256_v9  ;;  %v1459_v9 = vld [vmem:[#allocation21 + $0x3f8] sm:$0xff] }
 0x55c   :  { %3171 = vmatpush1.bf16.msra.mxu1 %v7258_v10  ;;  %3090 = vmatprep.subr.bf16.mxu0 %v7265_v11  ;;  %v7312_v10 = vcombine.low %v1446_v2, %v1450_v4  ;;  %v7314_v11 = vcombine.low %v1447_v5, %v1451_v6  ;;  %v7323_v16 = vcombine.high %v1455_v7, %v1459_v9  ;;  %v1506_v2 = vld [vmem:[#allocation21 + $0x570] sm:$0xff]  ;;  %v1503_v4 = vld [vmem:[#allocation21 + $0x558] sm:$0xff] }
 0x55d   :  { %3172 = vmatprep.subr.bf16.mxu1 %v7267_v12  ;;  %v7321_v12 = vcombine.high %v1454_v38, %v1458_v39  ;;  %v1507_v5 = vld [vmem:[#allocation21 + $0x578] sm:$0xff]  ;;  %v7360_v6 = vcombine.low %v1494_v57, %v1498_v58 }
 0x55f   :  { %3091 = vmatpush1.bf16.msra.mxu0 %v7264_v20  ;;  %v1467_v20 = vld [vmem:[#allocation21 + $0x438] sm:$0xff] }
 0x560   :  { %3173 = vmatpush1.bf16.msra.mxu1 %v7266_v21  ;;  %3092 = vmatprep.subr.bf16.mxu0 %v7273_v22  ;;  %v7320_v21 = vcombine.low %v1454_v38, %v1458_v39  ;;  %v7322_v22 = vcombine.low %v1455_v7, %v1459_v9  ;;  %v7331_v24 = vcombine.high %v1463_v18, %v1467_v20  ;;  %v1514_v38 = vld [vmem:[#allocation21 + $0x5b0] sm:$0xff]  ;;  %v1511_v39 = vld [vmem:[#allocation21 + $0x598] sm:$0xff] }
 0x561   :  { %3174 = vmatprep.subr.bf16.mxu1 %v7275_v23  ;;  %v7329_v23 = vcombine.high %v1462_v41, %v1466_v17  ;;  %v1515_v7 = vld [vmem:[#allocation21 + $0x5b8] sm:$0xff]  ;;  %v1522_v41 = vld [vmem:[#allocation21 + $0x5f0] sm:$0xff] }
 0x562   :  { %v1519_v17 = vld [vmem:[#allocation21 + $0x5d8] sm:$0xff] }
 0x563   :  { %3093 = vmatpush1.bf16.msra.mxu0 %v7272_v27  ;;  %v1471_v27 = vld [vmem:[#allocation21 + $0x458] sm:$0xff] }
 0x564   :  { %3175 = vmatpush1.bf16.msra.mxu1 %v7274_v28  ;;  %3094 = vmatprep.subr.bf16.mxu0 %v7281_v29  ;;  %v1475_v28 = vld [vmem:[#allocation21 + $0x478] sm:$0xff]  ;;  %v7330_v29 = vcombine.low %v1463_v18, %v1467_v20 }
 0x565   :  { %3176 = vmatprep.subr.bf16.mxu1 %v7283_v33  ;;  %v7337_v33 = vcombine.high %v1470_v13, %v1474_v25  ;;  %v7339_v37 = vcombine.high %v1471_v27, %v1475_v28  ;;  %v1523_v18 = vld [vmem:[#allocation21 + $0x5f8] sm:$0xff] }
 0x567   :  { %3095 = vmatpush1.bf16.msra.mxu0 %v7280_v42  ;;  %v1483_v42 = vld [vmem:[#allocation21 + $0x4b8] sm:$0xff] }
 0x568   :  { %3177 = vmatpush1.bf16.msra.mxu1 %v7282_v43  ;;  %3096 = vmatprep.subr.bf16.mxu0 %v7289_v44  ;;  %v7336_v43 = vcombine.low %v1470_v13, %v1474_v25  ;;  %v7338_v44 = vcombine.low %v1471_v27, %v1475_v28  ;;  %v7347_v47 = vcombine.high %v1479_v40, %v1483_v42  ;;  %v1530_v13 = vld [vmem:[#allocation21 + $0x630] sm:$0xff]  ;;  %v1527_v25 = vld [vmem:[#allocation21 + $0x618] sm:$0xff] }
 0x569   :  { %3178 = vmatprep.subr.bf16.mxu1 %v7291_v3  ;;  %v7345_v3 = vcombine.high %v1478_v35, %v1482_v50  ;;  %v7386_v28 = vcombine.low %v1519_v17, %v1523_v18 }
 0x56b   :  { %3097 = vmatpush1.bf16.msra.mxu0 %v7288_v55  ;;  %v1491_v55 = vld [vmem:[#allocation21 + $0x4f8] sm:$0xff] }
 0x56c   :  { %3179 = vmatpush1.bf16.msra.mxu1 %v7290_v45  ;;  %3098 = vmatprep.subr.bf16.mxu0 %v7297_v51  ;;  %v7344_v45 = vcombine.low %v1478_v35, %v1482_v50  ;;  %v7353_v51 = vcombine.high %v1486_v48, %v1490_v46  ;;  %v1534_v35 = vld [vmem:[#allocation21 + $0x650] sm:$0xff] }
 0x56d   :  { %3180 = vmatprep.subr.bf16.mxu1 %v7299_v56  ;;  %v7355_v56 = vcombine.high %v1487_v49, %v1491_v55  ;;  %v1538_v50 = vld [vmem:[#allocation21 + $0x670] sm:$0xff] }
 0x56f   :  { %3099 = vmatpush1.bf16.msra.mxu0 %v7296_v62  ;;  %v7354_v62 = vcombine.low %v1487_v49, %v1491_v55  ;;  %v1547_v49 = vld [vmem:[#allocation21 + $0x6b8] sm:$0xff]  ;;  %v7400_v55 = vcombine.low %v1534_v35, %v1538_v50 }
 0x570   :  { %3181 = vmatpush1.bf16.msra.mxu1 %v7298_v63  ;;  %3100 = vmatprep.subr.bf16.mxu0 %v7305_v0  ;;  %v7361_v63 = vcombine.high %v1494_v57, %v1498_v58  ;;  %v7363_v0 = vcombine.high %v1495_v59, %v1499_v60  ;;  %v1554_v57 = vld [vmem:[#allocation21 + $0x6f0] sm:$0xff]  ;;  %v1551_v58 = vld [vmem:[#allocation21 + $0x6d8] sm:$0xff] }
 0x571   :  { %3182 = vmatprep.subr.bf16.mxu1 %v7307_v1  ;;  %v1502_v1 = vld [vmem:[#allocation21 + $0x550] sm:$0xff] }
 0x572   :  { %v7368_v9 = vcombine.low %v1502_v1, %v1506_v2 }
 0x573   :  { %3101 = vmatpush1.bf16.msra.mxu0 %v7304_v30  ;;  %v7362_v30 = vcombine.low %v1495_v59, %v1499_v60  ;;  %v1555_v59 = vld [vmem:[#allocation21 + $0x6f8] sm:$0xff] }
 0x574   :  { %3183 = vmatpush1.bf16.msra.mxu1 %v7306_v31  ;;  %3102 = vmatprep.subr.bf16.mxu0 %v7313_v32  ;;  %v7369_v31 = vcombine.high %v1502_v1, %v1506_v2  ;;  %v7371_v32 = vcombine.high %v1503_v4, %v1507_v5  ;;  %v1562_v1 = vld [vmem:[#allocation21 + $0x730] sm:$0xff]  ;;  %v1559_v2 = vld [vmem:[#allocation21 + $0x718] sm:$0xff] }
 0x575   :  { %3184 = vmatprep.subr.bf16.mxu1 %v7315_v36  ;;  %v1510_v36 = vld [vmem:[#allocation21 + $0x590] sm:$0xff] }
 0x576   :  { %v7376_v20 = vcombine.low %v1510_v36, %v1514_v38 }
 0x577   :  { %3103 = vmatpush1.bf16.msra.mxu0 %v7312_v10  ;;  %v7370_v10 = vcombine.low %v1503_v4, %v1507_v5  ;;  %v1563_v4 = vld [vmem:[#allocation21 + $0x738] sm:$0xff] }
 0x578   :  { %3185 = vmatpush1.bf16.msra.mxu1 %v7314_v11  ;;  %3104 = vmatprep.subr.bf16.mxu0 %v7321_v12  ;;  %v7377_v11 = vcombine.high %v1510_v36, %v1514_v38  ;;  %v7379_v12 = vcombine.high %v1511_v39, %v1515_v7  ;;  %v1570_v36 = vld [vmem:[#allocation21 + $0x770] sm:$0xff]  ;;  %v1567_v38 = vld [vmem:[#allocation21 + $0x758] sm:$0xff] }
 0x579   :  { %3186 = vmatprep.subr.bf16.mxu1 %v7323_v16  ;;  %v1518_v16 = vld [vmem:[#allocation21 + $0x5d0] sm:$0xff] }
 0x57a   :  { %v7384_v27 = vcombine.low %v1518_v16, %v1522_v41 }
 0x57b   :  { %3105 = vmatpush1.bf16.msra.mxu0 %v7320_v21  ;;  %v7378_v21 = vcombine.low %v1511_v39, %v1515_v7  ;;  %v1571_v39 = vld [vmem:[#allocation21 + $0x778] sm:$0xff] }
 0x57c   :  { %3187 = vmatpush1.bf16.msra.mxu1 %v7322_v22  ;;  %3115 = vmatprep.subr.bf16.mxu0 %v7329_v23  ;;  %v7385_v22 = vcombine.high %v1518_v16, %v1522_v41  ;;  %v7387_v23 = vcombine.high %v1519_v17, %v1523_v18  ;;  %v1578_v16 = vld [vmem:[#allocation21 + $0x7b0] sm:$0xff]  ;;  %v1575_v41 = vld [vmem:[#allocation21 + $0x798] sm:$0xff] }
 0x57d   :  { %3197 = vmatprep.subr.bf16.mxu1 %v7331_v24  ;;  %v1526_v24 = vld [vmem:[#allocation21 + $0x610] sm:$0xff]  ;;  %v1579_v17 = vld [vmem:[#allocation21 + $0x7b8] sm:$0xff] }
 0x57e   :  { %3107 = vmatmul.mubr.bf16.vlgmr.msra.gmra.mrb[8].mxu0 %v9775_v53 }
 0x57f   :  { %3189 = vmatmul.mubr.bf16.vlgmr.msra.gmra.mrb[16].mxu1 %v9775_v53  ;;  %3116 = vmatpush1.bf16.msra.mxu0 %v7328_v26  ;;  %v7346_v53 = vcombine.low %v1479_v40, %v1483_v42  ;;  %v1531_v26 = vld [vmem:[#allocation21 + $0x638] sm:$0xff]  ;;  %v7392_v42 = vcombine.low %v1526_v24, %v1530_v13 }
 0x580   :  { %3147 = vmatprep.mubr.bf16.mxu0 %v9781_v61  ;;  %3198 = vmatpush1.bf16.msra.mxu1 %v7330_v29  ;;  %v7393_v29 = vcombine.high %v1526_v24, %v1530_v13  ;;  %v1539_v40 = vld [vmem:[#allocation21 + $0x678] sm:$0xff]  ;;  %v1586_v24 = vld [vmem:[#allocation21 + $0x7f0] sm:$0xff] }
 0x581   :  { %3229 = vmatprep.mubr.bf16.mxu1 %v9781_v61  ;;  %3117 = vmatprep.subr.bf16.mxu0 %v7337_v33  ;;  %v7352_v61 = vcombine.low %v1486_v48, %v1490_v46  ;;  %v7395_v33 = vcombine.high %v1527_v25, %v1531_v26  ;;  %v1546_v48 = vld [vmem:[#allocation21 + $0x6b0] sm:$0xff]  ;;  %v1543_v46 = vld [vmem:[#allocation21 + $0x698] sm:$0xff] }
 0x582   :  { %3199 = vmatprep.subr.bf16.mxu1 %v7339_v37  ;;  %v1535_v37 = vld [vmem:[#allocation21 + $0x658] sm:$0xff] }
 0x583   :  { %3118 = vmatpush1.bf16.msra.mxu0 %v7336_v43  ;;  %v7394_v43 = vcombine.low %v1527_v25, %v1531_v26  ;;  %v1583_v13 = vld [vmem:[#allocation21 + $0x7d8] sm:$0xff] }
 0x584   :  { %3200 = vmatpush1.bf16.msra.mxu1 %v7338_v44  ;;  %3119 = vmatprep.subr.bf16.mxu0 %v7345_v3  ;;  %v7401_v44 = vcombine.high %v1534_v35, %v1538_v50  ;;  %v7403_v3 = vcombine.high %v1535_v37, %v1539_v40  ;;  %v1587_v25 = vld [vmem:[#allocation21 + $0x7f8] sm:$0xff]  ;;  %v9806_v50 = vld [vmem:[#allocation22] sm:$0xff] }
 0x585   :  { %3201 = vmatprep.subr.bf16.mxu1 %v7347_v47  ;;  %v1542_v47 = vld [vmem:[#allocation21 + $0x690] sm:$0xff]  ;;  %v7450_v35 = vcombine.low %v1583_v13, %v1587_v25 }
 0x586   :  { %v7408_v60 = vcombine.low %v1542_v47, %v1546_v48 }
 0x587   :  { %3120 = vmatpush1.bf16.msra.mxu0 %v7344_v45  ;;  %v7402_v45 = vcombine.low %v1535_v37, %v1539_v40  ;;  %v1593_v37 = vrot.slane %v9806_v50, %v9697_v54  ;;  %v1601_v40 = vrot.slane %v9806_v50, %v9749_v14 }
 0x588   :  { %3202 = vmatpush1.bf16.msra.mxu1 %v7346_v53  ;;  %3121 = vmatprep.subr.bf16.mxu0 %v7353_v51  ;;  %v7409_v53 = vcombine.high %v1542_v47, %v1546_v48  ;;  %v7411_v51 = vcombine.high %v1543_v46, %v1547_v49 }
 0x589   :  { %3203 = vmatprep.subr.bf16.mxu1 %v7355_v56  ;;  %v1550_v56 = vld [vmem:[#allocation21 + $0x6d0] sm:$0xff] }
 0x58a   :  { %v7416_v5 = vcombine.low %v1550_v56, %v1554_v57 }
 0x58b   :  { %3122 = vmatpush1.bf16.msra.mxu0 %v7352_v61  ;;  %v7410_v61 = vcombine.low %v1543_v46, %v1547_v49 }
 0x58c   :  { %3204 = vmatpush1.bf16.msra.mxu1 %v7354_v62  ;;  %3123 = vmatprep.subr.bf16.mxu0 %v7361_v63  ;;  %v7417_v62 = vcombine.high %v1550_v56, %v1554_v57  ;;  %v7419_v63 = vcombine.high %v1551_v58, %v1555_v59 }
 0x58d   :  { %3205 = vmatprep.subr.bf16.mxu1 %v7363_v0  ;;  %v1558_v0 = vld [vmem:[#allocation21 + $0x710] sm:$0xff] }
 0x58e   :  { %v7424_v7 = vcombine.low %v1558_v0, %v1562_v1 }
 0x58f   :  { %3124 = vmatpush1.bf16.msra.mxu0 %v7360_v6  ;;  %v7418_v6 = vcombine.low %v1551_v58, %v1555_v59 }
 0x590   :  { %3206 = vmatpush1.bf16.msra.mxu1 %v7362_v30  ;;  %3125 = vmatprep.subr.bf16.mxu0 %v7369_v31  ;;  %v7425_v30 = vcombine.high %v1558_v0, %v1562_v1  ;;  %v7427_v31 = vcombine.high %v1559_v2, %v1563_v4 }
 0x591   :  { %3207 = vmatprep.subr.bf16.mxu1 %v7371_v32  ;;  %v1566_v32 = vld [vmem:[#allocation21 + $0x750] sm:$0xff] }
 0x592   :  { %v7432_v18 = vcombine.low %v1566_v32, %v1570_v36 }
 0x593   :  { %3126 = vmatpush1.bf16.msra.mxu0 %v7368_v9  ;;  %v7426_v9 = vcombine.low %v1559_v2, %v1563_v4 }
 0x594   :  { %3208 = vmatpush1.bf16.msra.mxu1 %v7370_v10  ;;  %3127 = vmatprep.subr.bf16.mxu0 %v7377_v11  ;;  %v7433_v10 = vcombine.high %v1566_v32, %v1570_v36  ;;  %v7435_v11 = vcombine.high %v1567_v38, %v1571_v39  ;;  %v8243_v36 = vld [vmem:[#allocation27] ss:$28 sps:$4 sm:$0xff]  }
 0x595   :  { %3209 = vmatprep.subr.bf16.mxu1 %v7379_v12  ;;  %v1574_v12 = vld [vmem:[#allocation21 + $0x790] sm:$0xff] }
 0x596   :  { %v7440_v26 = vcombine.low %v1574_v12, %v1578_v16 }
 0x597   :  { %3128 = vmatpush1.bf16.msra.mxu0 %v7376_v20  ;;  %v7434_v20 = vcombine.low %v1567_v38, %v1571_v39  ;;  %v8246_v38 = vld [vmem:[#allocation27 + $0x8] ss:$28 sps:$4 sm:$0xff]  }
 0x598   :  { %3210 = vmatpush1.bf16.msra.mxu1 %v7378_v21  ;;  %3129 = vmatprep.subr.bf16.mxu0 %v7385_v22  ;;  %v7441_v21 = vcombine.high %v1574_v12, %v1578_v16  ;;  %v7443_v22 = vcombine.high %v1575_v41, %v1579_v17  ;;  %v8251_v16 = vld [vmem:[#allocation27 + $0x3c] ss:$28 sps:$4 sm:$0xff]  }
 0x599   :  { %3211 = vmatprep.subr.bf16.mxu1 %v7387_v23  ;;  %v1582_v23 = vld [vmem:[#allocation21 + $0x7d0] sm:$0xff] }
 0x59b   :  { %3130 = vmatpush1.bf16.msra.mxu0 %v7384_v27  ;;  %v7442_v27 = vcombine.low %v1575_v41, %v1579_v17  ;;  %v8254_v41 = vld [vmem:[#allocation27 + $0x44] ss:$28 sps:$4 sm:$0xff]  }
 0x59c   :  { %3212 = vmatpush1.bf16.msra.mxu1 %v7386_v28  ;;  %3131 = vmatprep.subr.bf16.mxu0 %v7393_v29  ;;  %v7449_v28 = vcombine.high %v1582_v23, %v1586_v24  ;;  %v7451_v29 = vcombine.high %v1583_v13, %v1587_v25 }
 0x59d   :  { %3213 = vmatprep.subr.bf16.mxu1 %v7395_v33  ;;  %v7448_v33 = vcombine.low %v1582_v23, %v1586_v24 }
 0x59f   :  { %3132 = vmatpush1.bf16.msra.mxu0 %v7392_v42  ;;  %v1597_v42 = vrot.slane %v9806_v50, %v9701_v34 }
 0x5a0   :  { %3214 = vmatpush1.bf16.msra.mxu1 %v7394_v43  ;;  %3133 = vmatprep.subr.bf16.mxu0 %v7401_v44  ;;  %v1605_v43 = vrot.slane %v9806_v50, %v9752_v15 }
 0x5a1   :  { %3215 = vmatprep.subr.bf16.mxu1 %v7403_v3 }
 0x5a3   :  { %3134 = vmatpush1.bf16.msra.mxu0 %v7400_v55 }
 0x5a4   :  { %3216 = vmatpush1.bf16.msra.mxu1 %v7402_v45  ;;  %3135 = vmatprep.subr.bf16.mxu0 %v7409_v53 }
 0x5a5   :  { %3217 = vmatprep.subr.bf16.mxu1 %v7411_v51 }
 0x5a7   :  { %3136 = vmatpush1.bf16.msra.mxu0 %v7408_v60 }
 0x5a8   :  { %3218 = vmatpush1.bf16.msra.mxu1 %v7410_v61  ;;  %3137 = vmatprep.subr.bf16.mxu0 %v7417_v62 }
 0x5a9   :  { %3219 = vmatprep.subr.bf16.mxu1 %v7419_v63 }
 0x5ab   :  { %3138 = vmatpush1.bf16.msra.mxu0 %v7416_v5 }
 0x5ac   :  { %3220 = vmatpush1.bf16.msra.mxu1 %v7418_v6  ;;  %3139 = vmatprep.subr.bf16.mxu0 %v7425_v30  ;;  %v8245_v6 = vld [vmem:[#allocation27 + $0x4] ss:$28 sps:$4 sm:$0xff]   ;;  %v8248_v30 = vld [vmem:[#allocation27 + $0xc] ss:$28 sps:$4 sm:$0xff]  }
 0x5ad   :  { %3221 = vmatprep.subr.bf16.mxu1 %v7427_v31 }
 0x5af   :  { %3140 = vmatpush1.bf16.msra.mxu0 %v7424_v7 }
 0x5b0   :  { %3222 = vmatpush1.bf16.msra.mxu1 %v7426_v9  ;;  %3141 = vmatprep.subr.bf16.mxu0 %v7433_v10 }
 0x5b1   :  { %3223 = vmatprep.subr.bf16.mxu1 %v7435_v11 }
 0x5b3   :  { %3142 = vmatpush1.bf16.msra.mxu0 %v7432_v18 }
 0x5b4   :  { %3224 = vmatpush1.bf16.msra.mxu1 %v7434_v20  ;;  %3143 = vmatprep.subr.bf16.mxu0 %v7441_v21  ;;  %v8249_v20 = vld [vmem:[#allocation27 + $0x38] ss:$28 sps:$4 sm:$0xff]   ;;  %v8252_v21 = vld [vmem:[#allocation27 + $0x40] ss:$28 sps:$4 sm:$0xff]  }
 0x5b5   :  { %3225 = vmatprep.subr.bf16.mxu1 %v7443_v22 }
 0x5b7   :  { %3144 = vmatpush1.bf16.msra.mxu0 %v7440_v26 }
 0x5b8   :  { %3226 = vmatpush1.bf16.msra.mxu1 %v7442_v27  ;;  %3145 = vmatprep.subr.bf16.mxu0 %v7449_v28  ;;  %v8257_v27 = vld [vmem:[#allocation27 + $0x74] ss:$28 sps:$4 sm:$0xff]   ;;  %v8260_v28 = vld [vmem:[#allocation27 + $0x7c] ss:$28 sps:$4 sm:$0xff]  }
 0x5b9   :  { %3227 = vmatprep.subr.bf16.mxu1 %v7451_v29 }
 0x5bb   :  { %3146 = vmatpush1.bf16.msra.mxu0 %v7448_v33 }
 0x5bc   :  { %3228 = vmatpush1.bf16.msra.mxu1 %v7450_v35  ;;  %6426 = vmatprep.subr.bf16.mxu0 %v8245_v6  ;;  %v8255_v35 = vld [vmem:[#allocation27 + $0x70] ss:$28 sps:$4 sm:$0xff]  }
 0x5bd   :  { %6590 = vmatprep.subr.bf16.mxu1 %v8248_v30 }
 0x5be   :  { %3148 = vmatmul.mubr.bf16.vlgmr.msra.gmra.mrb[8].mxu0 %v9794_v8 }
 0x5bf   :  { %3230 = vmatmul.mubr.bf16.vlgmr.msra.gmra.mrb[16].mxu1 %v9794_v8  ;;  %6427 = vmatpush1.bf16.msra.mxu0 %v8243_v36  ;;  %v8278_v36 = vld [vmem:[#allocation27 + $0x124] ss:$28 sps:$4 sm:$0xff]  }
 0x5c0   :  { %6591 = vmatpush1.bf16.msra.mxu1 %v8246_v38  ;;  %6428 = vmatprep.subr.bf16.mxu0 %v8251_v16 }
 0x5c1   :  { %6592 = vmatprep.subr.bf16.mxu1 %v8254_v41 }
 0x5c3   :  { %6429 = vmatpush1.bf16.msra.mxu0 %v8249_v20  ;;  %v8284_v20 = vld [vmem:[#allocation27 + $0x15c] ss:$28 sps:$4 sm:$0xff]  }
 0x5c4   :  { %6593 = vmatpush1.bf16.msra.mxu1 %v8252_v21  ;;  %6430 = vmatprep.subr.bf16.mxu0 %v8257_v27 }
 0x5c5   :  { %6594 = vmatprep.subr.bf16.mxu1 %v8260_v28 }
 0x5c7   :  { %6431 = vmatpush1.bf16.msra.mxu0 %v8255_v35 }
 0x611   :  { %v2985_v44 = vpop.f32.mrb[4].mxu0  ;;  %v3067_v3 = vpop.f32.mrb[12].mxu1 }
 0x612   :  { %v8017_v47 = vadd.f32 %v2985_v44, %v1593_v37  ;;  %v8019_v48 = vadd.f32 %v3067_v3, %v1601_v40  ;;  %v2987_v46 = vpop.f32.mrb[5].mxu0  ;;  %v3069_v8 = vpop.f32.mrb[13].mxu1  ;;  %v8258_v37 = vld [vmem:[#allocation27 + $0x78] ss:$28 sps:$4 sm:$0xff]  }
 0x613   :  { %v8018_v49 = vadd.f32 %v2987_v46, %v1597_v42  ;;  %v8020_v55 = vadd.f32 %v3069_v8, %v1605_v43  ;;  %v2989_v45 = vpop.f32.mrb[6].mxu0  ;;  %v3071_v53 = vpop.f32.mrb[14].mxu1  ;;  %6595 = vmatpush1.bf16.msra.mxu1 %v8258_v37  ;;  %v8266_v46 = vld [vmem:[#allocation27 + $0xb4] ss:$28 sps:$4 sm:$0xff]   ;;  %v8287_v37 = vld [vmem:[#allocation27 + $0x18c] ss:$28 sps:$4 sm:$0xff]  }
 0x614   :  { %v3238_v51 = vrot.slane %v8017_v47, 4  ;;  %v3250_v56 = vrot.slane %v8019_v48, 4  ;;  %v2990_v57 = vpop.f32.mrb[7].mxu0  ;;  %v3072_v58 = vpop.f32.mrb[15].mxu1  ;;  %v8264_v45 = vld [vmem:[#allocation27 + $0xb0] ss:$28 sps:$4 sm:$0xff]   ;;  %6596 = vmatprep.subr.bf16.mxu1 %v8266_v46 }
 0x615   :  { %v3244_v59 = vrot.slane %v8018_v49, 4  ;;  %v3256_v60 = vrot.slane %v8020_v55, 4  ;;  %v8291_v46 = vld [vmem:[#allocation27 + $0x1c0] ss:$28 sps:$4 sm:$0xff]  }
 0x616   :  { %v3239_v61 = vadd.f32 %v8017_v47, %v3238_v51  ;;  %v3251_v62 = vadd.f32 %v8019_v48, %v3250_v56 }
 0x617   :  { %v3245_v63 = vadd.f32 %v8018_v49, %v3244_v59  ;;  %v3257_v0 = vadd.f32 %v8020_v55, %v3256_v60  ;;  %6597 = vmatpush1.bf16.msra.mxu1 %v8264_v45  ;;  %v8269_v60 = vld [vmem:[#allocation27 + $0xe4] ss:$28 sps:$4 sm:$0xff]   ;;  %v8297_v45 = vld [vmem:[#allocation27 + $0x1f8] ss:$28 sps:$4 sm:$0xff]  }
 0x618   :  { %v3240_v1 = vrot.slane %v3239_v61, 2  ;;  %v3252_v2 = vrot.slane %v3251_v62, 2 }
 0x619   :  { %v3246_v4 = vrot.slane %v3245_v63, 2  ;;  %v3258_v5 = vrot.slane %v3257_v0, 2 }
 0x61a   :  { %v3241_v31 = vadd.f32 %v3240_v1, %v3239_v61  ;;  %v3253_v32 = vadd.f32 %v3252_v2, %v3251_v62  ;;  %v8272_v61 = vld [vmem:[#allocation27 + $0xec] ss:$28 sps:$4 sm:$0xff]  }
 0x61b   :  { %v3247_v39 = vadd.f32 %v3246_v4, %v3245_v63  ;;  %v3259_v7 = vadd.f32 %v3258_v5, %v3257_v0  ;;  %v8267_v0 = vld [vmem:[#allocation27 + $0xe0] ss:$28 sps:$4 sm:$0xff]   ;;  %v8270_v1 = vld [vmem:[#allocation27 + $0xe8] ss:$28 sps:$4 sm:$0xff]   ;;  %6598 = vmatprep.subr.bf16.mxu1 %v8272_v61  ;;  %v8306_v61 = vld [vmem:[#allocation27 + $0x238] ss:$28 sps:$4 sm:$0xff]  }
 0x61c   :  { %v3242_v9 = vrot.slane %v3241_v31, 1  ;;  %v3254_v10 = vrot.slane %v3253_v32, 1  ;;  %6599 = vmatpush1.bf16.msra.mxu1 %v8270_v1 }
 0x61d   :  { %v3248_v11 = vrot.slane %v3247_v39, 1  ;;  %v3260_v12 = vrot.slane %v3259_v7, 1  ;;  %6600 = vmatprep.subr.bf16.mxu1 %v8278_v36  ;;  %v8320_v36 = vld [vmem:[#allocation27 + $0x2ac] ss:$28 sps:$4 sm:$0xff]  }
 0x61e   :  { %v3243_v17 = vadd.f32 %v3242_v9, %v3241_v31  ;;  %v3255_v18 = vadd.f32 %v3254_v10, %v3253_v32  ;;  %v8275_v32 = vld [vmem:[#allocation27 + $0x11c] ss:$28 sps:$4 sm:$0xff]  }
 0x61f   :  { %v3249_v22 = vadd.f32 %v3248_v11, %v3247_v39  ;;  %v3261_v23 = vadd.f32 %v3260_v12, %v3259_v7  ;;  %v8273_v7 = vld [vmem:[#allocation27 + $0x118] ss:$28 sps:$4 sm:$0xff]   ;;  %v8276_v9 = vld [vmem:[#allocation27 + $0x120] ss:$28 sps:$4 sm:$0xff]  }
 0x620   :  { %v3286_v24 = vmul.f32 0.125, %v3243_v17  ;;  %v3288_v13 = vmul.f32 0.125, %v3255_v18  ;;  %6601 = vmatpush1.bf16.msra.mxu1 %v8276_v9  ;;  %v8281_v18 = vld [vmem:[#allocation27 + $0x154] ss:$28 sps:$4 sm:$0xff]   ;;  %v8326_v9 = vld [vmem:[#allocation27 + $0x2e4] ss:$28 sps:$4 sm:$0xff]  }
 0x621   :  { %v3287_v25 = vmul.f32 0.125, %v3249_v22  ;;  %v3289_v26 = vmul.f32 0.125, %v3261_v23  ;;  %v8279_v23 = vld [vmem:[#allocation27 + $0x150] ss:$28 sps:$4 sm:$0xff]   ;;  %6602 = vmatprep.subr.bf16.mxu1 %v8284_v20 }
 0x622   :  { %v9816_v29 = vsub.f32 %v8017_v47, %v3286_v24  ;;  %v9818_v33 = vsub.f32 %v8019_v48, %v3288_v13  ;;  %v8263_v48 = vld [vmem:[#allocation27 + $0xac] ss:$28 sps:$4 sm:$0xff]   ;;  %v8282_v24 = vld [vmem:[#allocation27 + $0x158] ss:$28 sps:$4 sm:$0xff]  }
 0x623   :  { %v9820_v40 = vsub.f32 %v8018_v49, %v3287_v25  ;;  %v9822_v42 = vsub.f32 %v8020_v55, %v3289_v26  ;;  %v8261_v55 = vld [vmem:[#allocation27 + $0xa8] ss:$28 sps:$4 sm:$0xff]   ;;  %6432 = vmatprep.subr.bf16.mxu0 %v8263_v48 }
 0x624   :  { %v3302_v43 = vmul.f32 %v9816_v29, %v9816_v29  ;;  %v3304_v44 = vmul.f32 %v9818_v33, %v9818_v33  ;;  %6433 = vmatpush1.bf16.msra.mxu0 %v8261_v55  ;;  %6603 = vmatpush1.bf16.msra.mxu1 %v8282_v24  ;;  %v8296_v48 = vld [vmem:[#allocation27 + $0x1cc] ss:$28 sps:$4 sm:$0xff]   ;;  %v8302_v55 = vld [vmem:[#allocation27 + $0x204] ss:$28 sps:$4 sm:$0xff]  }
 0x625   :  { %v3303_v3 = vmul.f32 %v9820_v40, %v9820_v40  ;;  %v3305_v47 = vmul.f32 %v9822_v42, %v9822_v42  ;;  %6434 = vmatprep.subr.bf16.mxu0 %v8269_v60  ;;  %v8303_v60 = vld [vmem:[#allocation27 + $0x230] ss:$28 sps:$4 sm:$0xff]  }
 0x626   :  { %v3310_v8 = vrot.slane %v3302_v43, 4  ;;  %v3322_v49 = vrot.slane %v3304_v44, 4  ;;  %v8335_v20 = vld [vmem:[#allocation27 + $0x34c] ss:$28 sps:$4 sm:$0xff]  }
 0x627   :  { %v3316_v53 = vrot.slane %v3303_v3, 4  ;;  %v3328_v51 = vrot.slane %v3305_v47, 4  ;;  %v8344_v24 = vld [vmem:[#allocation27 + $0x38c] ss:$28 sps:$4 sm:$0xff]  }
 0x628   :  { %v3311_v56 = vadd.f32 %v3310_v8, %v3302_v43  ;;  %v3323_v57 = vadd.f32 %v3322_v49, %v3304_v44  ;;  %6435 = vmatpush1.bf16.msra.mxu0 %v8267_v0  ;;  %v8285_v43 = vld [vmem:[#allocation27 + $0x188] ss:$28 sps:$4 sm:$0xff]   ;;  %v8288_v44 = vld [vmem:[#allocation27 + $0x190] ss:$28 sps:$4 sm:$0xff]   ;;  %v8299_v49 = vld [vmem:[#allocation27 + $0x1fc] ss:$28 sps:$4 sm:$0xff]  }
 0x629   :  { %v3317_v58 = vadd.f32 %v3316_v53, %v3303_v3  ;;  %v3329_v59 = vadd.f32 %v3328_v51, %v3305_v47  ;;  %6436 = vmatprep.subr.bf16.mxu0 %v8275_v32  ;;  %v8290_v3 = vld [vmem:[#allocation27 + $0x194] ss:$28 sps:$4 sm:$0xff]   ;;  %v8293_v47 = vld [vmem:[#allocation27 + $0x1c4] ss:$28 sps:$4 sm:$0xff]  }
 0x62a   :  { %v3312_v62 = vrot.slane %v3311_v56, 2  ;;  %v3324_v63 = vrot.slane %v3323_v57, 2  ;;  %6604 = vmatprep.subr.bf16.mxu1 %v8290_v3  ;;  %v8294_v8 = vld [vmem:[#allocation27 + $0x1c8] ss:$28 sps:$4 sm:$0xff]   ;;  %v8300_v53 = vld [vmem:[#allocation27 + $0x200] ss:$28 sps:$4 sm:$0xff]  }
 0x62b   :  { %v3318_v2 = vrot.slane %v3317_v58, 2  ;;  %v3330_v4 = vrot.slane %v3329_v59, 2  ;;  %6605 = vmatpush1.bf16.msra.mxu1 %v8288_v44  ;;  %v8317_v32 = vld [vmem:[#allocation27 + $0x2a4] ss:$28 sps:$4 sm:$0xff]  }
 0x62c   :  { %v3313_v5 = vadd.f32 %v3312_v62, %v3311_v56  ;;  %v3325_v6 = vadd.f32 %v3324_v63, %v3323_v57  ;;  %6437 = vmatpush1.bf16.msra.mxu0 %v8273_v7  ;;  %6606 = vmatprep.subr.bf16.mxu1 %v8296_v48  ;;  %v8305_v57 = vld [vmem:[#allocation27 + $0x234] ss:$28 sps:$4 sm:$0xff]   ;;  %v8323_v7 = vld [vmem:[#allocation27 + $0x2dc] ss:$28 sps:$4 sm:$0xff]  }
 0x62d   :  { %v3319_v30 = vadd.f32 %v3318_v2, %v3317_v58  ;;  %v3331_v31 = vadd.f32 %v3330_v4, %v3329_v59  ;;  %6438 = vmatprep.subr.bf16.mxu0 %v8281_v18  ;;  %v8308_v58 = vld [vmem:[#allocation27 + $0x23c] ss:$28 sps:$4 sm:$0xff]   ;;  %v8311_v2 = vld [vmem:[#allocation27 + $0x26c] ss:$28 sps:$4 sm:$0xff]   ;;  %v8314_v4 = vld [vmem:[#allocation27 + $0x274] ss:$28 sps:$4 sm:$0xff]  }
 0x62e   :  { %v3314_v38 = vrot.slane %v3313_v5, 1  ;;  %v3326_v39 = vrot.slane %v3325_v6, 1  ;;  %v8333_v18 = vld [vmem:[#allocation27 + $0x348] ss:$28 sps:$4 sm:$0xff]  }
 0x62f   :  { %v3320_v10 = vrot.slane %v3319_v30, 1  ;;  %v3332_v11 = vrot.slane %v3331_v31, 1  ;;  %6607 = vmatpush1.bf16.msra.mxu1 %v8294_v8 }
 0x630   :  { %v3315_v12 = vadd.f32 %v3314_v38, %v3313_v5  ;;  %v3327_v16 = vadd.f32 %v3326_v39, %v3325_v6  ;;  %6439 = vmatpush1.bf16.msra.mxu0 %v8279_v23  ;;  %6608 = vmatprep.subr.bf16.mxu1 %v8302_v55  ;;  %v8309_v6 = vld [vmem:[#allocation27 + $0x268] ss:$28 sps:$4 sm:$0xff]   ;;  %v8315_v38 = vld [vmem:[#allocation27 + $0x2a0] ss:$28 sps:$4 sm:$0xff]  }
 0x631   :  { %v3321_v41 = vadd.f32 %v3320_v10, %v3319_v30  ;;  %v3333_v17 = vadd.f32 %v3332_v11, %v3331_v31  ;;  %6440 = vmatprep.subr.bf16.mxu0 %v8287_v37  ;;  %v8312_v30 = vld [vmem:[#allocation27 + $0x270] ss:$28 sps:$4 sm:$0xff]   ;;  %v8318_v39 = vld [vmem:[#allocation27 + $0x2a8] ss:$28 sps:$4 sm:$0xff]   ;;  %v8321_v10 = vld [vmem:[#allocation27 + $0x2d8] ss:$28 sps:$4 sm:$0xff]  }
 0x632   :  { %v3358_v21 = vmul.f32 0.125, %v3315_v12  ;;  %v3360_v22 = vmul.f32 0.125, %v3327_v16  ;;  %v8324_v11 = vld [vmem:[#allocation27 + $0x2e0] ss:$28 sps:$4 sm:$0xff]   ;;  %v8329_v12 = vld [vmem:[#allocation27 + $0x314] ss:$28 sps:$4 sm:$0xff]  }
 0x633   :  { %v3359_v13 = vmul.f32 0.125, %v3321_v41  ;;  %v3361_v25 = vmul.f32 0.125, %v3333_v17  ;;  %6609 = vmatpush1.bf16.msra.mxu1 %v8300_v53  ;;  %v8332_v16 = vld [vmem:[#allocation27 + $0x31c] ss:$28 sps:$4 sm:$0xff]   ;;  %v8327_v41 = vld [vmem:[#allocation27 + $0x310] ss:$28 sps:$4 sm:$0xff]  }
 0x634   :  { %v3367_v26 = vadd.f32 1e-05, %v3358_v21  ;;  %v3369_v27 = vadd.f32 1e-05, %v3360_v22  ;;  %6441 = vmatpush1.bf16.msra.mxu0 %v8285_v43  ;;  %6610 = vmatprep.subr.bf16.mxu1 %v8308_v58  ;;  %v8330_v17 = vld [vmem:[#allocation27 + $0x318] ss:$28 sps:$4 sm:$0xff]  }
 0x635   :  { %v3368_v28 = vadd.f32 1e-05, %v3359_v13  ;;  %v3370_v35 = vadd.f32 1e-05, %v3361_v25  ;;  %6442 = vmatprep.subr.bf16.mxu0 %v8293_v47  ;;  %v8336_v21 = vld [vmem:[#allocation27 + $0x350] ss:$28 sps:$4 sm:$0xff]  }
 0x636   :  { %8897 = vrsqrt.f32 %v3367_v26  ;;  %v8338_v22 = vld [vmem:[#allocation27 + $0x354] ss:$28 sps:$4 sm:$0xff]   ;;  %v8341_v23 = vld [vmem:[#allocation27 + $0x384] ss:$28 sps:$4 sm:$0xff]   ;;  %v9841_v13 = vsub.s32 4, %v9694_v52  ;;  %v9844_v25 = vsub.s32 6, %v9694_v52 }
 0x637   :  { %8899 = vrsqrt.f32 %v3369_v27  ;;  %6611 = vmatpush1.bf16.msra.mxu1 %v8306_v61  ;;  %v9847_v26 = vsub.s32 5, %v9694_v52  ;;  %v9850_v27 = vsub.s32 7, %v9694_v52 }
 0x638   :  { %8901 = vrsqrt.f32 %v3368_v28  ;;  %6443 = vmatpush1.bf16.msra.mxu0 %v8291_v46  ;;  %6612 = vmatprep.subr.bf16.mxu1 %v8314_v4  ;;  %v1609_v28 = vrot.slane %v9806_v50, %v9841_v13 }
 0x639   :  { %8903 = vrsqrt.f32 %v3370_v35  ;;  %6444 = vmatprep.subr.bf16.mxu0 %v8299_v49  ;;  %v1617_v35 = vrot.slane %v9806_v50, %v9844_v25  ;;  %v1613_v37 = vrot.slane %v9806_v50, %v9847_v26  ;;  %v1621_v43 = vrot.slane %v9806_v50, %v9850_v27 }
 0x63b   :  { %6613 = vmatpush1.bf16.msra.mxu1 %v8312_v30 }
 0x63c   :  { %6445 = vmatpush1.bf16.msra.mxu0 %v8297_v45  ;;  %6614 = vmatprep.subr.bf16.mxu1 %v8320_v36 }
 0x63d   :  { %6446 = vmatprep.subr.bf16.mxu0 %v8305_v57 }
 0x63f   :  { %6615 = vmatpush1.bf16.msra.mxu1 %v8318_v39 }
 0x640   :  { %v8898_v51 = vpop.eup %8897  ;;  %6447 = vmatpush1.bf16.msra.mxu0 %v8303_v60  ;;  %6616 = vmatprep.subr.bf16.mxu1 %v8326_v9 }
 0x641   :  { %v8900_v56 = vpop.eup %8899  ;;  %6448 = vmatprep.subr.bf16.mxu0 %v8311_v2 }
 0x642   :  { %v8902_v59 = vpop.eup %8901 }
 0x643   :  { %v8904_v62 = vpop.eup %8903  ;;  %v3391_v63 = vcombine.low %v8898_v51, %v8902_v59  ;;  %6617 = vmatpush1.bf16.msra.mxu1 %v8324_v11 }
 0x644   :  { %v3392_v0 = vcombine.low %v8900_v56, %v8904_v62  ;;  %6449 = vmatpush1.bf16.msra.mxu0 %v8309_v6  ;;  %6618 = vmatprep.subr.bf16.mxu1 %v8332_v16 }
 0x645   :  { %v9833_v1 = vrot.slane %v3391_v63, %v9706_v19  ;;  %6450 = vmatprep.subr.bf16.mxu0 %v8317_v32 }
 0x646   :  { %v9836_v5 = vrot.slane %v3392_v0, %v9706_v19 }
 0x647   :  { %6619 = vmatpush1.bf16.msra.mxu1 %v8330_v17 }
 0x648   :  { %v3423_v31 = vcombine.low %v9833_v1, %v9836_v5  ;;  %6451 = vmatpush1.bf16.msra.mxu0 %v8315_v38  ;;  %6620 = vmatprep.subr.bf16.mxu1 %v8338_v22 }
 0x649   :  { %6452 = vmatprep.subr.bf16.mxu0 %v8323_v7 }
 0x64b   :  { %6621 = vmatpush1.bf16.msra.mxu1 %v8336_v21 }
 0x64c   :  { %6453 = vmatpush1.bf16.msra.mxu0 %v8321_v10  ;;  %6631 = vmatprep.subr.bf16.mxu1 %v8344_v24 }
 0x64d   :  { %6454 = vmatprep.subr.bf16.mxu0 %v8329_v12 }
 0x650   :  { %6455 = vmatpush1.bf16.msra.mxu0 %v8327_v41 }
 0x651   :  { %6456 = vmatprep.subr.bf16.mxu0 %v8335_v20 }
 0x654   :  { %6457 = vmatpush1.bf16.msra.mxu0 %v8333_v18 }
 0x655   :  { %6467 = vmatprep.subr.bf16.mxu0 %v8341_v23 }
 0x691   :  { %v3149_v44 = vpop.f32.mrb[8].mxu0 }
 0x692   :  { %v8021_v3 = vadd.f32 %v3149_v44, %v1609_v28  ;;  %v3231_v47 = vpop.f32.mrb[16].mxu1  ;;  %v3151_v48 = vpop.f32.mrb[9].mxu0 }
 0x693   :  { %v8023_v46 = vadd.f32 %v3231_v47, %v1617_v35  ;;  %v8022_v8 = vadd.f32 %v3151_v48, %v1613_v37  ;;  %v3233_v52 = vpop.f32.mrb[17].mxu1  ;;  %v3153_v49 = vpop.f32.mrb[10].mxu0 }
 0x694   :  { %v3262_v55 = vrot.slane %v8021_v3, 4  ;;  %v8024_v45 = vadd.f32 %v3233_v52, %v1621_v43  ;;  %v3235_v53 = vpop.f32.mrb[18].mxu1  ;;  %v3154_v51 = vpop.f32.mrb[11].mxu0 }
 0x695   :  { %v3274_v56 = vrot.slane %v8023_v46, 4  ;;  %v3268_v57 = vrot.slane %v8022_v8, 4  ;;  %v3236_v58 = vpop.f32.mrb[19].mxu1 }
 0x696   :  { %v3263_v59 = vadd.f32 %v8021_v3, %v3262_v55  ;;  %v3280_v60 = vrot.slane %v8024_v45, 4 }
 0x697   :  { %v3275_v61 = vadd.f32 %v8023_v46, %v3274_v56  ;;  %v3269_v62 = vadd.f32 %v8022_v8, %v3268_v57 }
 0x698   :  { %v3264_v50 = vrot.slane %v3263_v59, 2  ;;  %v3281_v63 = vadd.f32 %v8024_v45, %v3280_v60 }
 0x699   :  { %v3276_v0 = vrot.slane %v3275_v61, 2  ;;  %v3270_v2 = vrot.slane %v3269_v62, 2 }
 0x69a   :  { %v3265_v4 = vadd.f32 %v3264_v50, %v3263_v59  ;;  %v3282_v6 = vrot.slane %v3281_v63, 2 }
 0x69b   :  { %v3277_v30 = vadd.f32 %v3276_v0, %v3275_v61  ;;  %v3271_v32 = vadd.f32 %v3270_v2, %v3269_v62 }
 0x69c   :  { %v3266_v36 = vrot.slane %v3265_v4, 1  ;;  %v3283_v38 = vadd.f32 %v3282_v6, %v3281_v63 }
 0x69d   :  { %v3278_v39 = vrot.slane %v3277_v30, 1  ;;  %v3272_v7 = vrot.slane %v3271_v32, 1 }
 0x69e   :  { %v3267_v9 = vadd.f32 %v3266_v36, %v3265_v4  ;;  %v3284_v10 = vrot.slane %v3283_v38, 1 }
 0x69f   :  { %v3279_v11 = vadd.f32 %v3278_v39, %v3277_v30  ;;  %v3273_v12 = vadd.f32 %v3272_v7, %v3271_v32 }
 0x6a0   :  { %v3290_v16 = vmul.f32 0.125, %v3267_v9  ;;  %v3285_v41 = vadd.f32 %v3284_v10, %v3283_v38 }
 0x6a1   :  { %v3292_v17 = vmul.f32 0.125, %v3279_v11  ;;  %v3291_v18 = vmul.f32 0.125, %v3273_v12 }
 0x6a2   :  { %v9860_v20 = vsub.f32 %v8021_v3, %v3290_v16  ;;  %v3293_v21 = vmul.f32 0.125, %v3285_v41 }
 0x6a3   :  { %v9862_v22 = vsub.f32 %v8023_v46, %v3292_v17  ;;  %v9864_v23 = vsub.f32 %v8022_v8, %v3291_v18 }
 0x6a4   :  { %v3306_v24 = vmul.f32 %v9860_v20, %v9860_v20  ;;  %v9868_v28 = vsub.f32 %v8024_v45, %v3293_v21 }
 0x6a5   :  { %v3308_v35 = vmul.f32 %v9862_v22, %v9862_v22  ;;  %v3307_v37 = vmul.f32 %v9864_v23, %v9864_v23 }
 0x6a6   :  { %v3334_v43 = vrot.slane %v3306_v24, 4  ;;  %v3309_v44 = vmul.f32 %v9868_v28, %v9868_v28 }
 0x6a7   :  { %v3346_v3 = vrot.slane %v3308_v35, 4  ;;  %v3340_v47 = vrot.slane %v3307_v37, 4 }
 0x6a8   :  { %v3335_v48 = vadd.f32 %v3334_v43, %v3306_v24  ;;  %v3352_v46 = vrot.slane %v3309_v44, 4  ;;  %v3491_v43 = vld [vmem:[#allocation25] sm:$0xff] }
 0x6a9   :  { %v3347_v8 = vadd.f32 %v3346_v3, %v3308_v35  ;;  %v3341_v52 = vadd.f32 %v3340_v47, %v3307_v37  ;;  %v3431_v35 = vrot.slane %v3423_v31, %v9706_v19  ;;  %v3524_v47 = vrot.slane %v3491_v43, %v9850_v27 }
 0x6aa   :  { %v3336_v49 = vrot.slane %v3335_v48, 2  ;;  %v3353_v55 = vadd.f32 %v3352_v46, %v3309_v44  ;;  %v3366_v44 = vld [vmem:[#allocation24] sm:$0xff]  ;;  %v3500_v46 = vrot.slane %v3491_v43, %v9701_v34  ;;  %v3512_v1 = vrot.slane %v3491_v43, %v9841_v13 }
 0x6ab   :  { %v3348_v45 = vrot.slane %v3347_v8, 2  ;;  %v3342_v53 = vrot.slane %v3341_v52, 2 }
 0x6ac   :  { %v3337_v51 = vadd.f32 %v3336_v49, %v3335_v48  ;;  %v3354_v56 = vrot.slane %v3353_v55, 2  ;;  %v3504_v49 = vrot.slane %v3491_v43, %v9749_v14 }
 0x6ad   :  { %v3349_v57 = vadd.f32 %v3348_v45, %v3347_v8  ;;  %v3343_v58 = vadd.f32 %v3342_v53, %v3341_v52  ;;  %v3496_v8 = vrot.slane %v3491_v43, %v9697_v54  ;;  %v3508_v52 = vrot.slane %v3491_v43, %v9752_v15 }
 0x6ae   :  { %v3338_v59 = vrot.slane %v3337_v51, 1  ;;  %v3355_v60 = vadd.f32 %v3354_v56, %v3353_v55  ;;  %v3516_v55 = vrot.slane %v3491_v43, %v9847_v26 }
 0x6af   :  { %v3350_v61 = vrot.slane %v3349_v57, 1  ;;  %v3344_v62 = vrot.slane %v3343_v58, 1 }
 0x6b0   :  { %v3339_v50 = vadd.f32 %v3338_v59, %v3337_v51  ;;  %v3356_v63 = vrot.slane %v3355_v60, 1 }
 0x6b1   :  { %v3351_v0 = vadd.f32 %v3350_v61, %v3349_v57  ;;  %v3345_v2 = vadd.f32 %v3344_v62, %v3343_v58 }
 0x6b2   :  { %v3362_v4 = vmul.f32 0.125, %v3339_v50  ;;  %v3357_v6 = vadd.f32 %v3356_v63, %v3355_v60 }
 0x6b3   :  { %v3364_v30 = vmul.f32 0.125, %v3351_v0  ;;  %v3363_v32 = vmul.f32 0.125, %v3345_v2 }
 0x6b4   :  { %v3371_v36 = vadd.f32 1e-05, %v3362_v4  ;;  %v3365_v38 = vmul.f32 0.125, %v3357_v6 }
 0x6b5   :  { %v3373_v39 = vadd.f32 1e-05, %v3364_v30  ;;  %v3372_v7 = vadd.f32 1e-05, %v3363_v32 }
 0x6b6   :  { %8905 = vrsqrt.f32 %v3371_v36  ;;  %v3374_v9 = vadd.f32 1e-05, %v3365_v38  ;;  %v8339_v38 = vld [vmem:[#allocation27 + $0x380] ss:$28 sps:$4 sm:$0xff]  }
 0x6b7   :  { %8907 = vrsqrt.f32 %v3373_v39  ;;  %v8342_v39 = vld [vmem:[#allocation27 + $0x388] ss:$28 sps:$4 sm:$0xff]  }
 0x6b8   :  { %8909 = vrsqrt.f32 %v3372_v7 }
 0x6b9   :  { %8911 = vrsqrt.f32 %v3374_v9 }
 0x6c0   :  { %v8906_v10 = vpop.eup %8905 }
 0x6c1   :  { %v8908_v11 = vpop.eup %8907 }
 0x6c2   :  { %v8910_v12 = vpop.eup %8909 }
 0x6c3   :  { %v8912_v16 = vpop.eup %8911  ;;  %v3393_v41 = vcombine.low %v8906_v10, %v8910_v12  ;;  %v8347_v10 = vld [vmem:[#allocation27 + $0x3bc] ss:$28 sps:$4 sm:$0xff]  }
 0x6c4   :  { %v3394_v17 = vcombine.low %v8908_v11, %v8912_v16  ;;  %v8350_v11 = vld [vmem:[#allocation27 + $0x3c4] ss:$28 sps:$4 sm:$0xff]   ;;  %v8345_v16 = vld [vmem:[#allocation27 + $0x3b8] ss:$28 sps:$4 sm:$0xff]  }
 0x6c5   :  { %v3415_v18 = vrot.slane %v3393_v41, %v9706_v19  ;;  %v8348_v41 = vld [vmem:[#allocation27 + $0x3c0] ss:$28 sps:$4 sm:$0xff]  }
 0x6c6   :  { %v3422_v21 = vrot.slane %v3394_v17, %v9706_v19  ;;  %v8353_v17 = vld [vmem:[#allocation27 + $0x3f4] ss:$28 sps:$4 sm:$0xff]  }
 0x6c8   :  { %v3424_v24 = vcombine.low %v3415_v18, %v3422_v21  ;;  %v8356_v18 = vld [vmem:[#allocation27 + $0x3fc] ss:$28 sps:$4 sm:$0xff]   ;;  %v8351_v21 = vld [vmem:[#allocation27 + $0x3f0] ss:$28 sps:$4 sm:$0xff]  }
 0x6ca   :  { %v3438_v37 = vrot.slane %v3424_v24, %v9706_v19  ;;  %v3520_v19 = vrot.slane %v3491_v43, %v9844_v25  ;;  %v8354_v24 = vld [vmem:[#allocation27 + $0x3f8] ss:$28 sps:$4 sm:$0xff]   ;;  %v8357_v43 = vld [vmem:[#allocation27 + $0x428] ss:$28 sps:$4 sm:$0xff]  }
 0x6cc   :  { %v3439_v3 = vcombine.low %v3431_v35, %v3438_v37  ;;  %v8359_v35 = vld [vmem:[#allocation27 + $0x42c] ss:$28 sps:$4 sm:$0xff]   ;;  %v8362_v37 = vld [vmem:[#allocation27 + $0x434] ss:$28 sps:$4 sm:$0xff]  }
 0x6ce   :  { %v3441_v48 = vmul.f32 %v3439_v3, %v3366_v44  ;;  %v8360_v44 = vld [vmem:[#allocation27 + $0x430] ss:$28 sps:$4 sm:$0xff]   ;;  %v8365_v3 = vld [vmem:[#allocation27 + $0x464] ss:$28 sps:$4 sm:$0xff]  }
 0x6d0   :  { %v3474_v5 = vrot.slane %v3441_v48, %v9850_v27  ;;  %v3450_v31 = vrot.slane %v3441_v48, %v9701_v34  ;;  %v3446_v45 = vrot.slane %v3441_v48, %v9697_v54  ;;  %v3458_v53 = vrot.slane %v3441_v48, %v9752_v15 }
 0x6d1   :  { %v3454_v51 = vrot.slane %v3441_v48, %v9749_v14  ;;  %v3466_v56 = vrot.slane %v3441_v48, %v9847_v26  ;;  %v3462_v57 = vrot.slane %v3441_v48, %v9841_v13  ;;  %v3470_v58 = vrot.slane %v3441_v48, %v9844_v25  ;;  %v8363_v48 = vld [vmem:[#allocation27 + $0x460] ss:$28 sps:$4 sm:$0xff]  }
 0x6d2   :  { %v3490_v59 = vmul.f32 %v3474_v5, %v9868_v28  ;;  %v3484_v60 = vmul.f32 %v3450_v31, %v9820_v40  ;;  %v3483_v27 = vmul.f32 %v3446_v45, %v9816_v29  ;;  %v3486_v61 = vmul.f32 %v3458_v53, %v9822_v42  ;;  %v8375_v5 = vld [vmem:[#allocation27 + $0x4d0] ss:$28 sps:$4 sm:$0xff]   ;;  %v8378_v31 = vld [vmem:[#allocation27 + $0x4d8] ss:$28 sps:$4 sm:$0xff]  }
 0x6d3   :  { %v3485_v62 = vmul.f32 %v3454_v51, %v9818_v33  ;;  %v3488_v50 = vmul.f32 %v3466_v56, %v9864_v23  ;;  %v3487_v63 = vmul.f32 %v3462_v57, %v9860_v20  ;;  %v3489_v0 = vmul.f32 %v3470_v58, %v9862_v22  ;;  %v8383_v45 = vld [vmem:[#allocation27 + $0x50c] ss:$28 sps:$4 sm:$0xff]   ;;  %v8386_v53 = vld [vmem:[#allocation27 + $0x514] ss:$28 sps:$4 sm:$0xff]   ;;  %v8389_v57 = vld [vmem:[#allocation27 + $0x544] ss:$28 sps:$4 sm:$0xff]  }
 0x6d4   :  { %v9907_v2 = vadd.f32 %v3524_v47, %v3490_v59  ;;  %v3534_v4 = vadd.f32 %v3500_v46, %v3484_v60  ;;  %v3533_v6 = vadd.f32 %v3496_v8, %v3483_v27  ;;  %v3536_v30 = vadd.f32 %v3508_v52, %v3486_v61  ;;  %v8368_v47 = vld [vmem:[#allocation27 + $0x46c] ss:$28 sps:$4 sm:$0xff]   ;;  %v8371_v8 = vld [vmem:[#allocation27 + $0x49c] ss:$28 sps:$4 sm:$0xff]   ;;  %v8374_v52 = vld [vmem:[#allocation27 + $0x4a4] ss:$28 sps:$4 sm:$0xff]  }
 0x6d5   :  { %v9909_v28 = vadd.f32 %v3504_v49, %v3485_v62  ;;  %v9911_v40 = vadd.f32 %v3516_v55, %v3488_v50  ;;  %v9913_v29 = vadd.f32 %v3512_v1, %v3487_v63  ;;  %v9915_v42 = vadd.f32 %v3520_v19, %v3489_v0  ;;  %v8366_v46 = vld [vmem:[#allocation27 + $0x468] ss:$28 sps:$4 sm:$0xff]   ;;  %v8369_v49 = vld [vmem:[#allocation27 + $0x498] ss:$28 sps:$4 sm:$0xff]   ;;  %v8372_v55 = vld [vmem:[#allocation27 + $0x4a0] ss:$28 sps:$4 sm:$0xff]  }
 0x6d6   :  { %vm3542_vm8 = vcmp.gt.f32.partialorder %v3534_v4, 0.0  ;;  %v3550_v33 = vmul.f32 0.2, %v3534_v4  ;;  %vm3541_vm9 = vcmp.gt.f32.partialorder %v3533_v6, 0.0  ;;  %v3549_v23 = vmul.f32 0.2, %v3533_v6 }
 0x6d7   :  { %vm3544_vm10 = vcmp.gt.f32.partialorder %v3536_v30, 0.0  ;;  %v3552_v20 = vmul.f32 0.2, %v3536_v30  ;;  %v8377_v1 = vld [vmem:[#allocation27 + $0x4d4] ss:$28 sps:$4 sm:$0xff]   ;;  %vm3543_vm11 = vcmp.gt.f32.partialorder %v9909_v28, 0.0 }
 0x6d8   :  { %v3558_v22 = vsel %vm3542_vm8, %v3534_v4, %v3550_v33  ;;  %v3557_v32 = vsel %vm3541_vm9, %v3533_v6, %v3549_v23  ;;  %v8380_v19 = vld [vmem:[#allocation27 + $0x4dc] ss:$28 sps:$4 sm:$0xff]   ;;  %v8381_v51 = vld [vmem:[#allocation27 + $0x508] ss:$28 sps:$4 sm:$0xff]   ;;  %v8384_v56 = vld [vmem:[#allocation27 + $0x510] ss:$28 sps:$4 sm:$0xff]  }
 0x6d9   :  { %v9917_v36 = vpack.c.bf16 %v3558_v22, %v3558_v22  ;;  %v9919_v7 = vpack.c.bf16 %v3557_v32, %v3557_v32  ;;  %v3560_v9 = vsel %vm3544_vm10, %v3536_v30, %v3552_v20  ;;  %v8392_v58 = vld [vmem:[#allocation27 + $0x54c] ss:$28 sps:$4 sm:$0xff]   ;;  %v8387_v59 = vld [vmem:[#allocation27 + $0x540] ss:$28 sps:$4 sm:$0xff]   ;;  %v8393_v62 = vld [vmem:[#allocation27 + $0x578] ss:$28 sps:$4 sm:$0xff]  }
 0x6da   :  { %v9925_v12 = vpack.c.bf16 %v3560_v9, %v3560_v9  ;;  %v8390_v60 = vld [vmem:[#allocation27 + $0x548] ss:$28 sps:$4 sm:$0xff]   ;;  %v8395_v27 = vld [vmem:[#allocation27 + $0x57c] ss:$28 sps:$4 sm:$0xff]   ;;  %v8401_v63 = vld [vmem:[#allocation27 + $0x5b4] ss:$28 sps:$4 sm:$0xff]  }
 0x6db   :  { %6458 = vmatprep.mubr.bf16.mxu0 %v9917_v36  ;;  %6622 = vmatprep.mubr.bf16.mxu1 %v9917_v36  ;;  %v8398_v61 = vld [vmem:[#allocation27 + $0x584] ss:$28 sps:$4 sm:$0xff]   ;;  %v8404_v0 = vld [vmem:[#allocation27 + $0x5bc] ss:$28 sps:$4 sm:$0xff]   ;;  %v8399_v4 = vld [vmem:[#allocation27 + $0x5b0] ss:$28 sps:$4 sm:$0xff]  }
 0x6dc   :  { %6459 = vmatmul.mubr.bf16.vlgmr.msra.gmra.mrb[12].mxu0 %v9919_v7  ;;  %6623 = vmatmul.mubr.bf16.vlgmr.msra.gmra.mrb[20].mxu1 %v9919_v7  ;;  %v8396_v50 = vld [vmem:[#allocation27 + $0x580] ss:$28 sps:$4 sm:$0xff]   ;;  %v8402_v6 = vld [vmem:[#allocation27 + $0x5b8] ss:$28 sps:$4 sm:$0xff]   ;;  %v8407_v30 = vld [vmem:[#allocation27 + $0x5ec] ss:$28 sps:$4 sm:$0xff]  }
 0x6dd   :  { %6468 = vmatpush1.bf16.msra.mxu0 %v8339_v38  ;;  %6632 = vmatpush1.bf16.msra.mxu1 %v8342_v39  ;;  %v8410_v33 = vld [vmem:[#allocation27 + $0x5f4] ss:$28 sps:$4 sm:$0xff]   ;;  %v8405_v23 = vld [vmem:[#allocation27 + $0x5e8] ss:$28 sps:$4 sm:$0xff]   ;;  %v8411_v38 = vld [vmem:[#allocation27 + $0x620] ss:$28 sps:$4 sm:$0xff]  }
 0x6de   :  { %6499 = vmatprep.mubr.bf16.mxu0 %v9925_v12  ;;  %6663 = vmatprep.mubr.bf16.mxu1 %v9925_v12  ;;  %v8408_v20 = vld [vmem:[#allocation27 + $0x5f0] ss:$28 sps:$4 sm:$0xff]   ;;  %v8413_v22 = vld [vmem:[#allocation27 + $0x624] ss:$28 sps:$4 sm:$0xff]   ;;  %v8419_v9 = vld [vmem:[#allocation27 + $0x65c] ss:$28 sps:$4 sm:$0xff]  }
 0x6df   :  { %6469 = vmatprep.subr.bf16.mxu0 %v8347_v10  ;;  %6633 = vmatprep.subr.bf16.mxu1 %v8350_v11  ;;  %v8416_v32 = vld [vmem:[#allocation27 + $0x62c] ss:$28 sps:$4 sm:$0xff]   ;;  %v8422_v10 = vld [vmem:[#allocation27 + $0x664] ss:$28 sps:$4 sm:$0xff]   ;;  %v8417_v11 = vld [vmem:[#allocation27 + $0x658] ss:$28 sps:$4 sm:$0xff]  }
 0x6e0   :  { %v8414_v39 = vld [vmem:[#allocation27 + $0x628] ss:$28 sps:$4 sm:$0xff]   ;;  %vm3546_vm12 = vcmp.gt.f32.partialorder %v9911_v40, 0.0  ;;  %vm3545_vm13 = vcmp.gt.f32.partialorder %v9913_v29, 0.0  ;;  %vm3548_vm14 = vcmp.gt.f32.partialorder %v9907_v2, 0.0  ;;  %vm3547_vm15 = vcmp.gt.f32.partialorder %v9915_v42, 0.0 }
 0x6e1   :  { %6470 = vmatpush1.bf16.msra.mxu0 %v8345_v16  ;;  %6634 = vmatpush1.bf16.msra.mxu1 %v8348_v41  ;;  %v8420_v16 = vld [vmem:[#allocation27 + $0x660] ss:$28 sps:$4 sm:$0xff]   ;;  %v8425_v41 = vld [vmem:[#allocation27 + $0x694] ss:$28 sps:$4 sm:$0xff]  }
 0x6e2   :  { %6471 = vmatprep.subr.bf16.mxu0 %v8353_v17  ;;  %6635 = vmatprep.subr.bf16.mxu1 %v8356_v18  ;;  %v8428_v17 = vld [vmem:[#allocation27 + $0x69c] ss:$28 sps:$4 sm:$0xff]   ;;  %v8423_v18 = vld [vmem:[#allocation27 + $0x690] ss:$28 sps:$4 sm:$0xff]  }
 0x6e5   :  { %6472 = vmatpush1.bf16.msra.mxu0 %v8351_v21  ;;  %6636 = vmatpush1.bf16.msra.mxu1 %v8354_v24  ;;  %v8426_v21 = vld [vmem:[#allocation27 + $0x698] ss:$28 sps:$4 sm:$0xff]   ;;  %v8431_v24 = vld [vmem:[#allocation27 + $0x6cc] ss:$28 sps:$4 sm:$0xff]  }
 0x6e6   :  { %6473 = vmatprep.subr.bf16.mxu0 %v8359_v35  ;;  %6637 = vmatprep.subr.bf16.mxu1 %v8362_v37  ;;  %v8434_v35 = vld [vmem:[#allocation27 + $0x6d4] ss:$28 sps:$4 sm:$0xff]   ;;  %v3551_v37 = vmul.f32 0.2, %v9909_v28 }
 0x6e9   :  { %6474 = vmatpush1.bf16.msra.mxu0 %v8357_v43  ;;  %6638 = vmatpush1.bf16.msra.mxu1 %v8360_v44  ;;  %v3554_v43 = vmul.f32 0.2, %v9911_v40  ;;  %v8429_v44 = vld [vmem:[#allocation27 + $0x6c8] ss:$28 sps:$4 sm:$0xff]  }
 0x6ea   :  { %6475 = vmatprep.subr.bf16.mxu0 %v8365_v3  ;;  %6639 = vmatprep.subr.bf16.mxu1 %v8368_v47  ;;  %v8432_v3 = vld [vmem:[#allocation27 + $0x6d0] ss:$28 sps:$4 sm:$0xff]   ;;  %v8437_v47 = vld [vmem:[#allocation27 + $0x704] ss:$28 sps:$4 sm:$0xff]  }
 0x6ed   :  { %6476 = vmatpush1.bf16.msra.mxu0 %v8363_v48  ;;  %6640 = vmatpush1.bf16.msra.mxu1 %v8366_v46  ;;  %v8440_v48 = vld [vmem:[#allocation27 + $0x70c] ss:$28 sps:$4 sm:$0xff]   ;;  %v3559_v46 = vsel %vm3543_vm11, %v9909_v28, %v3551_v37  ;;  %v8441_v28 = vld [vmem:[#allocation27 + $0x738] ss:$28 sps:$4 sm:$0xff]  }
 0x6ee   :  { %6477 = vmatprep.subr.bf16.mxu0 %v8371_v8  ;;  %6641 = vmatprep.subr.bf16.mxu1 %v8374_v52  ;;  %v3562_v8 = vsel %vm3546_vm12, %v9911_v40, %v3554_v43  ;;  %v8435_v52 = vld [vmem:[#allocation27 + $0x700] ss:$28 sps:$4 sm:$0xff]   ;;  %v8498_v37 = vld [vmem:[#allocation27 + $0x938] ss:$28 sps:$4 sm:$0xff]   ;;  %v8503_v43 = vld [vmem:[#allocation27 + $0x96c] ss:$28 sps:$4 sm:$0xff]  }
 0x6ef   :  { %v8444_v40 = vld [vmem:[#allocation27 + $0x740] ss:$28 sps:$4 sm:$0xff]  }
 0x6f1   :  { %6478 = vmatpush1.bf16.msra.mxu0 %v8369_v49  ;;  %6642 = vmatpush1.bf16.msra.mxu1 %v8372_v55  ;;  %v9935_v49 = vpack.c.bf16 %v3559_v46, %v3559_v46  ;;  %v8438_v55 = vld [vmem:[#allocation27 + $0x708] ss:$28 sps:$4 sm:$0xff]  }
 0x6f2   :  { %6479 = vmatprep.subr.bf16.mxu0 %v8377_v1  ;;  %6643 = vmatprep.subr.bf16.mxu1 %v8380_v19  ;;  %v9937_v1 = vpack.c.bf16 %v3562_v8, %v3562_v8  ;;  %v8443_v19 = vld [vmem:[#allocation27 + $0x73c] ss:$28 sps:$4 sm:$0xff]   ;;  %v8512_v46 = vld [vmem:[#allocation27 + $0x9ac] ss:$28 sps:$4 sm:$0xff]  }
 0x6f3   :  { %v8507_v8 = vld [vmem:[#allocation27 + $0x9a0] ss:$28 sps:$4 sm:$0xff]  }
 0x6f5   :  { %6480 = vmatpush1.bf16.msra.mxu0 %v8375_v5  ;;  %6644 = vmatpush1.bf16.msra.mxu1 %v8378_v31  ;;  %v8446_v5 = vld [vmem:[#allocation27 + $0x744] ss:$28 sps:$4 sm:$0xff]   ;;  %v8449_v31 = vld [vmem:[#allocation27 + $0x774] ss:$28 sps:$4 sm:$0xff]  }
 0x6f6   :  { %6481 = vmatprep.subr.bf16.mxu0 %v8383_v45  ;;  %6645 = vmatprep.subr.bf16.mxu1 %v8386_v53  ;;  %v8452_v45 = vld [vmem:[#allocation27 + $0x77c] ss:$28 sps:$4 sm:$0xff]   ;;  %v8447_v53 = vld [vmem:[#allocation27 + $0x770] ss:$28 sps:$4 sm:$0xff]  }
 0x6f9   :  { %6482 = vmatpush1.bf16.msra.mxu0 %v8381_v51  ;;  %6646 = vmatpush1.bf16.msra.mxu1 %v8384_v56  ;;  %v8450_v51 = vld [vmem:[#allocation27 + $0x778] ss:$28 sps:$4 sm:$0xff]   ;;  %v8455_v56 = vld [vmem:[#allocation27 + $0x7ac] ss:$28 sps:$4 sm:$0xff]  }
 0x6fa   :  { %6483 = vmatprep.subr.bf16.mxu0 %v8389_v57  ;;  %6647 = vmatprep.subr.bf16.mxu1 %v8392_v58  ;;  %v8458_v57 = vld [vmem:[#allocation27 + $0x7b4] ss:$28 sps:$4 sm:$0xff]   ;;  %v8453_v58 = vld [vmem:[#allocation27 + $0x7a8] ss:$28 sps:$4 sm:$0xff]  }
 0x6fd   :  { %6484 = vmatpush1.bf16.msra.mxu0 %v8387_v59  ;;  %6648 = vmatpush1.bf16.msra.mxu1 %v8390_v60  ;;  %v8456_v59 = vld [vmem:[#allocation27 + $0x7b0] ss:$28 sps:$4 sm:$0xff]   ;;  %v8461_v60 = vld [vmem:[#allocation27 + $0x7e4] ss:$28 sps:$4 sm:$0xff]  }
 0x6fe   :  { %6485 = vmatprep.subr.bf16.mxu0 %v8395_v27  ;;  %6649 = vmatprep.subr.bf16.mxu1 %v8398_v61  ;;  %v8464_v27 = vld [vmem:[#allocation27 + $0x7ec] ss:$28 sps:$4 sm:$0xff]   ;;  %v8459_v61 = vld [vmem:[#allocation27 + $0x7e0] ss:$28 sps:$4 sm:$0xff]  }
 0x701   :  { %6486 = vmatpush1.bf16.msra.mxu0 %v8393_v62  ;;  %6650 = vmatpush1.bf16.msra.mxu1 %v8396_v50  ;;  %v8462_v62 = vld [vmem:[#allocation27 + $0x7e8] ss:$28 sps:$4 sm:$0xff]   ;;  %v8467_v50 = vld [vmem:[#allocation27 + $0x81c] ss:$28 sps:$4 sm:$0xff]  }
 0x702   :  { %6487 = vmatprep.subr.bf16.mxu0 %v8401_v63  ;;  %6651 = vmatprep.subr.bf16.mxu1 %v8404_v0  ;;  %v8470_v63 = vld [vmem:[#allocation27 + $0x824] ss:$28 sps:$4 sm:$0xff]   ;;  %v8465_v0 = vld [vmem:[#allocation27 + $0x818] ss:$28 sps:$4 sm:$0xff]  }
 0x705   :  { %6488 = vmatpush1.bf16.msra.mxu0 %v8399_v4  ;;  %6652 = vmatpush1.bf16.msra.mxu1 %v8402_v6  ;;  %v8468_v4 = vld [vmem:[#allocation27 + $0x820] ss:$28 sps:$4 sm:$0xff]   ;;  %v8473_v6 = vld [vmem:[#allocation27 + $0x854] ss:$28 sps:$4 sm:$0xff]  }
 0x706   :  { %6489 = vmatprep.subr.bf16.mxu0 %v8407_v30  ;;  %6653 = vmatprep.subr.bf16.mxu1 %v8410_v33  ;;  %v8476_v30 = vld [vmem:[#allocation27 + $0x85c] ss:$28 sps:$4 sm:$0xff]   ;;  %v8471_v33 = vld [vmem:[#allocation27 + $0x850] ss:$28 sps:$4 sm:$0xff]  }
 0x709   :  { %6490 = vmatpush1.bf16.msra.mxu0 %v8405_v23  ;;  %6654 = vmatpush1.bf16.msra.mxu1 %v8408_v20  ;;  %v8474_v23 = vld [vmem:[#allocation27 + $0x858] ss:$28 sps:$4 sm:$0xff]   ;;  %v8479_v20 = vld [vmem:[#allocation27 + $0x88c] ss:$28 sps:$4 sm:$0xff]  }
 0x70a   :  { %6491 = vmatprep.subr.bf16.mxu0 %v8413_v22  ;;  %6655 = vmatprep.subr.bf16.mxu1 %v8416_v32  ;;  %v8482_v22 = vld [vmem:[#allocation27 + $0x894] ss:$28 sps:$4 sm:$0xff]   ;;  %v8477_v32 = vld [vmem:[#allocation27 + $0x888] ss:$28 sps:$4 sm:$0xff]  }
 0x70d   :  { %6492 = vmatpush1.bf16.msra.mxu0 %v8411_v38  ;;  %6656 = vmatpush1.bf16.msra.mxu1 %v8414_v39  ;;  %v8480_v38 = vld [vmem:[#allocation27 + $0x890] ss:$28 sps:$4 sm:$0xff]   ;;  %v8485_v39 = vld [vmem:[#allocation27 + $0x8c4] ss:$28 sps:$4 sm:$0xff]  }
 0x70e   :  { %6493 = vmatprep.subr.bf16.mxu0 %v8419_v9  ;;  %6657 = vmatprep.subr.bf16.mxu1 %v8422_v10  ;;  %v8488_v9 = vld [vmem:[#allocation27 + $0x8cc] ss:$28 sps:$4 sm:$0xff]   ;;  %v8483_v10 = vld [vmem:[#allocation27 + $0x8c0] ss:$28 sps:$4 sm:$0xff]  }
 0x711   :  { %6494 = vmatpush1.bf16.msra.mxu0 %v8417_v11  ;;  %6658 = vmatpush1.bf16.msra.mxu1 %v8420_v16  ;;  %v8486_v11 = vld [vmem:[#allocation27 + $0x8c8] ss:$28 sps:$4 sm:$0xff]   ;;  %v8491_v16 = vld [vmem:[#allocation27 + $0x8fc] ss:$28 sps:$4 sm:$0xff]  }
 0x712   :  { %6495 = vmatprep.subr.bf16.mxu0 %v8425_v41  ;;  %6659 = vmatprep.subr.bf16.mxu1 %v8428_v17  ;;  %v8494_v41 = vld [vmem:[#allocation27 + $0x904] ss:$28 sps:$4 sm:$0xff]   ;;  %v8489_v17 = vld [vmem:[#allocation27 + $0x8f8] ss:$28 sps:$4 sm:$0xff]  }
 0x715   :  { %6496 = vmatpush1.bf16.msra.mxu0 %v8423_v18  ;;  %6660 = vmatpush1.bf16.msra.mxu1 %v8426_v21  ;;  %v8492_v18 = vld [vmem:[#allocation27 + $0x900] ss:$28 sps:$4 sm:$0xff]   ;;  %v8497_v21 = vld [vmem:[#allocation27 + $0x934] ss:$28 sps:$4 sm:$0xff]  }
 0x716   :  { %6497 = vmatprep.subr.bf16.mxu0 %v8431_v24  ;;  %6661 = vmatprep.subr.bf16.mxu1 %v8434_v35  ;;  %v8500_v24 = vld [vmem:[#allocation27 + $0x93c] ss:$28 sps:$4 sm:$0xff]   ;;  %v8495_v35 = vld [vmem:[#allocation27 + $0x930] ss:$28 sps:$4 sm:$0xff]  }
 0x719   :  { %6498 = vmatpush1.bf16.msra.mxu0 %v8429_v44  ;;  %6662 = vmatpush1.bf16.msra.mxu1 %v8432_v3  ;;  %v8506_v44 = vld [vmem:[#allocation27 + $0x974] ss:$28 sps:$4 sm:$0xff]   ;;  %v8501_v3 = vld [vmem:[#allocation27 + $0x968] ss:$28 sps:$4 sm:$0xff]  }
 0x71a   :  { %6508 = vmatprep.subr.bf16.mxu0 %v8437_v47  ;;  %6672 = vmatprep.subr.bf16.mxu1 %v8440_v48  ;;  %v8504_v47 = vld [vmem:[#allocation27 + $0x970] ss:$28 sps:$4 sm:$0xff]   ;;  %v8509_v48 = vld [vmem:[#allocation27 + $0x9a4] ss:$28 sps:$4 sm:$0xff]  }
 0x71c   :  { %6500 = vmatmul.mubr.bf16.vlgmr.msra.gmra.mrb[12].mxu0 %v9935_v49  ;;  %6664 = vmatmul.mubr.bf16.vlgmr.msra.gmra.mrb[20].mxu1 %v9935_v49 }
 0x71d   :  { %6509 = vmatpush1.bf16.msra.mxu0 %v8435_v52  ;;  %6540 = vmatprep.mubr.bf16.mxu0 %v9937_v1  ;;  %v8510_v52 = vld [vmem:[#allocation27 + $0x9a8] ss:$28 sps:$4 sm:$0xff]  }
 0x71e   :  { %6673 = vmatpush1.bf16.msra.mxu1 %v8438_v55  ;;  %6704 = vmatprep.mubr.bf16.mxu1 %v9937_v1  ;;  %v8515_v55 = vld [vmem:[#allocation27 + $0x9dc] ss:$28 sps:$4 sm:$0xff]  }
 0x71f   :  { %6510 = vmatprep.subr.bf16.mxu0 %v8443_v19  ;;  %6674 = vmatprep.subr.bf16.mxu1 %v8446_v5  ;;  %v8518_v19 = vld [vmem:[#allocation27 + $0x9e4] ss:$28 sps:$4 sm:$0xff]   ;;  %v8513_v5 = vld [vmem:[#allocation27 + $0x9d8] ss:$28 sps:$4 sm:$0xff]  }
 0x721   :  { %6511 = vmatpush1.bf16.msra.mxu0 %v8441_v28  ;;  %v8516_v28 = vld [vmem:[#allocation27 + $0x9e0] ss:$28 sps:$4 sm:$0xff]  }
 0x722   :  { %6675 = vmatpush1.bf16.msra.mxu1 %v8444_v40  ;;  %6512 = vmatprep.subr.bf16.mxu0 %v8449_v31  ;;  %v8521_v40 = vld [vmem:[#allocation27 + $0xa14] ss:$28 sps:$4 sm:$0xff]   ;;  %v8524_v31 = vld [vmem:[#allocation27 + $0xa1c] ss:$28 sps:$4 sm:$0xff]  }
 0x723   :  { %6676 = vmatprep.subr.bf16.mxu1 %v8452_v45  ;;  %v8519_v45 = vld [vmem:[#allocation27 + $0xa10] ss:$28 sps:$4 sm:$0xff]  }
 0x725   :  { %6513 = vmatpush1.bf16.msra.mxu0 %v8447_v53  ;;  %v8522_v53 = vld [vmem:[#allocation27 + $0xa18] ss:$28 sps:$4 sm:$0xff]  }
 0x726   :  { %6677 = vmatpush1.bf16.msra.mxu1 %v8450_v51  ;;  %6514 = vmatprep.subr.bf16.mxu0 %v8455_v56  ;;  %v8527_v51 = vld [vmem:[#allocation27 + $0xa4c] ss:$28 sps:$4 sm:$0xff]   ;;  %v8530_v56 = vld [vmem:[#allocation27 + $0xa54] ss:$28 sps:$4 sm:$0xff]  }
 0x727   :  { %6678 = vmatprep.subr.bf16.mxu1 %v8458_v57  ;;  %v3553_v57 = vmul.f32 0.2, %v9913_v29 }
 0x729   :  { %6515 = vmatpush1.bf16.msra.mxu0 %v8453_v58  ;;  %v8525_v58 = vld [vmem:[#allocation27 + $0xa48] ss:$28 sps:$4 sm:$0xff]  }
 0x72a   :  { %6679 = vmatpush1.bf16.msra.mxu1 %v8456_v59  ;;  %6516 = vmatprep.subr.bf16.mxu0 %v8461_v60  ;;  %v3556_v59 = vmul.f32 0.2, %v9907_v2  ;;  %v8528_v60 = vld [vmem:[#allocation27 + $0xa50] ss:$28 sps:$4 sm:$0xff]  }
 0x72b   :  { %6680 = vmatprep.subr.bf16.mxu1 %v8464_v27  ;;  %v8533_v27 = vld [vmem:[#allocation27 + $0xa84] ss:$28 sps:$4 sm:$0xff]  }
 0x72d   :  { %6517 = vmatpush1.bf16.msra.mxu0 %v8459_v61  ;;  %v3561_v61 = vsel %vm3545_vm13, %v9913_v29, %v3553_v57  ;;  %v8537_v29 = vld [vmem:[#allocation27 + $0xab8] ss:$28 sps:$4 sm:$0xff]  }
 0x72e   :  { %6681 = vmatpush1.bf16.msra.mxu1 %v8462_v62  ;;  %6518 = vmatprep.subr.bf16.mxu0 %v8467_v50  ;;  %v8536_v62 = vld [vmem:[#allocation27 + $0xa8c] ss:$28 sps:$4 sm:$0xff]   ;;  %v8531_v50 = vld [vmem:[#allocation27 + $0xa80] ss:$28 sps:$4 sm:$0xff]   ;;  %v8594_v57 = vld [vmem:[#allocation27 + $0xcb8] ss:$28 sps:$4 sm:$0xff]  }
 0x72f   :  { %6682 = vmatprep.subr.bf16.mxu1 %v8470_v63  ;;  %v3564_v63 = vsel %vm3548_vm14, %v9907_v2, %v3556_v59  ;;  %v8540_v2 = vld [vmem:[#allocation27 + $0xac0] ss:$28 sps:$4 sm:$0xff]   ;;  %v8602_v59 = vld [vmem:[#allocation27 + $0xcf4] ss:$28 sps:$4 sm:$0xff]  }
 0x731   :  { %6519 = vmatpush1.bf16.msra.mxu0 %v8465_v0  ;;  %v9949_v0 = vpack.c.bf16 %v3561_v61, %v3561_v61  ;;  %v8605_v61 = vld [vmem:[#allocation27 + $0xd24] ss:$28 sps:$4 sm:$0xff]  }
 0x732   :  { %6683 = vmatpush1.bf16.msra.mxu1 %v8468_v4  ;;  %6520 = vmatprep.subr.bf16.mxu0 %v8473_v6  ;;  %v8534_v4 = vld [vmem:[#allocation27 + $0xa88] ss:$28 sps:$4 sm:$0xff]   ;;  %v8539_v6 = vld [vmem:[#allocation27 + $0xabc] ss:$28 sps:$4 sm:$0xff]  }
 0x733   :  { %6684 = vmatprep.subr.bf16.mxu1 %v8476_v30  ;;  %v9952_v30 = vpack.c.bf16 %v3564_v63, %v3564_v63  ;;  %v8606_v63 = vld [vmem:[#allocation27 + $0xd28] ss:$28 sps:$4 sm:$0xff]  }
 0x735   :  { %6521 = vmatpush1.bf16.msra.mxu0 %v8471_v33  ;;  %v8542_v33 = vld [vmem:[#allocation27 + $0xac4] ss:$28 sps:$4 sm:$0xff]  }
 0x736   :  { %6685 = vmatpush1.bf16.msra.mxu1 %v8474_v23  ;;  %6522 = vmatprep.subr.bf16.mxu0 %v8479_v20  ;;  %v8545_v23 = vld [vmem:[#allocation27 + $0xaf4] ss:$28 sps:$4 sm:$0xff]   ;;  %v8548_v20 = vld [vmem:[#allocation27 + $0xafc] ss:$28 sps:$4 sm:$0xff]  }
 0x737   :  { %6686 = vmatprep.subr.bf16.mxu1 %v8482_v22  ;;  %v8543_v22 = vld [vmem:[#allocation27 + $0xaf0] ss:$28 sps:$4 sm:$0xff]  }
 0x739   :  { %6523 = vmatpush1.bf16.msra.mxu0 %v8477_v32  ;;  %v8546_v32 = vld [vmem:[#allocation27 + $0xaf8] ss:$28 sps:$4 sm:$0xff]  }
 0x73a   :  { %6687 = vmatpush1.bf16.msra.mxu1 %v8480_v38  ;;  %6524 = vmatprep.subr.bf16.mxu0 %v8485_v39  ;;  %v8551_v38 = vld [vmem:[#allocation27 + $0xb2c] ss:$28 sps:$4 sm:$0xff]   ;;  %v8554_v39 = vld [vmem:[#allocation27 + $0xb34] ss:$28 sps:$4 sm:$0xff]  }
 0x73b   :  { %6688 = vmatprep.subr.bf16.mxu1 %v8488_v9  ;;  %v8549_v9 = vld [vmem:[#allocation27 + $0xb28] ss:$28 sps:$4 sm:$0xff]  }
 0x73d   :  { %6525 = vmatpush1.bf16.msra.mxu0 %v8483_v10  ;;  %v8552_v10 = vld [vmem:[#allocation27 + $0xb30] ss:$28 sps:$4 sm:$0xff]  }
 0x73e   :  { %6689 = vmatpush1.bf16.msra.mxu1 %v8486_v11  ;;  %6526 = vmatprep.subr.bf16.mxu0 %v8491_v16  ;;  %v8557_v11 = vld [vmem:[#allocation27 + $0xb64] ss:$28 sps:$4 sm:$0xff]   ;;  %v8560_v16 = vld [vmem:[#allocation27 + $0xb6c] ss:$28 sps:$4 sm:$0xff]  }
 0x73f   :  { %6690 = vmatprep.subr.bf16.mxu1 %v8494_v41  ;;  %v8555_v41 = vld [vmem:[#allocation27 + $0xb60] ss:$28 sps:$4 sm:$0xff]  }
 0x741   :  { %6527 = vmatpush1.bf16.msra.mxu0 %v8489_v17  ;;  %v8558_v17 = vld [vmem:[#allocation27 + $0xb68] ss:$28 sps:$4 sm:$0xff]  }
 0x742   :  { %6691 = vmatpush1.bf16.msra.mxu1 %v8492_v18  ;;  %6528 = vmatprep.subr.bf16.mxu0 %v8497_v21  ;;  %v8563_v18 = vld [vmem:[#allocation27 + $0xb9c] ss:$28 sps:$4 sm:$0xff]   ;;  %v8566_v21 = vld [vmem:[#allocation27 + $0xba4] ss:$28 sps:$4 sm:$0xff]  }
 0x743   :  { %6692 = vmatprep.subr.bf16.mxu1 %v8500_v24  ;;  %v8561_v24 = vld [vmem:[#allocation27 + $0xb98] ss:$28 sps:$4 sm:$0xff]  }
 0x745   :  { %6529 = vmatpush1.bf16.msra.mxu0 %v8495_v35  ;;  %v8564_v35 = vld [vmem:[#allocation27 + $0xba0] ss:$28 sps:$4 sm:$0xff]  }
 0x746   :  { %6693 = vmatpush1.bf16.msra.mxu1 %v8498_v37  ;;  %6530 = vmatprep.subr.bf16.mxu0 %v8503_v43  ;;  %v8569_v37 = vld [vmem:[#allocation27 + $0xbd4] ss:$28 sps:$4 sm:$0xff]   ;;  %v8572_v43 = vld [vmem:[#allocation27 + $0xbdc] ss:$28 sps:$4 sm:$0xff]  }
 0x747   :  { %6694 = vmatprep.subr.bf16.mxu1 %v8506_v44  ;;  %v8567_v44 = vld [vmem:[#allocation27 + $0xbd0] ss:$28 sps:$4 sm:$0xff]  }
 0x749   :  { %6531 = vmatpush1.bf16.msra.mxu0 %v8501_v3  ;;  %v8570_v3 = vld [vmem:[#allocation27 + $0xbd8] ss:$28 sps:$4 sm:$0xff]  }
 0x74a   :  { %6695 = vmatpush1.bf16.msra.mxu1 %v8504_v47  ;;  %6532 = vmatprep.subr.bf16.mxu0 %v8509_v48  ;;  %v8575_v47 = vld [vmem:[#allocation27 + $0xc0c] ss:$28 sps:$4 sm:$0xff]   ;;  %v8578_v48 = vld [vmem:[#allocation27 + $0xc14] ss:$28 sps:$4 sm:$0xff]  }
 0x74b   :  { %6696 = vmatprep.subr.bf16.mxu1 %v8512_v46  ;;  %v8573_v46 = vld [vmem:[#allocation27 + $0xc08] ss:$28 sps:$4 sm:$0xff]  }
 0x74d   :  { %6533 = vmatpush1.bf16.msra.mxu0 %v8507_v8  ;;  %v8576_v8 = vld [vmem:[#allocation27 + $0xc10] ss:$28 sps:$4 sm:$0xff]  }
 0x74e   :  { %6697 = vmatpush1.bf16.msra.mxu1 %v8510_v52  ;;  %6534 = vmatprep.subr.bf16.mxu0 %v8515_v55  ;;  %v8581_v52 = vld [vmem:[#allocation27 + $0xc44] ss:$28 sps:$4 sm:$0xff]   ;;  %v8584_v55 = vld [vmem:[#allocation27 + $0xc4c] ss:$28 sps:$4 sm:$0xff]  }
 0x74f   :  { %6698 = vmatprep.subr.bf16.mxu1 %v8518_v19  ;;  %v8579_v19 = vld [vmem:[#allocation27 + $0xc40] ss:$28 sps:$4 sm:$0xff]  }
 0x751   :  { %6535 = vmatpush1.bf16.msra.mxu0 %v8513_v5  ;;  %v8582_v5 = vld [vmem:[#allocation27 + $0xc48] ss:$28 sps:$4 sm:$0xff]  }
 0x752   :  { %6699 = vmatpush1.bf16.msra.mxu1 %v8516_v28  ;;  %6536 = vmatprep.subr.bf16.mxu0 %v8521_v40  ;;  %v8587_v28 = vld [vmem:[#allocation27 + $0xc7c] ss:$28 sps:$4 sm:$0xff]   ;;  %v8590_v40 = vld [vmem:[#allocation27 + $0xc84] ss:$28 sps:$4 sm:$0xff]  }
 0x753   :  { %6700 = vmatprep.subr.bf16.mxu1 %v8524_v31  ;;  %v8585_v31 = vld [vmem:[#allocation27 + $0xc78] ss:$28 sps:$4 sm:$0xff]  }
 0x755   :  { %6537 = vmatpush1.bf16.msra.mxu0 %v8519_v45  ;;  %v8588_v45 = vld [vmem:[#allocation27 + $0xc80] ss:$28 sps:$4 sm:$0xff]  }
 0x756   :  { %6701 = vmatpush1.bf16.msra.mxu1 %v8522_v53  ;;  %6538 = vmatprep.subr.bf16.mxu0 %v8527_v51  ;;  %v8593_v53 = vld [vmem:[#allocation27 + $0xcb4] ss:$28 sps:$4 sm:$0xff]   ;;  %v8596_v51 = vld [vmem:[#allocation27 + $0xcbc] ss:$28 sps:$4 sm:$0xff]  }
 0x757   :  { %6702 = vmatprep.subr.bf16.mxu1 %v8530_v56  ;;  %v8591_v56 = vld [vmem:[#allocation27 + $0xcb0] ss:$28 sps:$4 sm:$0xff]  }
 0x759   :  { %6539 = vmatpush1.bf16.msra.mxu0 %v8525_v58  ;;  %v8599_v58 = vld [vmem:[#allocation27 + $0xcec] ss:$28 sps:$4 sm:$0xff]  }
 0x75a   :  { %6703 = vmatpush1.bf16.msra.mxu1 %v8528_v60  ;;  %6549 = vmatprep.subr.bf16.mxu0 %v8533_v27  ;;  %v8597_v60 = vld [vmem:[#allocation27 + $0xce8] ss:$28 sps:$4 sm:$0xff]   ;;  %v8600_v27 = vld [vmem:[#allocation27 + $0xcf0] ss:$28 sps:$4 sm:$0xff]  }
 0x75b   :  { %6713 = vmatprep.subr.bf16.mxu1 %v8536_v62  ;;  %v8608_v62 = vld [vmem:[#allocation27 + $0xd2c] ss:$28 sps:$4 sm:$0xff]  }
 0x75c   :  { %6541 = vmatmul.mubr.bf16.vlgmr.msra.gmra.mrb[12].mxu0 %v9949_v0 }
 0x75d   :  { %6705 = vmatmul.mubr.bf16.vlgmr.msra.gmra.mrb[20].mxu1 %v9949_v0  ;;  %6550 = vmatpush1.bf16.msra.mxu0 %v8531_v50  ;;  %v8603_v50 = vld [vmem:[#allocation27 + $0xd20] ss:$28 sps:$4 sm:$0xff]  }
 0x75e   :  { %6581 = vmatprep.mubr.bf16.mxu0 %v9952_v30  ;;  %6714 = vmatpush1.bf16.msra.mxu1 %v8534_v4  ;;  %v8611_v4 = vld [vmem:[#allocation27 + $0xd5c] ss:$28 sps:$4 sm:$0xff]  }
 0x75f   :  { %6745 = vmatprep.mubr.bf16.mxu1 %v9952_v30  ;;  %6551 = vmatprep.subr.bf16.mxu0 %v8539_v6  ;;  %v8614_v6 = vld [vmem:[#allocation27 + $0xd64] ss:$28 sps:$4 sm:$0xff]  }
 0x760   :  { %6715 = vmatprep.subr.bf16.mxu1 %v8542_v33  ;;  %v8609_v33 = vld [vmem:[#allocation27 + $0xd58] ss:$28 sps:$4 sm:$0xff]  }
 0x761   :  { %6552 = vmatpush1.bf16.msra.mxu0 %v8537_v29  ;;  %v8612_v29 = vld [vmem:[#allocation27 + $0xd60] ss:$28 sps:$4 sm:$0xff]  }
 0x762   :  { %6716 = vmatpush1.bf16.msra.mxu1 %v8540_v2  ;;  %6553 = vmatprep.subr.bf16.mxu0 %v8545_v23  ;;  %v8617_v2 = vld [vmem:[#allocation27 + $0xd94] ss:$28 sps:$4 sm:$0xff]   ;;  %v8620_v23 = vld [vmem:[#allocation27 + $0xd9c] ss:$28 sps:$4 sm:$0xff]  }
 0x763   :  { %6717 = vmatprep.subr.bf16.mxu1 %v8548_v20  ;;  %v8615_v20 = vld [vmem:[#allocation27 + $0xd90] ss:$28 sps:$4 sm:$0xff]  }
 0x765   :  { %6554 = vmatpush1.bf16.msra.mxu0 %v8543_v22  ;;  %v8618_v22 = vld [vmem:[#allocation27 + $0xd98] ss:$28 sps:$4 sm:$0xff]  }
 0x766   :  { %6718 = vmatpush1.bf16.msra.mxu1 %v8546_v32  ;;  %6555 = vmatprep.subr.bf16.mxu0 %v8551_v38  ;;  %v8623_v32 = vld [vmem:[#allocation27 + $0xdcc] ss:$28 sps:$4 sm:$0xff]   ;;  %v8626_v38 = vld [vmem:[#allocation27 + $0xdd4] ss:$28 sps:$4 sm:$0xff]  }
 0x767   :  { %6719 = vmatprep.subr.bf16.mxu1 %v8554_v39  ;;  %v3555_v39 = vmul.f32 0.2, %v9915_v42 }
 0x769   :  { %6556 = vmatpush1.bf16.msra.mxu0 %v8549_v9  ;;  %v8621_v9 = vld [vmem:[#allocation27 + $0xdc8] ss:$28 sps:$4 sm:$0xff]  }
 0x76a   :  { %6720 = vmatpush1.bf16.msra.mxu1 %v8552_v10  ;;  %6557 = vmatprep.subr.bf16.mxu0 %v8557_v11  ;;  %v8624_v10 = vld [vmem:[#allocation27 + $0xdd0] ss:$28 sps:$4 sm:$0xff]  }
 0x76b   :  { %6721 = vmatprep.subr.bf16.mxu1 %v8560_v16  ;;  %v8629_v11 = vld [vmem:[#allocation27 + $0x14] ss:$28 sps:$4 sm:$0xff]   ;;  %v3563_v16 = vsel %vm3547_vm15, %v9915_v42, %v3555_v39 }
 0x76c   :  { %v8636_v42 = vld [vmem:[#allocation27 + $0x50] ss:$28 sps:$4 sm:$0xff]   ;;  %v8682_v39 = vld [vmem:[#allocation27 + $0x278] ss:$28 sps:$4 sm:$0xff]  }
 0x76d   :  { %6558 = vmatpush1.bf16.msra.mxu0 %v8555_v41  ;;  %v8630_v41 = vld [vmem:[#allocation27 + $0x1d8] ss:$28 sps:$4 sm:$0xff]  }
 0x76e   :  { %6722 = vmatpush1.bf16.msra.mxu1 %v8558_v17  ;;  %6559 = vmatprep.subr.bf16.mxu0 %v8563_v18  ;;  %v8627_v17 = vld [vmem:[#allocation27 + $0x10] ss:$28 sps:$4 sm:$0xff]   ;;  %v9960_v18 = vpack.c.bf16 %v3563_v16, %v3563_v16 }
 0x76f   :  { %6723 = vmatprep.subr.bf16.mxu1 %v8566_v21  ;;  %v8631_v21 = vld [vmem:[#allocation27 + $0x18] ss:$28 sps:$4 sm:$0xff]   ;;  %v8687_v16 = vld [vmem:[#allocation27 + $0x2b0] ss:$28 sps:$4 sm:$0xff]  }
 0x771   :  { %6560 = vmatpush1.bf16.msra.mxu0 %v8561_v24  ;;  %v8634_v24 = vld [vmem:[#allocation27 + $0x4c] ss:$28 sps:$4 sm:$0xff]  }
 0x772   :  { %6724 = vmatpush1.bf16.msra.mxu1 %v8564_v35  ;;  %6561 = vmatprep.subr.bf16.mxu0 %v8569_v37  ;;  %v8635_v35 = vld [vmem:[#allocation27 + $0x210] ss:$28 sps:$4 sm:$0xff]   ;;  %v8632_v37 = vld [vmem:[#allocation27 + $0x48] ss:$28 sps:$4 sm:$0xff]  }
 0x773   :  { %6725 = vmatprep.subr.bf16.mxu1 %v8572_v43  ;;  %v8639_v43 = vld [vmem:[#allocation27 + $0x84] ss:$28 sps:$4 sm:$0xff]  }
 0x775   :  { %6562 = vmatpush1.bf16.msra.mxu0 %v8567_v44  ;;  %v8640_v44 = vld [vmem:[#allocation27 + $0x248] ss:$28 sps:$4 sm:$0xff]  }
 0x776   :  { %6726 = vmatpush1.bf16.msra.mxu1 %v8570_v3  ;;  %6563 = vmatprep.subr.bf16.mxu0 %v8575_v47  ;;  %v8637_v3 = vld [vmem:[#allocation27 + $0x80] ss:$28 sps:$4 sm:$0xff]   ;;  %v8641_v47 = vld [vmem:[#allocation27 + $0x88] ss:$28 sps:$4 sm:$0xff]  }
 0x777   :  { %6727 = vmatprep.subr.bf16.mxu1 %v8578_v48  ;;  %v8644_v48 = vld [vmem:[#allocation27 + $0xbc] ss:$28 sps:$4 sm:$0xff]  }
 0x779   :  { %6564 = vmatpush1.bf16.msra.mxu0 %v8573_v46  ;;  %v8645_v46 = vld [vmem:[#allocation27 + $0x280] ss:$28 sps:$4 sm:$0xff]  }
 0x77a   :  { %6728 = vmatpush1.bf16.msra.mxu1 %v8576_v8  ;;  %6565 = vmatprep.subr.bf16.mxu0 %v8581_v52  ;;  %v8642_v8 = vld [vmem:[#allocation27 + $0xb8] ss:$28 sps:$4 sm:$0xff]   ;;  %v8646_v52 = vld [vmem:[#allocation27 + $0xc0] ss:$28 sps:$4 sm:$0xff]  }
 0x77b   :  { %6729 = vmatprep.subr.bf16.mxu1 %v8584_v55  ;;  %v8649_v55 = vld [vmem:[#allocation27 + $0xf4] ss:$28 sps:$4 sm:$0xff]  }
 0x77d   :  { %6566 = vmatpush1.bf16.msra.mxu0 %v8579_v19  ;;  %v8650_v19 = vld [vmem:[#allocation27 + $0x2b8] ss:$28 sps:$4 sm:$0xff]  }
 0x77e   :  { %6730 = vmatpush1.bf16.msra.mxu1 %v8582_v5  ;;  %6567 = vmatprep.subr.bf16.mxu0 %v8587_v28  ;;  %v8651_v5 = vld [vmem:[#allocation27 + $0xf8] ss:$28 sps:$4 sm:$0xff]   ;;  %v8654_v28 = vld [vmem:[#allocation27 + $0x12c] ss:$28 sps:$4 sm:$0xff]  }
 0x77f   :  { %6731 = vmatprep.subr.bf16.mxu1 %v8590_v40  ;;  %v8655_v40 = vld [vmem:[#allocation27 + $0x2f0] ss:$28 sps:$4 sm:$0xff]  }
 0x781   :  { %6568 = vmatpush1.bf16.msra.mxu0 %v8585_v31  ;;  %v8652_v31 = vld [vmem:[#allocation27 + $0x128] ss:$28 sps:$4 sm:$0xff]  }
 0x782   :  { %6732 = vmatpush1.bf16.msra.mxu1 %v8588_v45  ;;  %6569 = vmatprep.subr.bf16.mxu0 %v8593_v53  ;;  %v8656_v45 = vld [vmem:[#allocation27 + $0x130] ss:$28 sps:$4 sm:$0xff]   ;;  %v8659_v53 = vld [vmem:[#allocation27 + $0x164] ss:$28 sps:$4 sm:$0xff]  }
 0x783   :  { %6733 = vmatprep.subr.bf16.mxu1 %v8596_v51  ;;  %v8660_v51 = vld [vmem:[#allocation27 + $0x328] ss:$28 sps:$4 sm:$0xff]  }
 0x785   :  { %6570 = vmatpush1.bf16.msra.mxu0 %v8591_v56  ;;  %v8657_v56 = vld [vmem:[#allocation27 + $0x160] ss:$28 sps:$4 sm:$0xff]  }
 0x786   :  { %6734 = vmatpush1.bf16.msra.mxu1 %v8594_v57  ;;  %6571 = vmatprep.subr.bf16.mxu0 %v8599_v58  ;;  %v8661_v57 = vld [vmem:[#allocation27 + $0x168] ss:$28 sps:$4 sm:$0xff]   ;;  %v8664_v58 = vld [vmem:[#allocation27 + $0x19c] ss:$28 sps:$4 sm:$0xff]  }
 0x787   :  { %6735 = vmatprep.subr.bf16.mxu1 %v8602_v59  ;;  %v8665_v59 = vld [vmem:[#allocation27 + $0x360] ss:$28 sps:$4 sm:$0xff]  }
 0x789   :  { %6572 = vmatpush1.bf16.msra.mxu0 %v8597_v60  ;;  %v8662_v60 = vld [vmem:[#allocation27 + $0x198] ss:$28 sps:$4 sm:$0xff]  }
 0x78a   :  { %6736 = vmatpush1.bf16.msra.mxu1 %v8600_v27  ;;  %6573 = vmatprep.subr.bf16.mxu0 %v8605_v61  ;;  %v8666_v27 = vld [vmem:[#allocation27 + $0x1a0] ss:$28 sps:$4 sm:$0xff]   ;;  %v8669_v61 = vld [vmem:[#allocation27 + $0x1d4] ss:$28 sps:$4 sm:$0xff]  }
 0x78b   :  { %6737 = vmatprep.subr.bf16.mxu1 %v8608_v62  ;;  %v8670_v62 = vld [vmem:[#allocation27 + $0x558] ss:$28 sps:$4 sm:$0xff]  }
 0x78d   :  { %6574 = vmatpush1.bf16.msra.mxu0 %v8603_v50  ;;  %v8667_v50 = vld [vmem:[#allocation27 + $0x1d0] ss:$28 sps:$4 sm:$0xff]  }
 0x78e   :  { %6738 = vmatpush1.bf16.msra.mxu1 %v8606_v63  ;;  %6575 = vmatprep.subr.bf16.mxu0 %v8611_v4  ;;  %v8671_v63 = vld [vmem:[#allocation27 + $0x398] ss:$28 sps:$4 sm:$0xff]   ;;  %v8674_v4 = vld [vmem:[#allocation27 + $0x20c] ss:$28 sps:$4 sm:$0xff]  }
 0x78f   :  { %6739 = vmatprep.subr.bf16.mxu1 %v8614_v6  ;;  %v8675_v6 = vld [vmem:[#allocation27 + $0x590] ss:$28 sps:$4 sm:$0xff]  }
 0x791   :  { %6576 = vmatpush1.bf16.msra.mxu0 %v8609_v33  ;;  %v8672_v33 = vld [vmem:[#allocation27 + $0x208] ss:$28 sps:$4 sm:$0xff]  }
 0x792   :  { %6740 = vmatpush1.bf16.msra.mxu1 %v8612_v29  ;;  %6577 = vmatprep.subr.bf16.mxu0 %v8617_v2  ;;  %v8676_v29 = vld [vmem:[#allocation27 + $0x3d0] ss:$28 sps:$4 sm:$0xff]   ;;  %v8679_v2 = vld [vmem:[#allocation27 + $0x244] ss:$28 sps:$4 sm:$0xff]  }
 0x793   :  { %6741 = vmatprep.subr.bf16.mxu1 %v8620_v23  ;;  %v8680_v23 = vld [vmem:[#allocation27 + $0x5c8] ss:$28 sps:$4 sm:$0xff]  }
 0x795   :  { %6578 = vmatpush1.bf16.msra.mxu0 %v8615_v20  ;;  %v8677_v20 = vld [vmem:[#allocation27 + $0x240] ss:$28 sps:$4 sm:$0xff]  }
 0x796   :  { %6742 = vmatpush1.bf16.msra.mxu1 %v8618_v22  ;;  %6579 = vmatprep.subr.bf16.mxu0 %v8623_v32  ;;  %v8681_v22 = vld [vmem:[#allocation27 + $0x408] ss:$28 sps:$4 sm:$0xff]   ;;  %v8684_v32 = vld [vmem:[#allocation27 + $0x27c] ss:$28 sps:$4 sm:$0xff]  }
 0x797   :  { %6743 = vmatprep.subr.bf16.mxu1 %v8626_v38  ;;  %v8685_v38 = vld [vmem:[#allocation27 + $0x600] ss:$28 sps:$4 sm:$0xff]  }
 0x799   :  { %6580 = vmatpush1.bf16.msra.mxu0 %v8621_v9  ;;  %v8686_v9 = vld [vmem:[#allocation27 + $0x440] ss:$28 sps:$4 sm:$0xff]  }
 0x79a   :  { %6744 = vmatpush1.bf16.msra.mxu1 %v8624_v10  ;;  %6754 = vmatprep.subr.bf16.mxu0 %v8629_v11  ;;  %v8689_v10 = vld [vmem:[#allocation27 + $0x2b4] ss:$28 sps:$4 sm:$0xff]  }
 0x79b   :  { %7909 = vmatprep.subr.bf16.mxu1 %v8630_v41  ;;  %v8690_v11 = vld [vmem:[#allocation27 + $0x638] ss:$28 sps:$4 sm:$0xff]  }
 0x79c   :  { %6582 = vmatmul.mubr.bf16.vlgmr.msra.gmra.mrb[12].mxu0 %v9960_v18  ;;  %v8691_v41 = vld [vmem:[#allocation27 + $0x478] ss:$28 sps:$4 sm:$0xff]  }
 0x79d   :  { %6746 = vmatmul.mubr.bf16.vlgmr.msra.gmra.mrb[20].mxu1 %v9960_v18  ;;  %6755 = vmatpush1.bf16.msra.mxu0 %v8627_v17  ;;  %v8694_v17 = vld [vmem:[#allocation27 + $0x2ec] ss:$28 sps:$4 sm:$0xff]  }
 0x79e   :  { %6786 = vmatprep.mubr.bf16.mxu0 %v9917_v36  ;;  %7910 = vmatpush3.bf16.msra.mxu1 %v8631_v21  ;;  %v8695_v21 = vld [vmem:[#allocation27 + $0x670] ss:$28 sps:$4 sm:$0xff]  }
 0x79f   :  { %6950 = vmatprep.mubr.bf16.mxu1 %v9917_v36  ;;  %6756 = vmatprep.subr.bf16.mxu0 %v8634_v24  ;;  %v8647_v36 = vld [vmem:[#allocation27 + $0xf0] ss:$28 sps:$4 sm:$0xff]   ;;  %v8692_v24 = vld [vmem:[#allocation27 + $0x2e8] ss:$28 sps:$4 sm:$0xff]  }
 0x7a0   :  { %7911 = vmatprep.subr.bf16.mxu1 %v8635_v35  ;;  %v8696_v35 = vld [vmem:[#allocation27 + $0x4b0] ss:$28 sps:$4 sm:$0xff]  }
 0x7a1   :  { %6757 = vmatpush1.bf16.msra.mxu0 %v8632_v37  ;;  %v8699_v37 = vld [vmem:[#allocation27 + $0x324] ss:$28 sps:$4 sm:$0xff]  }
 0x7a2   :  { %7912 = vmatpush3.bf16.msra.mxu1 %v8636_v42  ;;  %6758 = vmatprep.subr.bf16.mxu0 %v8639_v43  ;;  %v8700_v42 = vld [vmem:[#allocation27 + $0x6a8] ss:$28 sps:$4 sm:$0xff]   ;;  %v8697_v43 = vld [vmem:[#allocation27 + $0x320] ss:$28 sps:$4 sm:$0xff]  }
 0x7a3   :  { %7913 = vmatprep.subr.bf16.mxu1 %v8640_v44  ;;  %v8701_v44 = vld [vmem:[#allocation27 + $0x4e8] ss:$28 sps:$4 sm:$0xff]  }
 0x7a5   :  { %6759 = vmatpush1.bf16.msra.mxu0 %v8637_v3  ;;  %v8704_v3 = vld [vmem:[#allocation27 + $0x35c] ss:$28 sps:$4 sm:$0xff]  }
 0x7a6   :  { %7914 = vmatpush3.bf16.msra.mxu1 %v8641_v47  ;;  %6760 = vmatprep.subr.bf16.mxu0 %v8644_v48  ;;  %v8705_v47 = vld [vmem:[#allocation27 + $0x6e0] ss:$28 sps:$4 sm:$0xff]   ;;  %v8702_v48 = vld [vmem:[#allocation27 + $0x358] ss:$28 sps:$4 sm:$0xff]  }
 0x7a7   :  { %7915 = vmatprep.subr.bf16.mxu1 %v8645_v46  ;;  %v8706_v46 = vld [vmem:[#allocation27 + $0x520] ss:$28 sps:$4 sm:$0xff]  }
 0x7a9   :  { %6761 = vmatpush1.bf16.msra.mxu0 %v8642_v8  ;;  %v8709_v8 = vld [vmem:[#allocation27 + $0x394] ss:$28 sps:$4 sm:$0xff]  }
 0x7aa   :  { %7916 = vmatpush3.bf16.msra.mxu1 %v8646_v52  ;;  %6762 = vmatprep.subr.bf16.mxu0 %v8649_v55  ;;  %v8710_v52 = vld [vmem:[#allocation27 + $0x8d8] ss:$28 sps:$4 sm:$0xff]   ;;  %v8707_v55 = vld [vmem:[#allocation27 + $0x390] ss:$28 sps:$4 sm:$0xff]  }
 0x7ab   :  { %7917 = vmatprep.subr.bf16.mxu1 %v8650_v19  ;;  %v8711_v19 = vld [vmem:[#allocation27 + $0x718] ss:$28 sps:$4 sm:$0xff]  }
 0x7ad   :  { %6763 = vmatpush1.bf16.msra.mxu0 %v8647_v36  ;;  %v8714_v36 = vld [vmem:[#allocation27 + $0x3cc] ss:$28 sps:$4 sm:$0xff]  }
 0x7ae   :  { %7918 = vmatpush3.bf16.msra.mxu1 %v8651_v5  ;;  %6764 = vmatprep.subr.bf16.mxu0 %v8654_v28  ;;  %v8715_v5 = vld [vmem:[#allocation27 + $0x910] ss:$28 sps:$4 sm:$0xff]   ;;  %v8712_v28 = vld [vmem:[#allocation27 + $0x3c8] ss:$28 sps:$4 sm:$0xff]  }
 0x7af   :  { %7919 = vmatprep.subr.bf16.mxu1 %v8655_v40  ;;  %v8716_v40 = vld [vmem:[#allocation27 + $0x750] ss:$28 sps:$4 sm:$0xff]  }
 0x7b1   :  { %6765 = vmatpush1.bf16.msra.mxu0 %v8652_v31  ;;  %v8719_v31 = vld [vmem:[#allocation27 + $0x404] ss:$28 sps:$4 sm:$0xff]  }
 0x7b2   :  { %7920 = vmatpush3.bf16.msra.mxu1 %v8656_v45  ;;  %6766 = vmatprep.subr.bf16.mxu0 %v8659_v53  ;;  %v8720_v45 = vld [vmem:[#allocation27 + $0x948] ss:$28 sps:$4 sm:$0xff]   ;;  %v8717_v53 = vld [vmem:[#allocation27 + $0x400] ss:$28 sps:$4 sm:$0xff]  }
 0x7b3   :  { %7921 = vmatprep.subr.bf16.mxu1 %v8660_v51  ;;  %v8724_v51 = vld [vmem:[#allocation27 + $0x43c] ss:$28 sps:$4 sm:$0xff]  }
 0x7b5   :  { %6767 = vmatpush1.bf16.msra.mxu0 %v8657_v56  ;;  %v8725_v56 = vld [vmem:[#allocation27 + $0x980] ss:$28 sps:$4 sm:$0xff]  }
 0x7b6   :  { %7922 = vmatpush3.bf16.msra.mxu1 %v8661_v57  ;;  %6768 = vmatprep.subr.bf16.mxu0 %v8664_v58  ;;  %v8722_v57 = vld [vmem:[#allocation27 + $0x438] ss:$28 sps:$4 sm:$0xff]  }
 0x7b7   :  { %7923 = vmatprep.subr.bf16.mxu1 %v8665_v59  ;;  %v8729_v58 = vld [vmem:[#allocation27 + $0x474] ss:$28 sps:$4 sm:$0xff]  }
 0x7b8   :  { %v8730_v59 = vld [vmem:[#allocation27 + $0x9b8] ss:$28 sps:$4 sm:$0xff]  }
 0x7b9   :  { %6769 = vmatpush1.bf16.msra.mxu0 %v8662_v60  ;;  %v8727_v60 = vld [vmem:[#allocation27 + $0x470] ss:$28 sps:$4 sm:$0xff]  }
 0x7ba   :  { %7924 = vmatpush3.bf16.msra.mxu1 %v8666_v27  ;;  %6770 = vmatprep.subr.bf16.mxu0 %v8669_v61  ;;  %v8731_v27 = vld [vmem:[#allocation27 + $0x7f8] ss:$28 sps:$4 sm:$0xff]   ;;  %v8734_v61 = vld [vmem:[#allocation27 + $0x4ac] ss:$28 sps:$4 sm:$0xff]  }
 0x7bb   :  { %7931 = vmatprep.subr.bf16.mxu1 %v8670_v62  ;;  %v8735_v62 = vld [vmem:[#allocation27 + $0x9f0] ss:$28 sps:$4 sm:$0xff]  }
 0x7bd   :  { %6951 = vmatmul.mubr.bf16.vlgmr.msra.gmra.mrb[24].mxu1 %v9919_v7  ;;  %6771 = vmatpush1.bf16.msra.mxu0 %v8667_v50  ;;  %v8732_v50 = vld [vmem:[#allocation27 + $0x4a8] ss:$28 sps:$4 sm:$0xff]  }
 0x7be   :  { %7932 = vmatpush3.bf16.msra.mxu1 %v8671_v63  ;;  %6990 = vmatprep.mubr.bf16.mxu1 %v9925_v12  ;;  %v8736_v63 = vld [vmem:[#allocation27 + $0x830] ss:$28 sps:$4 sm:$0xff]  }
 0x7bf   :  { %6772 = vmatprep.subr.bf16.mxu0 %v8674_v4  ;;  %7933 = vmatprep.subr.bf16.mxu1 %v8675_v6  ;;  %v8739_v4 = vld [vmem:[#allocation27 + $0x4e4] ss:$28 sps:$4 sm:$0xff]  }
 0x7c0   :  { %v8740_v6 = vld [vmem:[#allocation27 + $0xa28] ss:$28 sps:$4 sm:$0xff]  }
 0x7c1   :  { %6773 = vmatpush1.bf16.msra.mxu0 %v8672_v33  ;;  %v8737_v33 = vld [vmem:[#allocation27 + $0x4e0] ss:$28 sps:$4 sm:$0xff]  }
 0x7c2   :  { %7934 = vmatpush3.bf16.msra.mxu1 %v8676_v29  ;;  %6774 = vmatprep.subr.bf16.mxu0 %v8679_v2  ;;  %v8741_v29 = vld [vmem:[#allocation27 + $0x868] ss:$28 sps:$4 sm:$0xff]   ;;  %v8744_v2 = vld [vmem:[#allocation27 + $0x51c] ss:$28 sps:$4 sm:$0xff]  }
 0x7c3   :  { %7935 = vmatprep.subr.bf16.mxu1 %v8680_v23  ;;  %v8745_v23 = vld [vmem:[#allocation27 + $0xa60] ss:$28 sps:$4 sm:$0xff]  }
 0x7c5   :  { %6775 = vmatpush1.bf16.msra.mxu0 %v8677_v20  ;;  %v8742_v20 = vld [vmem:[#allocation27 + $0x518] ss:$28 sps:$4 sm:$0xff]  }
 0x7c6   :  { %7936 = vmatpush3.bf16.msra.mxu1 %v8681_v22  ;;  %6776 = vmatprep.subr.bf16.mxu0 %v8684_v32  ;;  %v8746_v22 = vld [vmem:[#allocation27 + $0x8a0] ss:$28 sps:$4 sm:$0xff]   ;;  %v8749_v32 = vld [vmem:[#allocation27 + $0x554] ss:$28 sps:$4 sm:$0xff]  }
 0x7c7   :  { %7937 = vmatprep.subr.bf16.mxu1 %v8685_v38  ;;  %v8750_v38 = vld [vmem:[#allocation27 + $0xc58] ss:$28 sps:$4 sm:$0xff]  }
 0x7c9   :  { %6777 = vmatpush1.bf16.msra.mxu0 %v8682_v39  ;;  %v8747_v39 = vld [vmem:[#allocation27 + $0x550] ss:$28 sps:$4 sm:$0xff]  }
 0x7ca   :  { %7938 = vmatpush3.bf16.msra.mxu1 %v8686_v9  ;;  %6778 = vmatprep.subr.bf16.mxu0 %v8689_v10  ;;  %v8751_v9 = vld [vmem:[#allocation27 + $0xa98] ss:$28 sps:$4 sm:$0xff]   ;;  %v8754_v10 = vld [vmem:[#allocation27 + $0x58c] ss:$28 sps:$4 sm:$0xff]  }
 0x7cb   :  { %7939 = vmatprep.subr.bf16.mxu1 %v8690_v11  ;;  %v8755_v11 = vld [vmem:[#allocation27 + $0xc90] ss:$28 sps:$4 sm:$0xff]  }
 0x7cd   :  { %6779 = vmatpush1.bf16.msra.mxu0 %v8687_v16  ;;  %v8752_v16 = vld [vmem:[#allocation27 + $0x588] ss:$28 sps:$4 sm:$0xff]  }
 0x7ce   :  { %7940 = vmatpush3.bf16.msra.mxu1 %v8691_v41  ;;  %6780 = vmatprep.subr.bf16.mxu0 %v8694_v17  ;;  %v8756_v41 = vld [vmem:[#allocation27 + $0xad0] ss:$28 sps:$4 sm:$0xff]   ;;  %v8759_v17 = vld [vmem:[#allocation27 + $0x5c4] ss:$28 sps:$4 sm:$0xff]  }
 0x7cf   :  { %7941 = vmatprep.subr.bf16.mxu1 %v8695_v21  ;;  %v8760_v21 = vld [vmem:[#allocation27 + $0xcc8] ss:$28 sps:$4 sm:$0xff]  }
 0x7d1   :  { %6781 = vmatpush1.bf16.msra.mxu0 %v8692_v24  ;;  %v8757_v24 = vld [vmem:[#allocation27 + $0x5c0] ss:$28 sps:$4 sm:$0xff]  }
 0x7d2   :  { %7942 = vmatpush3.bf16.msra.mxu1 %v8696_v35  ;;  %6782 = vmatprep.subr.bf16.mxu0 %v8699_v37  ;;  %v8761_v35 = vld [vmem:[#allocation27 + $0xb08] ss:$28 sps:$4 sm:$0xff]   ;;  %v8764_v37 = vld [vmem:[#allocation27 + $0x5fc] ss:$28 sps:$4 sm:$0xff]  }
 0x7d3   :  { %7943 = vmatprep.subr.bf16.mxu1 %v8700_v42  ;;  %v8765_v42 = vld [vmem:[#allocation27 + $0xd00] ss:$28 sps:$4 sm:$0xff]  }
 0x7d5   :  { %6783 = vmatpush1.bf16.msra.mxu0 %v8697_v43  ;;  %v8762_v43 = vld [vmem:[#allocation27 + $0x5f8] ss:$28 sps:$4 sm:$0xff]  }
 0x7d6   :  { %7944 = vmatpush3.bf16.msra.mxu1 %v8701_v44  ;;  %6784 = vmatprep.subr.bf16.mxu0 %v8704_v3  ;;  %v8766_v44 = vld [vmem:[#allocation27 + $0xb40] ss:$28 sps:$4 sm:$0xff]   ;;  %v8769_v3 = vld [vmem:[#allocation27 + $0x634] ss:$28 sps:$4 sm:$0xff]  }
 0x7d7   :  { %7945 = vmatprep.subr.bf16.mxu1 %v8705_v47  ;;  %v8770_v47 = vld [vmem:[#allocation27 + $0xd38] ss:$28 sps:$4 sm:$0xff]  }
 0x7d9   :  { %6785 = vmatpush1.bf16.msra.mxu0 %v8702_v48  ;;  %v8767_v48 = vld [vmem:[#allocation27 + $0x630] ss:$28 sps:$4 sm:$0xff]  }
 0x7da   :  { %7946 = vmatpush3.bf16.msra.mxu1 %v8706_v46  ;;  %6795 = vmatprep.subr.bf16.mxu0 %v8709_v8  ;;  %v8771_v46 = vld [vmem:[#allocation27 + $0xb78] ss:$28 sps:$4 sm:$0xff]   ;;  %v8774_v8 = vld [vmem:[#allocation27 + $0x66c] ss:$28 sps:$4 sm:$0xff]  }
 0x7db   :  { %7953 = vmatprep.subr.bf16.mxu1 %v8710_v52  ;;  %v8775_v52 = vld [vmem:[#allocation27 + $0xd70] ss:$28 sps:$4 sm:$0xff]  }
 0x7dc   :  { %6787 = vmatmul.mubr.bf16.vlgmr.msra.gmra.mrb[16].mxu0 %v9919_v7  ;;  %v8721_v7 = vld [vmem:[#allocation27 + $0x788] ss:$28 sps:$4 sm:$0xff]  }
 0x7dd   :  { %6991 = vmatmul.mubr.bf16.vlgmr.msra.gmra.mrb[28].mxu1 %v9935_v49  ;;  %6796 = vmatpush1.bf16.msra.mxu0 %v8707_v55  ;;  %v8772_v55 = vld [vmem:[#allocation27 + $0x668] ss:$28 sps:$4 sm:$0xff]  }
 0x7de   :  { %6827 = vmatprep.mubr.bf16.mxu0 %v9925_v12  ;;  %7954 = vmatpush3.bf16.msra.mxu1 %v8711_v19  ;;  %v8726_v12 = vld [vmem:[#allocation27 + $0x7c0] ss:$28 sps:$4 sm:$0xff]   ;;  %v8776_v19 = vld [vmem:[#allocation27 + $0xbb0] ss:$28 sps:$4 sm:$0xff]  }
 0x7df   :  { %7030 = vmatprep.mubr.bf16.mxu1 %v9937_v1  ;;  %6797 = vmatprep.subr.bf16.mxu0 %v8714_v36  ;;  %v8779_v36 = vld [vmem:[#allocation27 + $0x6a4] ss:$28 sps:$4 sm:$0xff]  }
 0x7e0   :  { %7955 = vmatprep.subr.bf16.mxu1 %v8715_v5  ;;  %v8780_v5 = vld [vmem:[#allocation27 + $0xda8] ss:$28 sps:$4 sm:$0xff]  }
 0x7e1   :  { %6798 = vmatpush1.bf16.msra.mxu0 %v8712_v28  ;;  %v8777_v28 = vld [vmem:[#allocation27 + $0x6a0] ss:$28 sps:$4 sm:$0xff]  }
 0x7e2   :  { %7956 = vmatpush3.bf16.msra.mxu1 %v8716_v40  ;;  %6799 = vmatprep.subr.bf16.mxu0 %v8719_v31  ;;  %v8781_v40 = vld [vmem:[#allocation27 + $0xbe8] ss:$28 sps:$4 sm:$0xff]   ;;  %v8784_v31 = vld [vmem:[#allocation27 + $0x6dc] ss:$28 sps:$4 sm:$0xff]  }
 0x7e3   :  { %7957 = vmatprep.subr.bf16.mxu1 %v8720_v45  ;;  %v8785_v45 = vld [vmem:[#allocation27 + $0xde0] ss:$28 sps:$4 sm:$0xff]  }
 0x7e5   :  { %6800 = vmatpush1.bf16.msra.mxu0 %v8717_v53  ;;  %v8782_v53 = vld [vmem:[#allocation27 + $0x6d8] ss:$28 sps:$4 sm:$0xff]  }
 0x7e6   :  { %7958 = vmatpush3.bf16.msra.mxu1 %v8721_v7  ;;  %6801 = vmatprep.subr.bf16.mxu0 %v8724_v51  ;;  %v8786_v7 = vld [vmem:[#allocation27 + $0xc20] ss:$28 sps:$4 sm:$0xff]   ;;  %v8789_v51 = vld [vmem:[#allocation27 + $0x714] ss:$28 sps:$4 sm:$0xff]  }
 0x7e7   :  { %7959 = vmatprep.subr.bf16.mxu1 %v8725_v56  ;;  %v8787_v56 = vld [vmem:[#allocation27 + $0x710] ss:$28 sps:$4 sm:$0xff]  }
 0x7e9   :  { %6802 = vmatpush1.bf16.msra.mxu0 %v8722_v57  ;;  %v8792_v57 = vld [vmem:[#allocation27 + $0x74c] ss:$28 sps:$4 sm:$0xff]  }
 0x7ea   :  { %7960 = vmatpush3.bf16.msra.mxu1 %v8726_v12  ;;  %6803 = vmatprep.subr.bf16.mxu0 %v8729_v58  ;;  %v8790_v12 = vld [vmem:[#allocation27 + $0x748] ss:$28 sps:$4 sm:$0xff]  }
 0x7eb   :  { %7961 = vmatprep.subr.bf16.mxu1 %v8730_v59  ;;  %v8795_v58 = vld [vmem:[#allocation27 + $0x784] ss:$28 sps:$4 sm:$0xff]  }
 0x7ec   :  { %v8793_v59 = vld [vmem:[#allocation27 + $0x780] ss:$28 sps:$4 sm:$0xff]  }
 0x7ed   :  { %6804 = vmatpush1.bf16.msra.mxu0 %v8727_v60  ;;  %v8798_v60 = vld [vmem:[#allocation27 + $0x7bc] ss:$28 sps:$4 sm:$0xff]  }
 0x7ee   :  { %7962 = vmatpush3.bf16.msra.mxu1 %v8731_v27  ;;  %6805 = vmatprep.subr.bf16.mxu0 %v8734_v61  ;;  %v8796_v27 = vld [vmem:[#allocation27 + $0x7b8] ss:$28 sps:$4 sm:$0xff]  }
 0x7ef   :  { %7963 = vmatprep.subr.bf16.mxu1 %v8735_v62  ;;  %v8801_v61 = vld [vmem:[#allocation27 + $0x7f4] ss:$28 sps:$4 sm:$0xff]  }
 0x7f0   :  { %v8799_v62 = vld [vmem:[#allocation27 + $0x7f0] ss:$28 sps:$4 sm:$0xff]  }
 0x7f1   :  { %6806 = vmatpush1.bf16.msra.mxu0 %v8732_v50  ;;  %v8802_v50 = vld [vmem:[#allocation27 + $0x828] ss:$28 sps:$4 sm:$0xff]  }
 0x7f2   :  { %7964 = vmatpush3.bf16.msra.mxu1 %v8736_v63  ;;  %6807 = vmatprep.subr.bf16.mxu0 %v8739_v4  ;;  %v8807_v63 = vld [vmem:[#allocation27 + $0x864] ss:$28 sps:$4 sm:$0xff]   ;;  %v8810_v4 = vld [vmem:[#allocation27 + $0x89c] ss:$28 sps:$4 sm:$0xff]  }
 0x7f3   :  { %7965 = vmatprep.subr.bf16.mxu1 %v8740_v6  ;;  %v8808_v6 = vld [vmem:[#allocation27 + $0x898] ss:$28 sps:$4 sm:$0xff]  }
 0x7f5   :  { %6808 = vmatpush1.bf16.msra.mxu0 %v8737_v33  ;;  %v8813_v33 = vld [vmem:[#allocation27 + $0x8d4] ss:$28 sps:$4 sm:$0xff]  }
 0x7f6   :  { %7966 = vmatpush3.bf16.msra.mxu1 %v8741_v29  ;;  %6809 = vmatprep.subr.bf16.mxu0 %v8744_v2  ;;  %v8811_v29 = vld [vmem:[#allocation27 + $0x8d0] ss:$28 sps:$4 sm:$0xff]  }
 0x7f7   :  { %7967 = vmatprep.subr.bf16.mxu1 %v8745_v23  ;;  %v8816_v2 = vld [vmem:[#allocation27 + $0x90c] ss:$28 sps:$4 sm:$0xff]  }
 0x7f8   :  { %v8814_v23 = vld [vmem:[#allocation27 + $0x908] ss:$28 sps:$4 sm:$0xff]  }
 0x7f9   :  { %6810 = vmatpush1.bf16.msra.mxu0 %v8742_v20  ;;  %v8819_v20 = vld [vmem:[#allocation27 + $0x944] ss:$28 sps:$4 sm:$0xff]  }
 0x7fa   :  { %7968 = vmatpush3.bf16.msra.mxu1 %v8746_v22  ;;  %6811 = vmatprep.subr.bf16.mxu0 %v8749_v32  ;;  %v8817_v22 = vld [vmem:[#allocation27 + $0x940] ss:$28 sps:$4 sm:$0xff]  }
 0x7fb   :  { %7975 = vmatprep.subr.bf16.mxu1 %v8750_v38  ;;  %v8822_v32 = vld [vmem:[#allocation27 + $0x97c] ss:$28 sps:$4 sm:$0xff]  }
 0x7fc   :  { %v8820_v38 = vld [vmem:[#allocation27 + $0x978] ss:$28 sps:$4 sm:$0xff]  }
 0x7fd   :  { %7031 = vmatmul.mubr.bf16.vlgmr.msra.gmra.mrb[32].mxu1 %v9949_v0  ;;  %6812 = vmatpush1.bf16.msra.mxu0 %v8747_v39  ;;  %v8825_v39 = vld [vmem:[#allocation27 + $0x9b4] ss:$28 sps:$4 sm:$0xff]  }
 0x7fe   :  { %7976 = vmatpush3.bf16.msra.mxu1 %v8751_v9  ;;  %7070 = vmatprep.mubr.bf16.mxu1 %v9952_v30  ;;  %v8823_v9 = vld [vmem:[#allocation27 + $0x9b0] ss:$28 sps:$4 sm:$0xff]  }
 0x7ff   :  { %6813 = vmatprep.subr.bf16.mxu0 %v8754_v10  ;;  %7977 = vmatprep.subr.bf16.mxu1 %v8755_v11  ;;  %v8828_v10 = vld [vmem:[#allocation27 + $0x9ec] ss:$28 sps:$4 sm:$0xff]  }
 0x800   :  { %v8826_v11 = vld [vmem:[#allocation27 + $0x9e8] ss:$28 sps:$4 sm:$0xff]  }
 0x801   :  { %6814 = vmatpush1.bf16.msra.mxu0 %v8752_v16  ;;  %v8831_v16 = vld [vmem:[#allocation27 + $0xa24] ss:$28 sps:$4 sm:$0xff]  }
 0x802   :  { %7978 = vmatpush3.bf16.msra.mxu1 %v8756_v41  ;;  %6815 = vmatprep.subr.bf16.mxu0 %v8759_v17  ;;  %v8829_v41 = vld [vmem:[#allocation27 + $0xa20] ss:$28 sps:$4 sm:$0xff]  }
 0x803   :  { %7979 = vmatprep.subr.bf16.mxu1 %v8760_v21  ;;  %v8834_v17 = vld [vmem:[#allocation27 + $0xa5c] ss:$28 sps:$4 sm:$0xff]  }
 0x804   :  { %v8832_v21 = vld [vmem:[#allocation27 + $0xa58] ss:$28 sps:$4 sm:$0xff]  }
 0x805   :  { %6816 = vmatpush1.bf16.msra.mxu0 %v8757_v24  ;;  %v8837_v24 = vld [vmem:[#allocation27 + $0xa94] ss:$28 sps:$4 sm:$0xff]  }
 0x806   :  { %7980 = vmatpush3.bf16.msra.mxu1 %v8761_v35  ;;  %6817 = vmatprep.subr.bf16.mxu0 %v8764_v37  ;;  %v8835_v35 = vld [vmem:[#allocation27 + $0xa90] ss:$28 sps:$4 sm:$0xff]  }
 0x807   :  { %7981 = vmatprep.subr.bf16.mxu1 %v8765_v42  ;;  %v8840_v37 = vld [vmem:[#allocation27 + $0xacc] ss:$28 sps:$4 sm:$0xff]  }
 0x808   :  { %v8838_v42 = vld [vmem:[#allocation27 + $0xac8] ss:$28 sps:$4 sm:$0xff]  }
 0x809   :  { %6818 = vmatpush1.bf16.msra.mxu0 %v8762_v43  ;;  %v8843_v43 = vld [vmem:[#allocation27 + $0xb04] ss:$28 sps:$4 sm:$0xff]  }
 0x80a   :  { %7982 = vmatpush3.bf16.msra.mxu1 %v8766_v44  ;;  %6819 = vmatprep.subr.bf16.mxu0 %v8769_v3  ;;  %v8841_v44 = vld [vmem:[#allocation27 + $0xb00] ss:$28 sps:$4 sm:$0xff]  }
 0x80b   :  { %7983 = vmatprep.subr.bf16.mxu1 %v8770_v47  ;;  %v8846_v3 = vld [vmem:[#allocation27 + $0xb3c] ss:$28 sps:$4 sm:$0xff]  }
 0x80c   :  { %v8844_v47 = vld [vmem:[#allocation27 + $0xb38] ss:$28 sps:$4 sm:$0xff]  }
 0x80d   :  { %6820 = vmatpush1.bf16.msra.mxu0 %v8767_v48  ;;  %v8849_v48 = vld [vmem:[#allocation27 + $0xb74] ss:$28 sps:$4 sm:$0xff]  }
 0x80e   :  { %7984 = vmatpush3.bf16.msra.mxu1 %v8771_v46  ;;  %6821 = vmatprep.subr.bf16.mxu0 %v8774_v8  ;;  %v8847_v46 = vld [vmem:[#allocation27 + $0xb70] ss:$28 sps:$4 sm:$0xff]   ;;  %v9979_v8 = vld [vmem:[#allocation28] sm:$0xff] }
 0x80f   :  { %7985 = vmatprep.subr.bf16.mxu1 %v8775_v52  ;;  %v4098_v52 = vrot.slane %v9979_v8, %v9749_v14 }
 0x811   :  { %6822 = vmatpush1.bf16.msra.mxu0 %v8772_v55  ;;  %v4094_v55 = vrot.slane %v9979_v8, %v9701_v34 }
 0x812   :  { %7986 = vmatpush3.bf16.msra.mxu1 %v8776_v19  ;;  %6823 = vmatprep.subr.bf16.mxu0 %v8779_v36  ;;  %v8850_v19 = vld [vmem:[#allocation27 + $0xba8] ss:$28 sps:$4 sm:$0xff]   ;;  %v4102_v36 = vrot.slane %v9979_v8, %v9752_v15 }
 0x813   :  { %7987 = vmatprep.subr.bf16.mxu1 %v8780_v5  ;;  %v8855_v5 = vld [vmem:[#allocation27 + $0xbe4] ss:$28 sps:$4 sm:$0xff]  }
 0x815   :  { %6824 = vmatpush1.bf16.msra.mxu0 %v8777_v28 }
 0x816   :  { %7988 = vmatpush3.bf16.msra.mxu1 %v8781_v40  ;;  %6825 = vmatprep.subr.bf16.mxu0 %v8784_v31 }
 0x817   :  { %7989 = vmatprep.subr.bf16.mxu1 %v8785_v45 }
 0x819   :  { %6826 = vmatpush1.bf16.msra.mxu0 %v8782_v53 }
 0x81a   :  { %7990 = vmatpush3.bf16.msra.mxu1 %v8786_v7  ;;  %6836 = vmatprep.subr.bf16.mxu0 %v8789_v51 }
 0x81c   :  { %6828 = vmatmul.mubr.bf16.vlgmr.msra.gmra.mrb[16].mxu0 %v9935_v49  ;;  %v8804_v49 = vld [vmem:[#allocation27 + $0x82c] ss:$28 sps:$4 sm:$0xff]  }
 0x81d   :  { %7071 = vmatmul.mubr.bf16.vlgmr.msra.gmra.mrb[36].mxu1 %v9960_v18  ;;  %6837 = vmatpush1.bf16.msra.mxu0 %v8787_v56  ;;  %v8853_v56 = vld [vmem:[#allocation27 + $0xbe0] ss:$28 sps:$4 sm:$0xff]  }
 0x81e   :  { %6868 = vmatprep.mubr.bf16.mxu0 %v9937_v1  ;;  %6838 = vmatprep.subr.bf16.mxu0 %v8792_v57  ;;  %v8805_v1 = vld [vmem:[#allocation27 + $0x860] ss:$28 sps:$4 sm:$0xff]  }
 0x821   :  { %6839 = vmatpush1.bf16.msra.mxu0 %v8790_v12  ;;  %v8858_v12 = vld [vmem:[#allocation27 + $0xc1c] ss:$28 sps:$4 sm:$0xff]  }
 0x822   :  { %6840 = vmatprep.subr.bf16.mxu0 %v8795_v58  ;;  %v8856_v58 = vld [vmem:[#allocation27 + $0xc18] ss:$28 sps:$4 sm:$0xff]  }
 0x825   :  { %6841 = vmatpush1.bf16.msra.mxu0 %v8793_v59  ;;  %v8861_v59 = vld [vmem:[#allocation27 + $0xc54] ss:$28 sps:$4 sm:$0xff]  }
 0x826   :  { %6842 = vmatprep.subr.bf16.mxu0 %v8798_v60  ;;  %v8859_v60 = vld [vmem:[#allocation27 + $0xc50] ss:$28 sps:$4 sm:$0xff]  }
 0x829   :  { %6843 = vmatpush1.bf16.msra.mxu0 %v8796_v27  ;;  %v8864_v27 = vld [vmem:[#allocation27 + $0xc8c] ss:$28 sps:$4 sm:$0xff]  }
 0x82a   :  { %6844 = vmatprep.subr.bf16.mxu0 %v8801_v61 }
 0x82d   :  { %6845 = vmatpush1.bf16.msra.mxu0 %v8799_v62 }
 0x82e   :  { %6846 = vmatprep.subr.bf16.mxu0 %v8804_v49  ;;  %v8862_v49 = vld [vmem:[#allocation27 + $0xc88] ss:$28 sps:$4 sm:$0xff]  }
 0x831   :  { %6847 = vmatpush1.bf16.msra.mxu0 %v8802_v50 }
 0x832   :  { %6848 = vmatprep.subr.bf16.mxu0 %v8807_v63  ;;  %v8867_v63 = vld [vmem:[#allocation27 + $0xcc4] ss:$28 sps:$4 sm:$0xff]  }
 0x835   :  { %6849 = vmatpush1.bf16.msra.mxu0 %v8805_v1 }
 0x836   :  { %6850 = vmatprep.subr.bf16.mxu0 %v8810_v4  ;;  %v8865_v4 = vld [vmem:[#allocation27 + $0xcc0] ss:$28 sps:$4 sm:$0xff]  }
 0x839   :  { %6851 = vmatpush1.bf16.msra.mxu0 %v8808_v6  ;;  %v8870_v6 = vld [vmem:[#allocation27 + $0xcfc] ss:$28 sps:$4 sm:$0xff]  }
 0x83a   :  { %6852 = vmatprep.subr.bf16.mxu0 %v8813_v33  ;;  %v8868_v33 = vld [vmem:[#allocation27 + $0xcf8] ss:$28 sps:$4 sm:$0xff]  }
 0x83d   :  { %6853 = vmatpush1.bf16.msra.mxu0 %v8811_v29  ;;  %v8873_v29 = vld [vmem:[#allocation27 + $0xd34] ss:$28 sps:$4 sm:$0xff]  }
 0x83e   :  { %6854 = vmatprep.subr.bf16.mxu0 %v8816_v2  ;;  %v8871_v2 = vld [vmem:[#allocation27 + $0xd30] ss:$28 sps:$4 sm:$0xff]  }
 0x841   :  { %6855 = vmatpush1.bf16.msra.mxu0 %v8814_v23  ;;  %v8876_v23 = vld [vmem:[#allocation27 + $0xd6c] ss:$28 sps:$4 sm:$0xff]  }
 0x842   :  { %6856 = vmatprep.subr.bf16.mxu0 %v8819_v20  ;;  %v8874_v20 = vld [vmem:[#allocation27 + $0xd68] ss:$28 sps:$4 sm:$0xff]  }
 0x845   :  { %6857 = vmatpush1.bf16.msra.mxu0 %v8817_v22  ;;  %v8879_v22 = vld [vmem:[#allocation27 + $0xda4] ss:$28 sps:$4 sm:$0xff]  }
 0x846   :  { %6858 = vmatprep.subr.bf16.mxu0 %v8822_v32 }
 0x849   :  { %6859 = vmatpush1.bf16.msra.mxu0 %v8820_v38 }
 0x84a   :  { %6860 = vmatprep.subr.bf16.mxu0 %v8825_v39  ;;  %v8877_v39 = vld [vmem:[#allocation27 + $0xda0] ss:$28 sps:$4 sm:$0xff]  }
 0x84d   :  { %6861 = vmatpush1.bf16.msra.mxu0 %v8823_v9 }
 0x84e   :  { %6862 = vmatprep.subr.bf16.mxu0 %v8828_v10 }
 0x851   :  { %6863 = vmatpush1.bf16.msra.mxu0 %v8826_v11  ;;  %v8882_v11 = vld [vmem:[#allocation27 + $0xddc] ss:$28 sps:$4 sm:$0xff]  }
 0x852   :  { %6864 = vmatprep.subr.bf16.mxu0 %v8831_v16 }
 0x855   :  { %6865 = vmatpush1.bf16.msra.mxu0 %v8829_v41  ;;  %v8880_v41 = vld [vmem:[#allocation27 + $0xdd8] ss:$28 sps:$4 sm:$0xff]  }
 0x856   :  { %6866 = vmatprep.subr.bf16.mxu0 %v8834_v17  ;;  %v4114_v17 = vrot.slane %v9979_v8, %v9844_v25 }
 0x859   :  { %6867 = vmatpush1.bf16.msra.mxu0 %v8832_v21 }
 0x85a   :  { %6877 = vmatprep.subr.bf16.mxu0 %v8837_v24 }
 0x85c   :  { %6869 = vmatmul.mubr.bf16.vlgmr.msra.gmra.mrb[16].mxu0 %v9949_v0  ;;  %v8852_v0 = vld [vmem:[#allocation27 + $0xbac] ss:$28 sps:$4 sm:$0xff]  }
 0x85d   :  { %6878 = vmatpush1.bf16.msra.mxu0 %v8835_v35  ;;  %6909 = vmatprep.mubr.bf16.mxu0 %v9952_v30  ;;  %v4090_v30 = vrot.slane %v9979_v8, %v9697_v54 }
 0x85e   :  { %6879 = vmatprep.subr.bf16.mxu0 %v8840_v37 }
 0x861   :  { %6880 = vmatpush1.bf16.msra.mxu0 %v8838_v42 }
 0x862   :  { %6881 = vmatprep.subr.bf16.mxu0 %v8843_v43 }
 0x865   :  { %6882 = vmatpush1.bf16.msra.mxu0 %v8841_v44 }
 0x866   :  { %6883 = vmatprep.subr.bf16.mxu0 %v8846_v3 }
 0x869   :  { %6884 = vmatpush1.bf16.msra.mxu0 %v8844_v47 }
 0x86a   :  { %6885 = vmatprep.subr.bf16.mxu0 %v8849_v48 }
 0x86d   :  { %6886 = vmatpush1.bf16.msra.mxu0 %v8847_v46 }
 0x86e   :  { %6887 = vmatprep.subr.bf16.mxu0 %v8852_v0 }
 0x86f   :  { %v6583_v28 = vpop.f32.mrb[12].mxu0 }
 0x870   :  { %v8025_v40 = vadd.f32 %v6583_v28, %v4090_v30  ;;  %v6747_v31 = vpop.f32.mrb[20].mxu1  ;;  %v6585_v45 = vpop.f32.mrb[13].mxu0  ;;  %v4106_v28 = vrot.slane %v9979_v8, %v9841_v13 }
 0x871   :  { %v8027_v53 = vadd.f32 %v6747_v31, %v4098_v52  ;;  %v8026_v7 = vadd.f32 %v6585_v45, %v4094_v55  ;;  %v6749_v54 = vpop.f32.mrb[21].mxu1  ;;  %v6587_v51 = vpop.f32.mrb[14].mxu0  ;;  %6888 = vmatpush1.bf16.msra.mxu0 %v8850_v19 }
 0x872   :  { %8913 = vtanh.f32 %v8025_v40  ;;  %v8028_v14 = vadd.f32 %v6749_v54, %v4102_v36  ;;  %v6751_v57 = vpop.f32.mrb[22].mxu1  ;;  %v6588_v34 = vpop.f32.mrb[15].mxu0  ;;  %6889 = vmatprep.subr.bf16.mxu0 %v8855_v5  ;;  %v4110_v40 = vrot.slane %v9979_v8, %v9847_v26 }
 0x873   :  { %8915 = vtanh.f32 %v8027_v53  ;;  %v6752_v15 = vpop.f32.mrb[23].mxu1 }
 0x874   :  { %8917 = vtanh.f32 %v8026_v7 }
 0x875   :  { %8919 = vtanh.f32 %v8028_v14  ;;  %6890 = vmatpush1.bf16.msra.mxu0 %v8853_v56 }
 0x876   :  { %6891 = vmatprep.subr.bf16.mxu0 %v8858_v12 }
 0x879   :  { %6892 = vmatpush1.bf16.msra.mxu0 %v8856_v58 }
 0x87a   :  { %6893 = vmatprep.subr.bf16.mxu0 %v8861_v59 }
 0x87c   :  { %v8914_v61 = vpop.eup %8913 }
 0x87d   :  { %v8916_v62 = vpop.eup %8915  ;;  %7085 = vst [vmem:[%s10036_s19] sm:$0xff] %v8914_v61  ;;  %6894 = vmatpush1.bf16.msra.mxu0 %v8859_v60 }
 0x87e   :  { %v8918_v50 = vpop.eup %8917  ;;  %7087 = vst [vmem:[%s10036_s19 + $0x10] sm:$0xff] %v8916_v62  ;;  %6895 = vmatprep.subr.bf16.mxu0 %v8864_v27 }
 0x87f   :  { %v8920_v1 = vpop.eup %8919  ;;  %7086 = vst [vmem:[%s10036_s19 + $0x8] sm:$0xff] %v8918_v50 }
 0x880   :  { %7088 = vst [vmem:[%s10036_s19 + $0x18] sm:$0xff] %v8920_v1 }
 0x881   :  { %6896 = vmatpush1.bf16.msra.mxu0 %v8862_v49 }
 0x882   :  { %6897 = vmatprep.subr.bf16.mxu0 %v8867_v63 }
 0x885   :  { %6898 = vmatpush1.bf16.msra.mxu0 %v8865_v4 }
 0x886   :  { %6899 = vmatprep.subr.bf16.mxu0 %v8870_v6 }
 0x889   :  { %6900 = vmatpush1.bf16.msra.mxu0 %v8868_v33 }
 0x88a   :  { %6901 = vmatprep.subr.bf16.mxu0 %v8873_v29 }
 0x88d   :  { %6902 = vmatpush1.bf16.msra.mxu0 %v8871_v2 }
 0x88e   :  { %6903 = vmatprep.subr.bf16.mxu0 %v8876_v23 }
 0x890   :  { %v7925_v32 = vpop.f32.mrb[24].mxu1 }
 0x891   :  { %v7926_v38 = vpop.f32.mrb[25].mxu1  ;;  %6904 = vmatpush1.bf16.msra.mxu0 %v8874_v20 }
 0x892   :  { %v7927_v9 = vadd.f32 %v7926_v38, %v7925_v32  ;;  %v7928_v10 = vpop.f32.mrb[26].mxu1  ;;  %6905 = vmatprep.subr.bf16.mxu0 %v8879_v22 }
 0x893   :  { %v7929_v16 = vpop.f32.mrb[27].mxu1 }
 0x894   :  { %v6953_v35 = vadd.f32 %v7927_v9, %v4114_v17 }
 0x895   :  { %6906 = vmatpush1.bf16.msra.mxu0 %v8877_v39 }
 0x896   :  { %6907 = vmatprep.subr.bf16.mxu0 %v8882_v11 }
 0x899   :  { %6908 = vmatpush1.bf16.msra.mxu0 %v8880_v41 }
 0x89c   :  { %6910 = vmatmul.mubr.bf16.vlgmr.msra.gmra.mrb[16].mxu0 %v9960_v18 }
 0x8b0   :  { %v7947_v21 = vpop.f32.mrb[28].mxu1 }
 0x8b1   :  { %v7948_v24 = vpop.f32.mrb[29].mxu1 }
 0x8b2   :  { %v7949_v37 = vadd.f32 %v7948_v24, %v7947_v21  ;;  %v7950_v42 = vpop.f32.mrb[30].mxu1 }
 0x8b3   :  { %v7951_v43 = vpop.f32.mrb[31].mxu1 }
 0x8b4   :  { %v6993_v44 = vadd.f32 %v7949_v37, %v6953_v35 }
 0x8d0   :  { %v7969_v3 = vpop.f32.mrb[32].mxu1 }
 0x8d1   :  { %v7970_v47 = vpop.f32.mrb[33].mxu1 }
 0x8d2   :  { %v7971_v48 = vadd.f32 %v7970_v47, %v7969_v3  ;;  %v7972_v46 = vpop.f32.mrb[34].mxu1 }
 0x8d3   :  { %v7973_v0 = vpop.f32.mrb[35].mxu1 }
 0x8d4   :  { %v7033_v30 = vadd.f32 %v7971_v48, %v6993_v44 }
 0x8f0   :  { %v7991_v52 = vpop.f32.mrb[36].mxu1 }
 0x8f1   :  { %v7992_v55 = vpop.f32.mrb[37].mxu1 }
 0x8f2   :  { %v7993_v19 = vadd.f32 %v7992_v55, %v7991_v52  ;;  %v7994_v18 = vpop.f32.mrb[38].mxu1 }
 0x8f3   :  { %v7995_v36 = vpop.f32.mrb[39].mxu1 }
 0x8f4   :  { %v7073_v5 = vadd.f32 %v7993_v19, %v7033_v30 }
 0x8f6   :  { %8921 = vtanh.f32 %v7073_v5 }
 0x900   :  { %v8922_v25 = vpop.eup %8921 }
 0x901   :  { %7091 = vst [vmem:[%s10036_s19 + $0x30] sm:$0xff] %v8922_v25 }
 0x96f   :  { %v6911_v31 = vpop.f32.mrb[16].mxu0 }
 0x970   :  { %v8029_v45 = vadd.f32 %v6911_v31, %v4106_v28  ;;  %v6913_v53 = vpop.f32.mrb[17].mxu0 }
 0x971   :  { %v8030_v7 = vadd.f32 %v6913_v53, %v4110_v40  ;;  %v6915_v54 = vpop.f32.mrb[18].mxu0 }
 0x972   :  { %8923 = vtanh.f32 %v8029_v45  ;;  %v6916_v51 = vpop.f32.mrb[19].mxu0 }
 0x973   :  { %8925 = vtanh.f32 %v8030_v7 }
 0x97c   :  { %v8924_v56 = vpop.eup %8923 }
 0x97d   :  { %v8926_v14 = vpop.eup %8925  ;;  %7089 = vst [vmem:[%s10036_s19 + $0x20] sm:$0xff] %v8924_v56 }
 0x97e   :  { %7090 = vst [vmem:[%s10036_s19 + $0x28] sm:$0xff] %v8926_v14 }
 0x97f   :  { %7096 = vsyncpa [#allocation3], 1 }
 0x980   :  { %7097 = vsyncpa [#allocation5], 1 }
 0x981   :  { %7098 = vsyncpa [#allocation8], 1 }
 0x982   :  { %7099 = vsyncpa [#allocation11], 1 }
 0x983   :  { %7100 = vsyncpa [#allocation14], 1 }
 0x984   :  { %7101 = vsyncpa [#allocation17], 1 }
 0x985   :  { %7102 = vsyncpa [#allocation20], 1 }
 0x986   :  { %7103 = vsyncpa [#allocation23], 1 }
 0x987   :  { %7104 = vsyncpa [#allocation26], 1 }
 0x988   :  { %7105 = vsyncpa [#allocation29], 1 }

</bundles_post_ra>
